<compile_context>
chip_gen: v5e
topology: v5e:2x2
jax: 0.10.0
libtpu: 0.0.40
codegen_flags: <defaults>
</compile_context>

<pallas_src>
import jax
import jax.numpy as jnp
from jax.experimental import pallas as pl
from jax.experimental.pallas import tpu as pltpu


def _make_bilstm_kernel(num_layers, seq_len, batch, hidden_size, gate_block):
    L, T, B, H, GB = num_layers, seq_len, batch, hidden_size, gate_block
    n_seq = min(2, L - 1)   # ping-pong layer-output buffers actually needed

    def kernel(*refs):
        # ---- unpack refs: inputs, outputs, scratch (order fixed by pallas_call) ----
        idx = 0
        x_ref = refs[idx]; idx += 1                       # (T*B, I)
        layer_w = []
        for _l in range(L):
            layer_w.append(refs[idx:idx + 3])             # wih, whh, bias (both dirs fused)
            idx += 3
        wfc_ref = refs[idx]; idx += 1                     # (GB, C)  (rows >= 2H are zero)
        bfc_ref = refs[idx]; idx += 1                     # (1, C)
        out_ref = refs[idx]; idx += 1                     # (B, C)
        gin = refs[idx]; idx += 1                         # (T*B, 4*GB) scratch
        seq_bufs = refs[idx:idx + n_seq]; idx += n_seq    # n_seq x (T*B, 2H) scratch

        # Lane masks, built ONCE and hoisted out of all loops (no per-iter broadcasts).
        lane4 = jax.lax.broadcasted_iota(jnp.int32, (B, 4 * GB), 1)
        fwd_gate_mask = (lane4 % GB) < H                  # fwd lanes inside each gate block
        lane1 = jax.lax.broadcasted_iota(jnp.int32, (B, GB), 1)
        fwd_state_mask = lane1 < H                        # fwd lanes of the stacked h state

        feat = None
        for l in range(L):
            wih_ref, whh_ref, b_ref = layer_w[l]
            inp = x_ref[...] if l == 0 else seq_bufs[(l - 1) % 2][...]

            # Hoisted input projection: ALL timesteps x BOTH directions in one
            # MXU matmul (fwd / bwd weights live in disjoint lanes), bias folded in.
            gin[...] = (jnp.dot(inp, wih_ref[...],
                                preferred_element_type=jnp.float32)
                        + b_ref[...])

            whh = whh_ref[...]                            # (GB, 4*GB): both dirs fused
            last_layer = (l == L - 1)
            cur = None if last_layer else seq_bufs[l % 2]

            # Stacked state: lanes [0:H] = fwd, [H:2H] = bwd, [2H:GB] = zero pad
            # (pad lanes provably stay exactly 0 through the recurrence).
            h = jnp.zeros((B, GB), jnp.float32)
            c = jnp.zeros((B, GB), jnp.float32)
            h_first = None

            for s in range(T):                            # fully unrolled (T is small)
                tf = s              # timestep processed by the forward direction
                tb = T - 1 - s      # timestep processed by the backward direction
                # fwd lanes <- gin[tf], bwd lanes <- gin[tb]: one vselect per step.
                gates_in = jnp.where(fwd_gate_mask,
                                     gin[tf * B:(tf + 1) * B, :],
                                     gin[tb * B:(tb + 1) * B, :])
                gates = gates_in + jnp.dot(h, whh,
                                           preferred_element_type=jnp.float32)
                # Gate slices are 128-lane aligned (vreg granular). PyTorch order i,f,g,o.
                i_g = jax.nn.sigmoid(gates[:, 0 * GB:1 * GB])
                f_g = jax.nn.sigmoid(gates[:, 1 * GB:2 * GB])
                g_g = jnp.tanh(gates[:, 2 * GB:3 * GB])
                o_g = jax.nn.sigmoid(gates[:, 3 * GB:4 * GB])
                c = f_g * c + i_g * g_g
                h = o_g * jnp.tanh(c)

                if last_layer:
                    if s == 0:
                        h_first = h      # holds bwd h(T-1) in lanes [H:2H]
                else:
                    # Write outputs already in PyTorch's [fwd | bwd] concat layout.
                    cur[tf * B:(tf + 1) * B, 0:H] = h[:, 0:H]           # fwd h(tf)
                    cur[tb * B:(tb + 1) * B, H:2 * H] = h[:, H:2 * H]   # bwd h(tb)

            if last_layer:
                # out[:, -1, :] = [fwd_h(T-1) | bwd_h(T-1)], assembled straight from
                # the live states with a lane select (no sequence write-back).
                feat = jnp.where(fwd_state_mask, h, h_first)            # (B, GB)

        out_ref[...] = (jnp.dot(feat, wfc_ref[...],
                                preferred_element_type=jnp.float32)
                        + bfc_ref[...])

    return kernel


def _pack_layer(params_fwd, params_bwd, hidden_size, gate_block):
    """Fuse one layer's two directions of PyTorch LSTM weights into the padded,
    128-lane-aligned gate layout used by the kernel.

    Gate k (PyTorch order i,f,g,o) of direction d occupies wide columns
    [k*GB + d*H, k*GB + (d+1)*H); the recurrent weight reads the stacked
    h-state rows [d*H, (d+1)*H).  Fwd / bwd occupy disjoint rows & columns, so
    their packed weights simply sum into one fused tensor per kind."""
    H, GB = hidden_size, gate_block

    def pack_dir(w_ih, w_hh, b_ih, b_hh, off):
        w_ih = jnp.asarray(w_ih, jnp.float32)
        w_hh = jnp.asarray(w_hh, jnp.float32)
        bias = jnp.asarray(b_ih, jnp.float32) + jnp.asarray(b_hh, jnp.float32)
        in_dim = w_ih.shape[1]
        wih_wide = jnp.zeros((in_dim, 4 * GB), jnp.float32)
        whh_wide = jnp.zeros((GB, 4 * GB), jnp.float32)
        b_wide = jnp.zeros((1, 4 * GB), jnp.float32)
        for k in range(4):
            col = k * GB + off
            wih_wide = wih_wide.at[:, col:col + H].set(w_ih[k * H:(k + 1) * H, :].T)
            whh_wide = whh_wide.at[off:off + H, col:col + H].set(
                w_hh[k * H:(k + 1) * H, :].T)
            b_wide = b_wide.at[0, col:col + H].set(bias[k * H:(k + 1) * H])
        return wih_wide, whh_wide, b_wide

    wf, hf, bf = pack_dir(*params_fwd, 0)
    wb, hb, bb = pack_dir(*params_bwd, H)
    return wf + wb, hf + hb, bf + bb


def bilstm_forward(x, lstm_params, fc_w, fc_b, *, hidden_size, num_layers, num_classes):
    """x: (B, T, input_size) float32 (batch_first, like the PyTorch module).
    lstm_params[layer][dir] = (w_ih, w_hh, b_ih, b_hh) with PyTorch shapes.
    fc_w: (num_classes, 2H), fc_b: (num_classes,)."""
    B, T, _I = x.shape
    H, L, C = hidden_size, num_layers, num_classes
    # One 128-lane-aligned gate block holds both directions' H units (+ zero pad).
    GB = ((2 * H + 127) // 128) * 128

    x_flat = jnp.transpose(x, (1, 0, 2)).astype(jnp.float32).reshape(T * B, -1)

    inputs = [x_flat]
    for layer in range(L):
        wih, whh, b = _pack_layer(lstm_params[layer][0], lstm_params[layer][1], H, GB)
        inputs += [wih, whh, b]
    # FC weight padded to GB rows (the feat state's pad lanes are exactly zero).
    wfc = jnp.zeros((GB, C), jnp.float32).at[0:2 * H, :].set(
        jnp.asarray(fc_w, jnp.float32).T)
    inputs += [wfc, jnp.asarray(fc_b, jnp.float32)[None, :]]

    kernel = _make_bilstm_kernel(L, T, B, H, GB)
    vmem = pltpu.MemorySpace.VMEM
    n_seq = min(2, L - 1)

    scratch_shapes = [pltpu.VMEM((T * B, 4 * GB), jnp.float32)]          # fused gate inputs
    scratch_shapes += [pltpu.VMEM((T * B, 2 * H), jnp.float32)] * n_seq  # layer outputs (ping/pong)

    out = pl.pallas_call(
        kernel,
        out_shape=jax.ShapeDtypeStruct((B, C), jnp.float32),
        in_specs=[pl.BlockSpec(memory_space=vmem)] * len(inputs),
        out_specs=pl.BlockSpec(memory_space=vmem),
        scratch_shapes=scratch_shapes,
        compiler_params=pltpu.CompilerParams(vmem_limit_bytes=32 * 1024 * 1024),
    )(*inputs)
    return out


def _ref_bilstm(x, lstm_params, fc_w, fc_b, *, hidden_size, num_layers):
    """Pure-JAX reference matching torch.nn.LSTM(bidirectional) semantics."""
    B, T, _ = x.shape
    H = hidden_size
    seq = x.astype(jnp.float32)
    for layer in range(num_layers):
        outs = []
        for d in range(2):
            w_ih, w_hh, b_ih, b_hh = lstm_params[layer][d]
            h = jnp.zeros((B, H), jnp.float32)
            c = jnp.zeros((B, H), jnp.float32)
            hs = [None] * T
            t_order = range(T) if d == 0 else range(T - 1, -1, -1)
            for t in t_order:
                gates = seq[:, t, :] @ w_ih.T + h @ w_hh.T + b_ih + b_hh
                i_g = jax.nn.sigmoid(gates[:, 0:H])
                f_g = jax.nn.sigmoid(gates[:, H:2 * H])
                g_g = jnp.tanh(gates[:, 2 * H:3 * H])
                o_g = jax.nn.sigmoid(gates[:, 3 * H:4 * H])
                c = f_g * c + i_g * g_g
                h = o_g * jnp.tanh(c)
                hs[t] = h
            outs.append(jnp.stack(hs, axis=1))
        seq = jnp.concatenate(outs, axis=-1)
    return seq[:, -1, :] @ fc_w.T + fc_b


if __name__ == "__main__":
    # Small shapes consistent with the module (batch chosen sublane-aligned).
    B, T = 8, 8
    INPUT_SIZE, HIDDEN, LAYERS, CLASSES = 16, 32, 2, 8

    key = jax.random.PRNGKey(0)

    def uni(k, shape, bound):
        return jax.random.uniform(k, shape, jnp.float32, -bound, bound)

    # Deterministic parameter init (PyTorch-style U(-1/sqrt(H), 1/sqrt(H))).
    bound = 1.0 / (HIDDEN ** 0.5)
    lstm_params = []
    for layer in range(LAYERS):
        in_dim = INPUT_SIZE if layer == 0 else 2 * HIDDEN
        dirs = []
        for _d in range(2):
            key, k1, k2, k3, k4 = jax.random.split(key, 5)
            dirs.append((
                uni(k1, (4 * HIDDEN, in_dim), bound),
                uni(k2, (4 * HIDDEN, HIDDEN), bound),
                uni(k3, (4 * HIDDEN,), bound),
                uni(k4, (4 * HIDDEN,), bound),
            ))
        lstm_params.append(dirs)
    fc_bound = 1.0 / ((2 * HIDDEN) ** 0.5)
    key, kfw, kfb, kx = jax.random.split(key, 4)
    fc_w = uni(kfw, (CLASSES, 2 * HIDDEN), fc_bound)
    fc_b = uni(kfb, (CLASSES,), fc_bound)

    x = jax.random.normal(kx, (B, T, INPUT_SIZE), jnp.float32)

    out = bilstm_forward(x, lstm_params, fc_w, fc_b,
                         hidden_size=HIDDEN, num_layers=LAYERS, num_classes=CLASSES)
    out = jax.block_until_ready(out)

    ref = _ref_bilstm(x, lstm_params, fc_w, fc_b,
                      hidden_size=HIDDEN, num_layers=LAYERS)
    assert out.shape == (B, CLASSES)
    assert jnp.allclose(out, ref, atol=5e-4, rtol=5e-4), (
        f"mismatch: max abs err {jnp.max(jnp.abs(out - ref))}")

    print("KERNEL_OK")
</pallas_src>

<mosaic_0001>
module attributes {stable_mosaic.version = 11 : i64} {
  func.func @kernel(%arg0: memref<64x16xf32, #tpu.memory_space<vmem>>, %arg1: memref<16x512xf32, #tpu.memory_space<vmem>>, %arg2: memref<128x512xf32, #tpu.memory_space<vmem>>, %arg3: memref<1x512xf32, #tpu.memory_space<vmem>>, %arg4: memref<64x512xf32, #tpu.memory_space<vmem>>, %arg5: memref<128x512xf32, #tpu.memory_space<vmem>>, %arg6: memref<1x512xf32, #tpu.memory_space<vmem>>, %arg7: memref<128x8xf32, #tpu.memory_space<vmem>>, %arg8: memref<1x8xf32, #tpu.memory_space<vmem>>, %arg9: memref<8x8xf32, #tpu.memory_space<vmem>>, %arg10: memref<64x512xf32, #tpu.memory_space<vmem>>, %arg11: memref<64x64xf32, #tpu.memory_space<vmem>>) attributes {dimension_semantics = [], scalar_prefetch = 0 : i64, scratch_operands = 2 : i64, tpu.core_type = #tpu.core_type<tc>} {
    %0 = tpu.iota {dimensions = array<i32: 1>} : vector<8x512xi32>
    %c128_i32 = arith.constant 128 : i32
    %c0_i32 = arith.constant 0 : i32
    %1 = arith.cmpi eq, %c128_i32, %c0_i32 : i32
    %c1_i32 = arith.constant 1 : i32
    %2 = arith.select %1, %c1_i32, %c128_i32 : i32
    %3 = vector.broadcast %2 : i32 to vector<8x512xi32>
    %4 = arith.remsi %0, %3 : vector<8x512xi32>
    %c0_i32_0 = arith.constant 0 : i32
    %5 = vector.broadcast %c0_i32_0 : i32 to vector<8x512xi32>
    %6 = arith.cmpi ne, %4, %5 : vector<8x512xi32>
    %c0_i32_1 = arith.constant 0 : i32
    %7 = vector.broadcast %c0_i32_1 : i32 to vector<8x512xi32>
    %8 = arith.cmpi slt, %4, %7 : vector<8x512xi32>
    %c0_i32_2 = arith.constant 0 : i32
    %9 = arith.cmpi slt, %2, %c0_i32_2 : i32
    %10 = vector.broadcast %9 : i1 to vector<8x512xi1>
    %11 = vector.broadcast %10 : vector<8x512xi1> to vector<8x512xi1>
    %12 = arith.xori %8, %11 : vector<8x512xi1>
    %13 = arith.andi %12, %6 : vector<8x512xi1>
    %14 = vector.broadcast %2 : i32 to vector<8x512xi32>
    %15 = arith.addi %4, %14 : vector<8x512xi32>
    %16 = arith.select %13, %15, %4 : vector<8x512xi1>, vector<8x512xi32>
    %c32_i32 = arith.constant 32 : i32
    %17 = vector.broadcast %c32_i32 : i32 to vector<8x512xi32>
    %18 = arith.cmpi slt, %16, %17 : vector<8x512xi32>
    %19 = tpu.iota {dimensions = array<i32: 1>} : vector<8x128xi32>
    %c32_i32_3 = arith.constant 32 : i32
    %20 = vector.broadcast %c32_i32_3 : i32 to vector<8x128xi32>
    %21 = arith.cmpi slt, %19, %20 : vector<8x128xi32>
    %c0 = arith.constant 0 : index
    %c0_4 = arith.constant 0 : index
    %22 = vector.load %arg0[%c0, %c0_4] : memref<64x16xf32, #tpu.memory_space<vmem>>, vector<64x16xf32>
    %c0_5 = arith.constant 0 : index
    %c0_6 = arith.constant 0 : index
    %23 = vector.load %arg1[%c0_5, %c0_6] : memref<16x512xf32, #tpu.memory_space<vmem>>, vector<16x512xf32>
    %cst = arith.constant dense<0.000000e+00> : vector<64x512xf32>
    %24 = tpu.matmul %22, %23, %cst {dimension_numbers = #tpu.dot_dimension_numbers<[1], [0], [0], [1], [0, 0, 1, 1], [], []>} : vector<64x16xf32>, vector<16x512xf32>, vector<64x512xf32> -> vector<64x512xf32>
    %c0_7 = arith.constant 0 : index
    %c0_8 = arith.constant 0 : index
    %25 = vector.load %arg3[%c0_7, %c0_8] : memref<1x512xf32, #tpu.memory_space<vmem>>, vector<1x512xf32>
    %26 = vector.broadcast %25 : vector<1x512xf32> to vector<64x512xf32>
    %27 = arith.addf %24, %26 : vector<64x512xf32>
    %c0_9 = arith.constant 0 : index
    %c0_10 = arith.constant 0 : index
    %28 = vector.load %arg10[%c0_9, %c0_10] : memref<64x512xf32, #tpu.memory_space<vmem>>, vector<64x512xf32>
    tpu.vector_store %arg10[%c0_9, %c0_10], %27 {strides = array<i32>} : memref<64x512xf32, #tpu.memory_space<vmem>>, vector<64x512xf32>,
    %c0_11 = arith.constant 0 : index
    %c0_12 = arith.constant 0 : index
    %29 = vector.load %arg2[%c0_11, %c0_12] : memref<128x512xf32, #tpu.memory_space<vmem>>, vector<128x512xf32>
    %cst_13 = arith.constant 0.000000e+00 : f32
    %30 = vector.broadcast %cst_13 : f32 to vector<8x128xf32>
    %cst_14 = arith.constant 0.000000e+00 : f32
    %31 = vector.broadcast %cst_14 : f32 to vector<8x128xf32>
    %c0_15 = arith.constant 0 : index
    %c0_16 = arith.constant 0 : index
    %32 = vector.load %arg10[%c0_15, %c0_16] : memref<64x512xf32, #tpu.memory_space<vmem>>, vector<8x512xf32>
    %c56 = arith.constant 56 : index
    %c0_17 = arith.constant 0 : index
    %33 = vector.load %arg10[%c56, %c0_17] : memref<64x512xf32, #tpu.memory_space<vmem>>, vector<8x512xf32>
    %34 = arith.select %18, %32, %33 : vector<8x512xi1>, vector<8x512xf32>
    %cst_18 = arith.constant dense<0.000000e+00> : vector<8x512xf32>
    %35 = tpu.matmul %30, %29, %cst_18 {dimension_numbers = #tpu.dot_dimension_numbers<[1], [0], [0], [1], [0, 0, 1, 1], [], []>} : vector<8x128xf32>, vector<128x512xf32>, vector<8x512xf32> -> vector<8x512xf32>
    %36 = arith.addf %34, %35 : vector<8x512xf32>
    %37 = vector.extract_strided_slice %36 {offsets = [0, 0], sizes = [8, 128], strides = [1, 1]} : vector<8x512xf32> to vector<8x128xf32>
    %38 = arith.negf %37 : vector<8x128xf32>
    %39 = math.exp %38 : vector<8x128xf32>
    %cst_19 = arith.constant 1.000000e+00 : f32
    %40 = vector.broadcast %cst_19 : f32 to vector<8x128xf32>
    %41 = arith.addf %40, %39 : vector<8x128xf32>
    %42 = arith.divf %40, %41 : vector<8x128xf32>
    %43 = vector.extract_strided_slice %36 {offsets = [0, 128], sizes = [8, 128], strides = [1, 1]} : vector<8x512xf32> to vector<8x128xf32>
    %44 = arith.negf %43 : vector<8x128xf32>
    %45 = math.exp %44 : vector<8x128xf32>
    %cst_20 = arith.constant 1.000000e+00 : f32
    %46 = vector.broadcast %cst_20 : f32 to vector<8x128xf32>
    %47 = arith.addf %46, %45 : vector<8x128xf32>
    %48 = arith.divf %46, %47 : vector<8x128xf32>
    %49 = vector.extract_strided_slice %36 {offsets = [0, 256], sizes = [8, 128], strides = [1, 1]} : vector<8x512xf32> to vector<8x128xf32>
    %50 = math.tanh %49 : vector<8x128xf32>
    %51 = vector.extract_strided_slice %36 {offsets = [0, 384], sizes = [8, 128], strides = [1, 1]} : vector<8x512xf32> to vector<8x128xf32>
    %52 = arith.negf %51 : vector<8x128xf32>
    %53 = math.exp %52 : vector<8x128xf32>
    %cst_21 = arith.constant 1.000000e+00 : f32
    %54 = vector.broadcast %cst_21 : f32 to vector<8x128xf32>
    %55 = arith.addf %54, %53 : vector<8x128xf32>
    %56 = arith.divf %54, %55 : vector<8x128xf32>
    %57 = arith.mulf %48, %31 : vector<8x128xf32>
    %58 = arith.mulf %42, %50 : vector<8x128xf32>
    %59 = arith.addf %57, %58 : vector<8x128xf32>
    %60 = math.tanh %59 : vector<8x128xf32>
    %61 = arith.mulf %56, %60 : vector<8x128xf32>
    %62 = vector.extract_strided_slice %61 {offsets = [0, 0], sizes = [8, 32], strides = [1, 1]} : vector<8x128xf32> to vector<8x32xf32>
    %c0_22 = arith.constant 0 : index
    %c0_23 = arith.constant 0 : index
    %63 = vector.load %arg11[%c0_22, %c0_23] : memref<64x64xf32, #tpu.memory_space<vmem>>, vector<8x32xf32>
    tpu.vector_store %arg11[%c0_22, %c0_23], %62 {strides = array<i32>} : memref<64x64xf32, #tpu.memory_space<vmem>>, vector<8x32xf32>,
    %64 = vector.extract_strided_slice %61 {offsets = [0, 32], sizes = [8, 32], strides = [1, 1]} : vector<8x128xf32> to vector<8x32xf32>
    %c56_24 = arith.constant 56 : index
    %c32 = arith.constant 32 : index
    %65 = vector.load %arg11[%c56_24, %c32] : memref<64x64xf32, #tpu.memory_space<vmem>>, vector<8x32xf32>
    tpu.vector_store %arg11[%c56_24, %c32], %64 {strides = array<i32>} : memref<64x64xf32, #tpu.memory_space<vmem>>, vector<8x32xf32>,
    %c8 = arith.constant 8 : index
    %c0_25 = arith.constant 0 : index
    %66 = vector.load %arg10[%c8, %c0_25] : memref<64x512xf32, #tpu.memory_space<vmem>>, vector<8x512xf32>
    %c48 = arith.constant 48 : index
    %c0_26 = arith.constant 0 : index
    %67 = vector.load %arg10[%c48, %c0_26] : memref<64x512xf32, #tpu.memory_space<vmem>>, vector<8x512xf32>
    %68 = arith.select %18, %66, %67 : vector<8x512xi1>, vector<8x512xf32>
    %cst_27 = arith.constant dense<0.000000e+00> : vector<8x512xf32>
    %69 = tpu.matmul %61, %29, %cst_27 {dimension_numbers = #tpu.dot_dimension_numbers<[1], [0], [0], [1], [0, 0, 1, 1], [], []>} : vector<8x128xf32>, vector<128x512xf32>, vector<8x512xf32> -> vector<8x512xf32>
    %70 = arith.addf %68, %69 : vector<8x512xf32>
    %71 = vector.extract_strided_slice %70 {offsets = [0, 0], sizes = [8, 128], strides = [1, 1]} : vector<8x512xf32> to vector<8x128xf32>
    %72 = arith.negf %71 : vector<8x128xf32>
    %73 = math.exp %72 : vector<8x128xf32>
    %cst_28 = arith.constant 1.000000e+00 : f32
    %74 = vector.broadcast %cst_28 : f32 to vector<8x128xf32>
    %75 = arith.addf %74, %73 : vector<8x128xf32>
    %76 = arith.divf %74, %75 : vector<8x128xf32>
    %77 = vector.extract_strided_slice %70 {offsets = [0, 128], sizes = [8, 128], strides = [1, 1]} : vector<8x512xf32> to vector<8x128xf32>
    %78 = arith.negf %77 : vector<8x128xf32>
    %79 = math.exp %78 : vector<8x128xf32>
    %cst_29 = arith.constant 1.000000e+00 : f32
    %80 = vector.broadcast %cst_29 : f32 to vector<8x128xf32>
    %81 = arith.addf %80, %79 : vector<8x128xf32>
    %82 = arith.divf %80, %81 : vector<8x128xf32>
    %83 = vector.extract_strided_slice %70 {offsets = [0, 256], sizes = [8, 128], strides = [1, 1]} : vector<8x512xf32> to vector<8x128xf32>
    %84 = math.tanh %83 : vector<8x128xf32>
    %85 = vector.extract_strided_slice %70 {offsets = [0, 384], sizes = [8, 128], strides = [1, 1]} : vector<8x512xf32> to vector<8x128xf32>
    %86 = arith.negf %85 : vector<8x128xf32>
    %87 = math.exp %86 : vector<8x128xf32>
    %cst_30 = arith.constant 1.000000e+00 : f32
    %88 = vector.broadcast %cst_30 : f32 to vector<8x128xf32>
    %89 = arith.addf %88, %87 : vector<8x128xf32>
    %90 = arith.divf %88, %89 : vector<8x128xf32>
    %91 = arith.mulf %82, %59 : vector<8x128xf32>
    %92 = arith.mulf %76, %84 : vector<8x128xf32>
    %93 = arith.addf %91, %92 : vector<8x128xf32>
    %94 = math.tanh %93 : vector<8x128xf32>
    %95 = arith.mulf %90, %94 : vector<8x128xf32>
    %96 = vector.extract_strided_slice %95 {offsets = [0, 0], sizes = [8, 32], strides = [1, 1]} : vector<8x128xf32> to vector<8x32xf32>
    %c8_31 = arith.constant 8 : index
    %c0_32 = arith.constant 0 : index
    %97 = vector.load %arg11[%c8_31, %c0_32] : memref<64x64xf32, #tpu.memory_space<vmem>>, vector<8x32xf32>
    tpu.vector_store %arg11[%c8_31, %c0_32], %96 {strides = array<i32>} : memref<64x64xf32, #tpu.memory_space<vmem>>, vector<8x32xf32>,
    %98 = vector.extract_strided_slice %95 {offsets = [0, 32], sizes = [8, 32], strides = [1, 1]} : vector<8x128xf32> to vector<8x32xf32>
    %c48_33 = arith.constant 48 : index
    %c32_34 = arith.constant 32 : index
    %99 = vector.load %arg11[%c48_33, %c32_34] : memref<64x64xf32, #tpu.memory_space<vmem>>, vector<8x32xf32>
    tpu.vector_store %arg11[%c48_33, %c32_34], %98 {strides = array<i32>} : memref<64x64xf32, #tpu.memory_space<vmem>>, vector<8x32xf32>,
    %c16 = arith.constant 16 : index
    %c0_35 = arith.constant 0 : index
    %100 = vector.load %arg10[%c16, %c0_35] : memref<64x512xf32, #tpu.memory_space<vmem>>, vector<8x512xf32>
    %c40 = arith.constant 40 : index
    %c0_36 = arith.constant 0 : index
    %101 = vector.load %arg10[%c40, %c0_36] : memref<64x512xf32, #tpu.memory_space<vmem>>, vector<8x512xf32>
    %102 = arith.select %18, %100, %101 : vector<8x512xi1>, vector<8x512xf32>
    %cst_37 = arith.constant dense<0.000000e+00> : vector<8x512xf32>
    %103 = tpu.matmul %95, %29, %cst_37 {dimension_numbers = #tpu.dot_dimension_numbers<[1], [0], [0], [1], [0, 0, 1, 1], [], []>} : vector<8x128xf32>, vector<128x512xf32>, vector<8x512xf32> -> vector<8x512xf32>
    %104 = arith.addf %102, %103 : vector<8x512xf32>
    %105 = vector.extract_strided_slice %104 {offsets = [0, 0], sizes = [8, 128], strides = [1, 1]} : vector<8x512xf32> to vector<8x128xf32>
    %106 = arith.negf %105 : vector<8x128xf32>
    %107 = math.exp %106 : vector<8x128xf32>
    %cst_38 = arith.constant 1.000000e+00 : f32
    %108 = vector.broadcast %cst_38 : f32 to vector<8x128xf32>
    %109 = arith.addf %108, %107 : vector<8x128xf32>
    %110 = arith.divf %108, %109 : vector<8x128xf32>
    %111 = vector.extract_strided_slice %104 {offsets = [0, 128], sizes = [8, 128], strides = [1, 1]} : vector<8x512xf32> to vector<8x128xf32>
    %112 = arith.negf %111 : vector<8x128xf32>
    %113 = math.exp %112 : vector<8x128xf32>
    %cst_39 = arith.constant 1.000000e+00 : f32
    %114 = vector.broadcast %cst_39 : f32 to vector<8x128xf32>
    %115 = arith.addf %114, %113 : vector<8x128xf32>
    %116 = arith.divf %114, %115 : vector<8x128xf32>
    %117 = vector.extract_strided_slice %104 {offsets = [0, 256], sizes = [8, 128], strides = [1, 1]} : vector<8x512xf32> to vector<8x128xf32>
    %118 = math.tanh %117 : vector<8x128xf32>
    %119 = vector.extract_strided_slice %104 {offsets = [0, 384], sizes = [8, 128], strides = [1, 1]} : vector<8x512xf32> to vector<8x128xf32>
    %120 = arith.negf %119 : vector<8x128xf32>
    %121 = math.exp %120 : vector<8x128xf32>
    %cst_40 = arith.constant 1.000000e+00 : f32
    %122 = vector.broadcast %cst_40 : f32 to vector<8x128xf32>
    %123 = arith.addf %122, %121 : vector<8x128xf32>
    %124 = arith.divf %122, %123 : vector<8x128xf32>
    %125 = arith.mulf %116, %93 : vector<8x128xf32>
    %126 = arith.mulf %110, %118 : vector<8x128xf32>
    %127 = arith.addf %125, %126 : vector<8x128xf32>
    %128 = math.tanh %127 : vector<8x128xf32>
    %129 = arith.mulf %124, %128 : vector<8x128xf32>
    %130 = vector.extract_strided_slice %129 {offsets = [0, 0], sizes = [8, 32], strides = [1, 1]} : vector<8x128xf32> to vector<8x32xf32>
    %c16_41 = arith.constant 16 : index
    %c0_42 = arith.constant 0 : index
    %131 = vector.load %arg11[%c16_41, %c0_42] : memref<64x64xf32, #tpu.memory_space<vmem>>, vector<8x32xf32>
    tpu.vector_store %arg11[%c16_41, %c0_42], %130 {strides = array<i32>} : memref<64x64xf32, #tpu.memory_space<vmem>>, vector<8x32xf32>,
    %132 = vector.extract_strided_slice %129 {offsets = [0, 32], sizes = [8, 32], strides = [1, 1]} : vector<8x128xf32> to vector<8x32xf32>
    %c40_43 = arith.constant 40 : index
    %c32_44 = arith.constant 32 : index
    %133 = vector.load %arg11[%c40_43, %c32_44] : memref<64x64xf32, #tpu.memory_space<vmem>>, vector<8x32xf32>
    tpu.vector_store %arg11[%c40_43, %c32_44], %132 {strides = array<i32>} : memref<64x64xf32, #tpu.memory_space<vmem>>, vector<8x32xf32>,
    %c24 = arith.constant 24 : index
    %c0_45 = arith.constant 0 : index
    %134 = vector.load %arg10[%c24, %c0_45] : memref<64x512xf32, #tpu.memory_space<vmem>>, vector<8x512xf32>
    %c32_46 = arith.constant 32 : index
    %c0_47 = arith.constant 0 : index
    %135 = vector.load %arg10[%c32_46, %c0_47] : memref<64x512xf32, #tpu.memory_space<vmem>>, vector<8x512xf32>
    %136 = arith.select %18, %134, %135 : vector<8x512xi1>, vector<8x512xf32>
    %cst_48 = arith.constant dense<0.000000e+00> : vector<8x512xf32>
    %137 = tpu.matmul %129, %29, %cst_48 {dimension_numbers = #tpu.dot_dimension_numbers<[1], [0], [0], [1], [0, 0, 1, 1], [], []>} : vector<8x128xf32>, vector<128x512xf32>, vector<8x512xf32> -> vector<8x512xf32>
    %138 = arith.addf %136, %137 : vector<8x512xf32>
    %139 = vector.extract_strided_slice %138 {offsets = [0, 0], sizes = [8, 128], strides = [1, 1]} : vector<8x512xf32> to vector<8x128xf32>
    %140 = arith.negf %139 : vector<8x128xf32>
    %141 = math.exp %140 : vector<8x128xf32>
    %cst_49 = arith.constant 1.000000e+00 : f32
    %142 = vector.broadcast %cst_49 : f32 to vector<8x128xf32>
    %143 = arith.addf %142, %141 : vector<8x128xf32>
    %144 = arith.divf %142, %143 : vector<8x128xf32>
    %145 = vector.extract_strided_slice %138 {offsets = [0, 128], sizes = [8, 128], strides = [1, 1]} : vector<8x512xf32> to vector<8x128xf32>
    %146 = arith.negf %145 : vector<8x128xf32>
    %147 = math.exp %146 : vector<8x128xf32>
    %cst_50 = arith.constant 1.000000e+00 : f32
    %148 = vector.broadcast %cst_50 : f32 to vector<8x128xf32>
    %149 = arith.addf %148, %147 : vector<8x128xf32>
    %150 = arith.divf %148, %149 : vector<8x128xf32>
    %151 = vector.extract_strided_slice %138 {offsets = [0, 256], sizes = [8, 128], strides = [1, 1]} : vector<8x512xf32> to vector<8x128xf32>
    %152 = math.tanh %151 : vector<8x128xf32>
    %153 = vector.extract_strided_slice %138 {offsets = [0, 384], sizes = [8, 128], strides = [1, 1]} : vector<8x512xf32> to vector<8x128xf32>
    %154 = arith.negf %153 : vector<8x128xf32>
    %155 = math.exp %154 : vector<8x128xf32>
    %cst_51 = arith.constant 1.000000e+00 : f32
    %156 = vector.broadcast %cst_51 : f32 to vector<8x128xf32>
    %157 = arith.addf %156, %155 : vector<8x128xf32>
    %158 = arith.divf %156, %157 : vector<8x128xf32>
    %159 = arith.mulf %150, %127 : vector<8x128xf32>
    %160 = arith.mulf %144, %152 : vector<8x128xf32>
    %161 = arith.addf %159, %160 : vector<8x128xf32>
    %162 = math.tanh %161 : vector<8x128xf32>
    %163 = arith.mulf %158, %162 : vector<8x128xf32>
    %164 = vector.extract_strided_slice %163 {offsets = [0, 0], sizes = [8, 32], strides = [1, 1]} : vector<8x128xf32> to vector<8x32xf32>
    %c24_52 = arith.constant 24 : index
    %c0_53 = arith.constant 0 : index
    %165 = vector.load %arg11[%c24_52, %c0_53] : memref<64x64xf32, #tpu.memory_space<vmem>>, vector<8x32xf32>
    tpu.vector_store %arg11[%c24_52, %c0_53], %164 {strides = array<i32>} : memref<64x64xf32, #tpu.memory_space<vmem>>, vector<8x32xf32>,
    %166 = vector.extract_strided_slice %163 {offsets = [0, 32], sizes = [8, 32], strides = [1, 1]} : vector<8x128xf32> to vector<8x32xf32>
    %c32_54 = arith.constant 32 : index
    %c32_55 = arith.constant 32 : index
    %167 = vector.load %arg11[%c32_54, %c32_55] : memref<64x64xf32, #tpu.memory_space<vmem>>, vector<8x32xf32>
    tpu.vector_store %arg11[%c32_54, %c32_55], %166 {strides = array<i32>} : memref<64x64xf32, #tpu.memory_space<vmem>>, vector<8x32xf32>,
    %c32_56 = arith.constant 32 : index
    %c0_57 = arith.constant 0 : index
    %168 = vector.load %arg10[%c32_56, %c0_57] : memref<64x512xf32, #tpu.memory_space<vmem>>, vector<8x512xf32>
    %c24_58 = arith.constant 24 : index
    %c0_59 = arith.constant 0 : index
    %169 = vector.load %arg10[%c24_58, %c0_59] : memref<64x512xf32, #tpu.memory_space<vmem>>, vector<8x512xf32>
    %170 = arith.select %18, %168, %169 : vector<8x512xi1>, vector<8x512xf32>
    %cst_60 = arith.constant dense<0.000000e+00> : vector<8x512xf32>
    %171 = tpu.matmul %163, %29, %cst_60 {dimension_numbers = #tpu.dot_dimension_numbers<[1], [0], [0], [1], [0, 0, 1, 1], [], []>} : vector<8x128xf32>, vector<128x512xf32>, vector<8x512xf32> -> vector<8x512xf32>
    %172 = arith.addf %170, %171 : vector<8x512xf32>
    %173 = vector.extract_strided_slice %172 {offsets = [0, 0], sizes = [8, 128], strides = [1, 1]} : vector<8x512xf32> to vector<8x128xf32>
    %174 = arith.negf %173 : vector<8x128xf32>
    %175 = math.exp %174 : vector<8x128xf32>
    %cst_61 = arith.constant 1.000000e+00 : f32
    %176 = vector.broadcast %cst_61 : f32 to vector<8x128xf32>
    %177 = arith.addf %176, %175 : vector<8x128xf32>
    %178 = arith.divf %176, %177 : vector<8x128xf32>
    %179 = vector.extract_strided_slice %172 {offsets = [0, 128], sizes = [8, 128], strides = [1, 1]} : vector<8x512xf32> to vector<8x128xf32>
    %180 = arith.negf %179 : vector<8x128xf32>
    %181 = math.exp %180 : vector<8x128xf32>
    %cst_62 = arith.constant 1.000000e+00 : f32
    %182 = vector.broadcast %cst_62 : f32 to vector<8x128xf32>
    %183 = arith.addf %182, %181 : vector<8x128xf32>
    %184 = arith.divf %182, %183 : vector<8x128xf32>
    %185 = vector.extract_strided_slice %172 {offsets = [0, 256], sizes = [8, 128], strides = [1, 1]} : vector<8x512xf32> to vector<8x128xf32>
    %186 = math.tanh %185 : vector<8x128xf32>
    %187 = vector.extract_strided_slice %172 {offsets = [0, 384], sizes = [8, 128], strides = [1, 1]} : vector<8x512xf32> to vector<8x128xf32>
    %188 = arith.negf %187 : vector<8x128xf32>
    %189 = math.exp %188 : vector<8x128xf32>
    %cst_63 = arith.constant 1.000000e+00 : f32
    %190 = vector.broadcast %cst_63 : f32 to vector<8x128xf32>
    %191 = arith.addf %190, %189 : vector<8x128xf32>
    %192 = arith.divf %190, %191 : vector<8x128xf32>
    %193 = arith.mulf %184, %161 : vector<8x128xf32>
    %194 = arith.mulf %178, %186 : vector<8x128xf32>
    %195 = arith.addf %193, %194 : vector<8x128xf32>
    %196 = math.tanh %195 : vector<8x128xf32>
    %197 = arith.mulf %192, %196 : vector<8x128xf32>
    %198 = vector.extract_strided_slice %197 {offsets = [0, 0], sizes = [8, 32], strides = [1, 1]} : vector<8x128xf32> to vector<8x32xf32>
    %c32_64 = arith.constant 32 : index
    %c0_65 = arith.constant 0 : index
    %199 = vector.load %arg11[%c32_64, %c0_65] : memref<64x64xf32, #tpu.memory_space<vmem>>, vector<8x32xf32>
    tpu.vector_store %arg11[%c32_64, %c0_65], %198 {strides = array<i32>} : memref<64x64xf32, #tpu.memory_space<vmem>>, vector<8x32xf32>,
    %200 = vector.extract_strided_slice %197 {offsets = [0, 32], sizes = [8, 32], strides = [1, 1]} : vector<8x128xf32> to vector<8x32xf32>
    %c24_66 = arith.constant 24 : index
    %c32_67 = arith.constant 32 : index
    %201 = vector.load %arg11[%c24_66, %c32_67] : memref<64x64xf32, #tpu.memory_space<vmem>>, vector<8x32xf32>
    tpu.vector_store %arg11[%c24_66, %c32_67], %200 {strides = array<i32>} : memref<64x64xf32, #tpu.memory_space<vmem>>, vector<8x32xf32>,
    %c40_68 = arith.constant 40 : index
    %c0_69 = arith.constant 0 : index
    %202 = vector.load %arg10[%c40_68, %c0_69] : memref<64x512xf32, #tpu.memory_space<vmem>>, vector<8x512xf32>
    %c16_70 = arith.constant 16 : index
    %c0_71 = arith.constant 0 : index
    %203 = vector.load %arg10[%c16_70, %c0_71] : memref<64x512xf32, #tpu.memory_space<vmem>>, vector<8x512xf32>
    %204 = arith.select %18, %202, %203 : vector<8x512xi1>, vector<8x512xf32>
    %cst_72 = arith.constant dense<0.000000e+00> : vector<8x512xf32>
    %205 = tpu.matmul %197, %29, %cst_72 {dimension_numbers = #tpu.dot_dimension_numbers<[1], [0], [0], [1], [0, 0, 1, 1], [], []>} : vector<8x128xf32>, vector<128x512xf32>, vector<8x512xf32> -> vector<8x512xf32>
    %206 = arith.addf %204, %205 : vector<8x512xf32>
    %207 = vector.extract_strided_slice %206 {offsets = [0, 0], sizes = [8, 128], strides = [1, 1]} : vector<8x512xf32> to vector<8x128xf32>
    %208 = arith.negf %207 : vector<8x128xf32>
    %209 = math.exp %208 : vector<8x128xf32>
    %cst_73 = arith.constant 1.000000e+00 : f32
    %210 = vector.broadcast %cst_73 : f32 to vector<8x128xf32>
    %211 = arith.addf %210, %209 : vector<8x128xf32>
    %212 = arith.divf %210, %211 : vector<8x128xf32>
    %213 = vector.extract_strided_slice %206 {offsets = [0, 128], sizes = [8, 128], strides = [1, 1]} : vector<8x512xf32> to vector<8x128xf32>
    %214 = arith.negf %213 : vector<8x128xf32>
    %215 = math.exp %214 : vector<8x128xf32>
    %cst_74 = arith.constant 1.000000e+00 : f32
    %216 = vector.broadcast %cst_74 : f32 to vector<8x128xf32>
    %217 = arith.addf %216, %215 : vector<8x128xf32>
    %218 = arith.divf %216, %217 : vector<8x128xf32>
    %219 = vector.extract_strided_slice %206 {offsets = [0, 256], sizes = [8, 128], strides = [1, 1]} : vector<8x512xf32> to vector<8x128xf32>
    %220 = math.tanh %219 : vector<8x128xf32>
    %221 = vector.extract_strided_slice %206 {offsets = [0, 384], sizes = [8, 128], strides = [1, 1]} : vector<8x512xf32> to vector<8x128xf32>
    %222 = arith.negf %221 : vector<8x128xf32>
    %223 = math.exp %222 : vector<8x128xf32>
    %cst_75 = arith.constant 1.000000e+00 : f32
    %224 = vector.broadcast %cst_75 : f32 to vector<8x128xf32>
    %225 = arith.addf %224, %223 : vector<8x128xf32>
    %226 = arith.divf %224, %225 : vector<8x128xf32>
    %227 = arith.mulf %218, %195 : vector<8x128xf32>
    %228 = arith.mulf %212, %220 : vector<8x128xf32>
    %229 = arith.addf %227, %228 : vector<8x128xf32>
    %230 = math.tanh %229 : vector<8x128xf32>
    %231 = arith.mulf %226, %230 : vector<8x128xf32>
    %232 = vector.extract_strided_slice %231 {offsets = [0, 0], sizes = [8, 32], strides = [1, 1]} : vector<8x128xf32> to vector<8x32xf32>
    %c40_76 = arith.constant 40 : index
    %c0_77 = arith.constant 0 : index
    %233 = vector.load %arg11[%c40_76, %c0_77] : memref<64x64xf32, #tpu.memory_space<vmem>>, vector<8x32xf32>
    tpu.vector_store %arg11[%c40_76, %c0_77], %232 {strides = array<i32>} : memref<64x64xf32, #tpu.memory_space<vmem>>, vector<8x32xf32>,
    %234 = vector.extract_strided_slice %231 {offsets = [0, 32], sizes = [8, 32], strides = [1, 1]} : vector<8x128xf32> to vector<8x32xf32>
    %c16_78 = arith.constant 16 : index
    %c32_79 = arith.constant 32 : index
    %235 = vector.load %arg11[%c16_78, %c32_79] : memref<64x64xf32, #tpu.memory_space<vmem>>, vector<8x32xf32>
    tpu.vector_store %arg11[%c16_78, %c32_79], %234 {strides = array<i32>} : memref<64x64xf32, #tpu.memory_space<vmem>>, vector<8x32xf32>,
    %c48_80 = arith.constant 48 : index
    %c0_81 = arith.constant 0 : index
    %236 = vector.load %arg10[%c48_80, %c0_81] : memref<64x512xf32, #tpu.memory_space<vmem>>, vector<8x512xf32>
    %c8_82 = arith.constant 8 : index
    %c0_83 = arith.constant 0 : index
    %237 = vector.load %arg10[%c8_82, %c0_83] : memref<64x512xf32, #tpu.memory_space<vmem>>, vector<8x512xf32>
    %238 = arith.select %18, %236, %237 : vector<8x512xi1>, vector<8x512xf32>
    %cst_84 = arith.constant dense<0.000000e+00> : vector<8x512xf32>
    %239 = tpu.matmul %231, %29, %cst_84 {dimension_numbers = #tpu.dot_dimension_numbers<[1], [0], [0], [1], [0, 0, 1, 1], [], []>} : vector<8x128xf32>, vector<128x512xf32>, vector<8x512xf32> -> vector<8x512xf32>
    %240 = arith.addf %238, %239 : vector<8x512xf32>
    %241 = vector.extract_strided_slice %240 {offsets = [0, 0], sizes = [8, 128], strides = [1, 1]} : vector<8x512xf32> to vector<8x128xf32>
    %242 = arith.negf %241 : vector<8x128xf32>
    %243 = math.exp %242 : vector<8x128xf32>
    %cst_85 = arith.constant 1.000000e+00 : f32
    %244 = vector.broadcast %cst_85 : f32 to vector<8x128xf32>
    %245 = arith.addf %244, %243 : vector<8x128xf32>
    %246 = arith.divf %244, %245 : vector<8x128xf32>
    %247 = vector.extract_strided_slice %240 {offsets = [0, 128], sizes = [8, 128], strides = [1, 1]} : vector<8x512xf32> to vector<8x128xf32>
    %248 = arith.negf %247 : vector<8x128xf32>
    %249 = math.exp %248 : vector<8x128xf32>
    %cst_86 = arith.constant 1.000000e+00 : f32
    %250 = vector.broadcast %cst_86 : f32 to vector<8x128xf32>
    %251 = arith.addf %250, %249 : vector<8x128xf32>
    %252 = arith.divf %250, %251 : vector<8x128xf32>
    %253 = vector.extract_strided_slice %240 {offsets = [0, 256], sizes = [8, 128], strides = [1, 1]} : vector<8x512xf32> to vector<8x128xf32>
    %254 = math.tanh %253 : vector<8x128xf32>
    %255 = vector.extract_strided_slice %240 {offsets = [0, 384], sizes = [8, 128], strides = [1, 1]} : vector<8x512xf32> to vector<8x128xf32>
    %256 = arith.negf %255 : vector<8x128xf32>
    %257 = math.exp %256 : vector<8x128xf32>
    %cst_87 = arith.constant 1.000000e+00 : f32
    %258 = vector.broadcast %cst_87 : f32 to vector<8x128xf32>
    %259 = arith.addf %258, %257 : vector<8x128xf32>
    %260 = arith.divf %258, %259 : vector<8x128xf32>
    %261 = arith.mulf %252, %229 : vector<8x128xf32>
    %262 = arith.mulf %246, %254 : vector<8x128xf32>
    %263 = arith.addf %261, %262 : vector<8x128xf32>
    %264 = math.tanh %263 : vector<8x128xf32>
    %265 = arith.mulf %260, %264 : vector<8x128xf32>
    %266 = vector.extract_strided_slice %265 {offsets = [0, 0], sizes = [8, 32], strides = [1, 1]} : vector<8x128xf32> to vector<8x32xf32>
    %c48_88 = arith.constant 48 : index
    %c0_89 = arith.constant 0 : index
    %267 = vector.load %arg11[%c48_88, %c0_89] : memref<64x64xf32, #tpu.memory_space<vmem>>, vector<8x32xf32>
    tpu.vector_store %arg11[%c48_88, %c0_89], %266 {strides = array<i32>} : memref<64x64xf32, #tpu.memory_space<vmem>>, vector<8x32xf32>,
    %268 = vector.extract_strided_slice %265 {offsets = [0, 32], sizes = [8, 32], strides = [1, 1]} : vector<8x128xf32> to vector<8x32xf32>
    %c8_90 = arith.constant 8 : index
    %c32_91 = arith.constant 32 : index
    %269 = vector.load %arg11[%c8_90, %c32_91] : memref<64x64xf32, #tpu.memory_space<vmem>>, vector<8x32xf32>
    tpu.vector_store %arg11[%c8_90, %c32_91], %268 {strides = array<i32>} : memref<64x64xf32, #tpu.memory_space<vmem>>, vector<8x32xf32>,
    %c56_92 = arith.constant 56 : index
    %c0_93 = arith.constant 0 : index
    %270 = vector.load %arg10[%c56_92, %c0_93] : memref<64x512xf32, #tpu.memory_space<vmem>>, vector<8x512xf32>
    %c0_94 = arith.constant 0 : index
    %c0_95 = arith.constant 0 : index
    %271 = vector.load %arg10[%c0_94, %c0_95] : memref<64x512xf32, #tpu.memory_space<vmem>>, vector<8x512xf32>
    %272 = arith.select %18, %270, %271 : vector<8x512xi1>, vector<8x512xf32>
    %cst_96 = arith.constant dense<0.000000e+00> : vector<8x512xf32>
    %273 = tpu.matmul %265, %29, %cst_96 {dimension_numbers = #tpu.dot_dimension_numbers<[1], [0], [0], [1], [0, 0, 1, 1], [], []>} : vector<8x128xf32>, vector<128x512xf32>, vector<8x512xf32> -> vector<8x512xf32>
    %274 = arith.addf %272, %273 : vector<8x512xf32>
    %275 = vector.extract_strided_slice %274 {offsets = [0, 0], sizes = [8, 128], strides = [1, 1]} : vector<8x512xf32> to vector<8x128xf32>
    %276 = arith.negf %275 : vector<8x128xf32>
    %277 = math.exp %276 : vector<8x128xf32>
    %cst_97 = arith.constant 1.000000e+00 : f32
    %278 = vector.broadcast %cst_97 : f32 to vector<8x128xf32>
    %279 = arith.addf %278, %277 : vector<8x128xf32>
    %280 = arith.divf %278, %279 : vector<8x128xf32>
    %281 = vector.extract_strided_slice %274 {offsets = [0, 128], sizes = [8, 128], strides = [1, 1]} : vector<8x512xf32> to vector<8x128xf32>
    %282 = arith.negf %281 : vector<8x128xf32>
    %283 = math.exp %282 : vector<8x128xf32>
    %cst_98 = arith.constant 1.000000e+00 : f32
    %284 = vector.broadcast %cst_98 : f32 to vector<8x128xf32>
    %285 = arith.addf %284, %283 : vector<8x128xf32>
    %286 = arith.divf %284, %285 : vector<8x128xf32>
    %287 = vector.extract_strided_slice %274 {offsets = [0, 256], sizes = [8, 128], strides = [1, 1]} : vector<8x512xf32> to vector<8x128xf32>
    %288 = math.tanh %287 : vector<8x128xf32>
    %289 = vector.extract_strided_slice %274 {offsets = [0, 384], sizes = [8, 128], strides = [1, 1]} : vector<8x512xf32> to vector<8x128xf32>
    %290 = arith.negf %289 : vector<8x128xf32>
    %291 = math.exp %290 : vector<8x128xf32>
    %cst_99 = arith.constant 1.000000e+00 : f32
    %292 = vector.broadcast %cst_99 : f32 to vector<8x128xf32>
    %293 = arith.addf %292, %291 : vector<8x128xf32>
    %294 = arith.divf %292, %293 : vector<8x128xf32>
    %295 = arith.mulf %286, %263 : vector<8x128xf32>
    %296 = arith.mulf %280, %288 : vector<8x128xf32>
    %297 = arith.addf %295, %296 : vector<8x128xf32>
    %298 = math.tanh %297 : vector<8x128xf32>
    %299 = arith.mulf %294, %298 : vector<8x128xf32>
    %300 = vector.extract_strided_slice %299 {offsets = [0, 0], sizes = [8, 32], strides = [1, 1]} : vector<8x128xf32> to vector<8x32xf32>
    %c56_100 = arith.constant 56 : index
    %c0_101 = arith.constant 0 : index
    %301 = vector.load %arg11[%c56_100, %c0_101] : memref<64x64xf32, #tpu.memory_space<vmem>>, vector<8x32xf32>
    tpu.vector_store %arg11[%c56_100, %c0_101], %300 {strides = array<i32>} : memref<64x64xf32, #tpu.memory_space<vmem>>, vector<8x32xf32>,
    %302 = vector.extract_strided_slice %299 {offsets = [0, 32], sizes = [8, 32], strides = [1, 1]} : vector<8x128xf32> to vector<8x32xf32>
    %c0_102 = arith.constant 0 : index
    %c32_103 = arith.constant 32 : index
    %303 = vector.load %arg11[%c0_102, %c32_103] : memref<64x64xf32, #tpu.memory_space<vmem>>, vector<8x32xf32>
    tpu.vector_store %arg11[%c0_102, %c32_103], %302 {strides = array<i32>} : memref<64x64xf32, #tpu.memory_space<vmem>>, vector<8x32xf32>,
    %c0_104 = arith.constant 0 : index
    %c0_105 = arith.constant 0 : index
    %304 = vector.load %arg11[%c0_104, %c0_105] : memref<64x64xf32, #tpu.memory_space<vmem>>, vector<64x64xf32>
    %c0_106 = arith.constant 0 : index
    %c0_107 = arith.constant 0 : index
    %305 = vector.load %arg4[%c0_106, %c0_107] : memref<64x512xf32, #tpu.memory_space<vmem>>, vector<64x512xf32>
    %cst_108 = arith.constant dense<0.000000e+00> : vector<64x512xf32>
    %306 = tpu.matmul %304, %305, %cst_108 {dimension_numbers = #tpu.dot_dimension_numbers<[1], [0], [0], [1], [0, 0, 1, 1], [], []>} : vector<64x64xf32>, vector<64x512xf32>, vector<64x512xf32> -> vector<64x512xf32>
    %c0_109 = arith.constant 0 : index
    %c0_110 = arith.constant 0 : index
    %307 = vector.load %arg6[%c0_109, %c0_110] : memref<1x512xf32, #tpu.memory_space<vmem>>, vector<1x512xf32>
    %308 = vector.broadcast %307 : vector<1x512xf32> to vector<64x512xf32>
    %309 = arith.addf %306, %308 : vector<64x512xf32>
    %c0_111 = arith.constant 0 : index
    %c0_112 = arith.constant 0 : index
    %310 = vector.load %arg10[%c0_111, %c0_112] : memref<64x512xf32, #tpu.memory_space<vmem>>, vector<64x512xf32>
    tpu.vector_store %arg10[%c0_111, %c0_112], %309 {strides = array<i32>} : memref<64x512xf32, #tpu.memory_space<vmem>>, vector<64x512xf32>,
    %c0_113 = arith.constant 0 : index
    %c0_114 = arith.constant 0 : index
    %311 = vector.load %arg5[%c0_113, %c0_114] : memref<128x512xf32, #tpu.memory_space<vmem>>, vector<128x512xf32>
    %cst_115 = arith.constant 0.000000e+00 : f32
    %312 = vector.broadcast %cst_115 : f32 to vector<8x128xf32>
    %cst_116 = arith.constant 0.000000e+00 : f32
    %313 = vector.broadcast %cst_116 : f32 to vector<8x128xf32>
    %c0_117 = arith.constant 0 : index
    %c0_118 = arith.constant 0 : index
    %314 = vector.load %arg10[%c0_117, %c0_118] : memref<64x512xf32, #tpu.memory_space<vmem>>, vector<8x512xf32>
    %c56_119 = arith.constant 56 : index
    %c0_120 = arith.constant 0 : index
    %315 = vector.load %arg10[%c56_119, %c0_120] : memref<64x512xf32, #tpu.memory_space<vmem>>, vector<8x512xf32>
    %316 = arith.select %18, %314, %315 : vector<8x512xi1>, vector<8x512xf32>
    %cst_121 = arith.constant dense<0.000000e+00> : vector<8x512xf32>
    %317 = tpu.matmul %312, %311, %cst_121 {dimension_numbers = #tpu.dot_dimension_numbers<[1], [0], [0], [1], [0, 0, 1, 1], [], []>} : vector<8x128xf32>, vector<128x512xf32>, vector<8x512xf32> -> vector<8x512xf32>
    %318 = arith.addf %316, %317 : vector<8x512xf32>
    %319 = vector.extract_strided_slice %318 {offsets = [0, 0], sizes = [8, 128], strides = [1, 1]} : vector<8x512xf32> to vector<8x128xf32>
    %320 = arith.negf %319 : vector<8x128xf32>
    %321 = math.exp %320 : vector<8x128xf32>
    %cst_122 = arith.constant 1.000000e+00 : f32
    %322 = vector.broadcast %cst_122 : f32 to vector<8x128xf32>
    %323 = arith.addf %322, %321 : vector<8x128xf32>
    %324 = arith.divf %322, %323 : vector<8x128xf32>
    %325 = vector.extract_strided_slice %318 {offsets = [0, 128], sizes = [8, 128], strides = [1, 1]} : vector<8x512xf32> to vector<8x128xf32>
    %326 = arith.negf %325 : vector<8x128xf32>
    %327 = math.exp %326 : vector<8x128xf32>
    %cst_123 = arith.constant 1.000000e+00 : f32
    %328 = vector.broadcast %cst_123 : f32 to vector<8x128xf32>
    %329 = arith.addf %328, %327 : vector<8x128xf32>
    %330 = arith.divf %328, %329 : vector<8x128xf32>
    %331 = vector.extract_strided_slice %318 {offsets = [0, 256], sizes = [8, 128], strides = [1, 1]} : vector<8x512xf32> to vector<8x128xf32>
    %332 = math.tanh %331 : vector<8x128xf32>
    %333 = vector.extract_strided_slice %318 {offsets = [0, 384], sizes = [8, 128], strides = [1, 1]} : vector<8x512xf32> to vector<8x128xf32>
    %334 = arith.negf %333 : vector<8x128xf32>
    %335 = math.exp %334 : vector<8x128xf32>
    %cst_124 = arith.constant 1.000000e+00 : f32
    %336 = vector.broadcast %cst_124 : f32 to vector<8x128xf32>
    %337 = arith.addf %336, %335 : vector<8x128xf32>
    %338 = arith.divf %336, %337 : vector<8x128xf32>
    %339 = arith.mulf %330, %313 : vector<8x128xf32>
    %340 = arith.mulf %324, %332 : vector<8x128xf32>
    %341 = arith.addf %339, %340 : vector<8x128xf32>
    %342 = math.tanh %341 : vector<8x128xf32>
    %343 = arith.mulf %338, %342 : vector<8x128xf32>
    %c8_125 = arith.constant 8 : index
    %c0_126 = arith.constant 0 : index
    %344 = vector.load %arg10[%c8_125, %c0_126] : memref<64x512xf32, #tpu.memory_space<vmem>>, vector<8x512xf32>
    %c48_127 = arith.constant 48 : index
    %c0_128 = arith.constant 0 : index
    %345 = vector.load %arg10[%c48_127, %c0_128] : memref<64x512xf32, #tpu.memory_space<vmem>>, vector<8x512xf32>
    %346 = arith.select %18, %344, %345 : vector<8x512xi1>, vector<8x512xf32>
    %cst_129 = arith.constant dense<0.000000e+00> : vector<8x512xf32>
    %347 = tpu.matmul %343, %311, %cst_129 {dimension_numbers = #tpu.dot_dimension_numbers<[1], [0], [0], [1], [0, 0, 1, 1], [], []>} : vector<8x128xf32>, vector<128x512xf32>, vector<8x512xf32> -> vector<8x512xf32>
    %348 = arith.addf %346, %347 : vector<8x512xf32>
    %349 = vector.extract_strided_slice %348 {offsets = [0, 0], sizes = [8, 128], strides = [1, 1]} : vector<8x512xf32> to vector<8x128xf32>
    %350 = arith.negf %349 : vector<8x128xf32>
    %351 = math.exp %350 : vector<8x128xf32>
    %cst_130 = arith.constant 1.000000e+00 : f32
    %352 = vector.broadcast %cst_130 : f32 to vector<8x128xf32>
    %353 = arith.addf %352, %351 : vector<8x128xf32>
    %354 = arith.divf %352, %353 : vector<8x128xf32>
    %355 = vector.extract_strided_slice %348 {offsets = [0, 128], sizes = [8, 128], strides = [1, 1]} : vector<8x512xf32> to vector<8x128xf32>
    %356 = arith.negf %355 : vector<8x128xf32>
    %357 = math.exp %356 : vector<8x128xf32>
    %cst_131 = arith.constant 1.000000e+00 : f32
    %358 = vector.broadcast %cst_131 : f32 to vector<8x128xf32>
    %359 = arith.addf %358, %357 : vector<8x128xf32>
    %360 = arith.divf %358, %359 : vector<8x128xf32>
    %361 = vector.extract_strided_slice %348 {offsets = [0, 256], sizes = [8, 128], strides = [1, 1]} : vector<8x512xf32> to vector<8x128xf32>
    %362 = math.tanh %361 : vector<8x128xf32>
    %363 = vector.extract_strided_slice %348 {offsets = [0, 384], sizes = [8, 128], strides = [1, 1]} : vector<8x512xf32> to vector<8x128xf32>
    %364 = arith.negf %363 : vector<8x128xf32>
    %365 = math.exp %364 : vector<8x128xf32>
    %cst_132 = arith.constant 1.000000e+00 : f32
    %366 = vector.broadcast %cst_132 : f32 to vector<8x128xf32>
    %367 = arith.addf %366, %365 : vector<8x128xf32>
    %368 = arith.divf %366, %367 : vector<8x128xf32>
    %369 = arith.mulf %360, %341 : vector<8x128xf32>
    %370 = arith.mulf %354, %362 : vector<8x128xf32>
    %371 = arith.addf %369, %370 : vector<8x128xf32>
    %372 = math.tanh %371 : vector<8x128xf32>
    %373 = arith.mulf %368, %372 : vector<8x128xf32>
    %c16_133 = arith.constant 16 : index
    %c0_134 = arith.constant 0 : index
    %374 = vector.load %arg10[%c16_133, %c0_134] : memref<64x512xf32, #tpu.memory_space<vmem>>, vector<8x512xf32>
    %c40_135 = arith.constant 40 : index
    %c0_136 = arith.constant 0 : index
    %375 = vector.load %arg10[%c40_135, %c0_136] : memref<64x512xf32, #tpu.memory_space<vmem>>, vector<8x512xf32>
    %376 = arith.select %18, %374, %375 : vector<8x512xi1>, vector<8x512xf32>
    %cst_137 = arith.constant dense<0.000000e+00> : vector<8x512xf32>
    %377 = tpu.matmul %373, %311, %cst_137 {dimension_numbers = #tpu.dot_dimension_numbers<[1], [0], [0], [1], [0, 0, 1, 1], [], []>} : vector<8x128xf32>, vector<128x512xf32>, vector<8x512xf32> -> vector<8x512xf32>
    %378 = arith.addf %376, %377 : vector<8x512xf32>
    %379 = vector.extract_strided_slice %378 {offsets = [0, 0], sizes = [8, 128], strides = [1, 1]} : vector<8x512xf32> to vector<8x128xf32>
    %380 = arith.negf %379 : vector<8x128xf32>
    %381 = math.exp %380 : vector<8x128xf32>
    %cst_138 = arith.constant 1.000000e+00 : f32
    %382 = vector.broadcast %cst_138 : f32 to vector<8x128xf32>
    %383 = arith.addf %382, %381 : vector<8x128xf32>
    %384 = arith.divf %382, %383 : vector<8x128xf32>
    %385 = vector.extract_strided_slice %378 {offsets = [0, 128], sizes = [8, 128], strides = [1, 1]} : vector<8x512xf32> to vector<8x128xf32>
    %386 = arith.negf %385 : vector<8x128xf32>
    %387 = math.exp %386 : vector<8x128xf32>
    %cst_139 = arith.constant 1.000000e+00 : f32
    %388 = vector.broadcast %cst_139 : f32 to vector<8x128xf32>
    %389 = arith.addf %388, %387 : vector<8x128xf32>
    %390 = arith.divf %388, %389 : vector<8x128xf32>
    %391 = vector.extract_strided_slice %378 {offsets = [0, 256], sizes = [8, 128], strides = [1, 1]} : vector<8x512xf32> to vector<8x128xf32>
    %392 = math.tanh %391 : vector<8x128xf32>
    %393 = vector.extract_strided_slice %378 {offsets = [0, 384], sizes = [8, 128], strides = [1, 1]} : vector<8x512xf32> to vector<8x128xf32>
    %394 = arith.negf %393 : vector<8x128xf32>
    %395 = math.exp %394 : vector<8x128xf32>
    %cst_140 = arith.constant 1.000000e+00 : f32
    %396 = vector.broadcast %cst_140 : f32 to vector<8x128xf32>
    %397 = arith.addf %396, %395 : vector<8x128xf32>
    %398 = arith.divf %396, %397 : vector<8x128xf32>
    %399 = arith.mulf %390, %371 : vector<8x128xf32>
    %400 = arith.mulf %384, %392 : vector<8x128xf32>
    %401 = arith.addf %399, %400 : vector<8x128xf32>
    %402 = math.tanh %401 : vector<8x128xf32>
    %403 = arith.mulf %398, %402 : vector<8x128xf32>
    %c24_141 = arith.constant 24 : index
    %c0_142 = arith.constant 0 : index
    %404 = vector.load %arg10[%c24_141, %c0_142] : memref<64x512xf32, #tpu.memory_space<vmem>>, vector<8x512xf32>
    %c32_143 = arith.constant 32 : index
    %c0_144 = arith.constant 0 : index
    %405 = vector.load %arg10[%c32_143, %c0_144] : memref<64x512xf32, #tpu.memory_space<vmem>>, vector<8x512xf32>
    %406 = arith.select %18, %404, %405 : vector<8x512xi1>, vector<8x512xf32>
    %cst_145 = arith.constant dense<0.000000e+00> : vector<8x512xf32>
    %407 = tpu.matmul %403, %311, %cst_145 {dimension_numbers = #tpu.dot_dimension_numbers<[1], [0], [0], [1], [0, 0, 1, 1], [], []>} : vector<8x128xf32>, vector<128x512xf32>, vector<8x512xf32> -> vector<8x512xf32>
    %408 = arith.addf %406, %407 : vector<8x512xf32>
    %409 = vector.extract_strided_slice %408 {offsets = [0, 0], sizes = [8, 128], strides = [1, 1]} : vector<8x512xf32> to vector<8x128xf32>
    %410 = arith.negf %409 : vector<8x128xf32>
    %411 = math.exp %410 : vector<8x128xf32>
    %cst_146 = arith.constant 1.000000e+00 : f32
    %412 = vector.broadcast %cst_146 : f32 to vector<8x128xf32>
    %413 = arith.addf %412, %411 : vector<8x128xf32>
    %414 = arith.divf %412, %413 : vector<8x128xf32>
    %415 = vector.extract_strided_slice %408 {offsets = [0, 128], sizes = [8, 128], strides = [1, 1]} : vector<8x512xf32> to vector<8x128xf32>
    %416 = arith.negf %415 : vector<8x128xf32>
    %417 = math.exp %416 : vector<8x128xf32>
    %cst_147 = arith.constant 1.000000e+00 : f32
    %418 = vector.broadcast %cst_147 : f32 to vector<8x128xf32>
    %419 = arith.addf %418, %417 : vector<8x128xf32>
    %420 = arith.divf %418, %419 : vector<8x128xf32>
    %421 = vector.extract_strided_slice %408 {offsets = [0, 256], sizes = [8, 128], strides = [1, 1]} : vector<8x512xf32> to vector<8x128xf32>
    %422 = math.tanh %421 : vector<8x128xf32>
    %423 = vector.extract_strided_slice %408 {offsets = [0, 384], sizes = [8, 128], strides = [1, 1]} : vector<8x512xf32> to vector<8x128xf32>
    %424 = arith.negf %423 : vector<8x128xf32>
    %425 = math.exp %424 : vector<8x128xf32>
    %cst_148 = arith.constant 1.000000e+00 : f32
    %426 = vector.broadcast %cst_148 : f32 to vector<8x128xf32>
    %427 = arith.addf %426, %425 : vector<8x128xf32>
    %428 = arith.divf %426, %427 : vector<8x128xf32>
    %429 = arith.mulf %420, %401 : vector<8x128xf32>
    %430 = arith.mulf %414, %422 : vector<8x128xf32>
    %431 = arith.addf %429, %430 : vector<8x128xf32>
    %432 = math.tanh %431 : vector<8x128xf32>
    %433 = arith.mulf %428, %432 : vector<8x128xf32>
    %c32_149 = arith.constant 32 : index
    %c0_150 = arith.constant 0 : index
    %434 = vector.load %arg10[%c32_149, %c0_150] : memref<64x512xf32, #tpu.memory_space<vmem>>, vector<8x512xf32>
    %c24_151 = arith.constant 24 : index
    %c0_152 = arith.constant 0 : index
    %435 = vector.load %arg10[%c24_151, %c0_152] : memref<64x512xf32, #tpu.memory_space<vmem>>, vector<8x512xf32>
    %436 = arith.select %18, %434, %435 : vector<8x512xi1>, vector<8x512xf32>
    %cst_153 = arith.constant dense<0.000000e+00> : vector<8x512xf32>
    %437 = tpu.matmul %433, %311, %cst_153 {dimension_numbers = #tpu.dot_dimension_numbers<[1], [0], [0], [1], [0, 0, 1, 1], [], []>} : vector<8x128xf32>, vector<128x512xf32>, vector<8x512xf32> -> vector<8x512xf32>
    %438 = arith.addf %436, %437 : vector<8x512xf32>
    %439 = vector.extract_strided_slice %438 {offsets = [0, 0], sizes = [8, 128], strides = [1, 1]} : vector<8x512xf32> to vector<8x128xf32>
    %440 = arith.negf %439 : vector<8x128xf32>
    %441 = math.exp %440 : vector<8x128xf32>
    %cst_154 = arith.constant 1.000000e+00 : f32
    %442 = vector.broadcast %cst_154 : f32 to vector<8x128xf32>
    %443 = arith.addf %442, %441 : vector<8x128xf32>
    %444 = arith.divf %442, %443 : vector<8x128xf32>
    %445 = vector.extract_strided_slice %438 {offsets = [0, 128], sizes = [8, 128], strides = [1, 1]} : vector<8x512xf32> to vector<8x128xf32>
    %446 = arith.negf %445 : vector<8x128xf32>
    %447 = math.exp %446 : vector<8x128xf32>
    %cst_155 = arith.constant 1.000000e+00 : f32
    %448 = vector.broadcast %cst_155 : f32 to vector<8x128xf32>
    %449 = arith.addf %448, %447 : vector<8x128xf32>
    %450 = arith.divf %448, %449 : vector<8x128xf32>
    %451 = vector.extract_strided_slice %438 {offsets = [0, 256], sizes = [8, 128], strides = [1, 1]} : vector<8x512xf32> to vector<8x128xf32>
    %452 = math.tanh %451 : vector<8x128xf32>
    %453 = vector.extract_strided_slice %438 {offsets = [0, 384], sizes = [8, 128], strides = [1, 1]} : vector<8x512xf32> to vector<8x128xf32>
    %454 = arith.negf %453 : vector<8x128xf32>
    %455 = math.exp %454 : vector<8x128xf32>
    %cst_156 = arith.constant 1.000000e+00 : f32
    %456 = vector.broadcast %cst_156 : f32 to vector<8x128xf32>
    %457 = arith.addf %456, %455 : vector<8x128xf32>
    %458 = arith.divf %456, %457 : vector<8x128xf32>
    %459 = arith.mulf %450, %431 : vector<8x128xf32>
    %460 = arith.mulf %444, %452 : vector<8x128xf32>
    %461 = arith.addf %459, %460 : vector<8x128xf32>
    %462 = math.tanh %461 : vector<8x128xf32>
    %463 = arith.mulf %458, %462 : vector<8x128xf32>
    %c40_157 = arith.constant 40 : index
    %c0_158 = arith.constant 0 : index
    %464 = vector.load %arg10[%c40_157, %c0_158] : memref<64x512xf32, #tpu.memory_space<vmem>>, vector<8x512xf32>
    %c16_159 = arith.constant 16 : index
    %c0_160 = arith.constant 0 : index
    %465 = vector.load %arg10[%c16_159, %c0_160] : memref<64x512xf32, #tpu.memory_space<vmem>>, vector<8x512xf32>
    %466 = arith.select %18, %464, %465 : vector<8x512xi1>, vector<8x512xf32>
    %cst_161 = arith.constant dense<0.000000e+00> : vector<8x512xf32>
    %467 = tpu.matmul %463, %311, %cst_161 {dimension_numbers = #tpu.dot_dimension_numbers<[1], [0], [0], [1], [0, 0, 1, 1], [], []>} : vector<8x128xf32>, vector<128x512xf32>, vector<8x512xf32> -> vector<8x512xf32>
    %468 = arith.addf %466, %467 : vector<8x512xf32>
    %469 = vector.extract_strided_slice %468 {offsets = [0, 0], sizes = [8, 128], strides = [1, 1]} : vector<8x512xf32> to vector<8x128xf32>
    %470 = arith.negf %469 : vector<8x128xf32>
    %471 = math.exp %470 : vector<8x128xf32>
    %cst_162 = arith.constant 1.000000e+00 : f32
    %472 = vector.broadcast %cst_162 : f32 to vector<8x128xf32>
    %473 = arith.addf %472, %471 : vector<8x128xf32>
    %474 = arith.divf %472, %473 : vector<8x128xf32>
    %475 = vector.extract_strided_slice %468 {offsets = [0, 128], sizes = [8, 128], strides = [1, 1]} : vector<8x512xf32> to vector<8x128xf32>
    %476 = arith.negf %475 : vector<8x128xf32>
    %477 = math.exp %476 : vector<8x128xf32>
    %cst_163 = arith.constant 1.000000e+00 : f32
    %478 = vector.broadcast %cst_163 : f32 to vector<8x128xf32>
    %479 = arith.addf %478, %477 : vector<8x128xf32>
    %480 = arith.divf %478, %479 : vector<8x128xf32>
    %481 = vector.extract_strided_slice %468 {offsets = [0, 256], sizes = [8, 128], strides = [1, 1]} : vector<8x512xf32> to vector<8x128xf32>
    %482 = math.tanh %481 : vector<8x128xf32>
    %483 = vector.extract_strided_slice %468 {offsets = [0, 384], sizes = [8, 128], strides = [1, 1]} : vector<8x512xf32> to vector<8x128xf32>
    %484 = arith.negf %483 : vector<8x128xf32>
    %485 = math.exp %484 : vector<8x128xf32>
    %cst_164 = arith.constant 1.000000e+00 : f32
    %486 = vector.broadcast %cst_164 : f32 to vector<8x128xf32>
    %487 = arith.addf %486, %485 : vector<8x128xf32>
    %488 = arith.divf %486, %487 : vector<8x128xf32>
    %489 = arith.mulf %480, %461 : vector<8x128xf32>
    %490 = arith.mulf %474, %482 : vector<8x128xf32>
    %491 = arith.addf %489, %490 : vector<8x128xf32>
    %492 = math.tanh %491 : vector<8x128xf32>
    %493 = arith.mulf %488, %492 : vector<8x128xf32>
    %c48_165 = arith.constant 48 : index
    %c0_166 = arith.constant 0 : index
    %494 = vector.load %arg10[%c48_165, %c0_166] : memref<64x512xf32, #tpu.memory_space<vmem>>, vector<8x512xf32>
    %c8_167 = arith.constant 8 : index
    %c0_168 = arith.constant 0 : index
    %495 = vector.load %arg10[%c8_167, %c0_168] : memref<64x512xf32, #tpu.memory_space<vmem>>, vector<8x512xf32>
    %496 = arith.select %18, %494, %495 : vector<8x512xi1>, vector<8x512xf32>
    %cst_169 = arith.constant dense<0.000000e+00> : vector<8x512xf32>
    %497 = tpu.matmul %493, %311, %cst_169 {dimension_numbers = #tpu.dot_dimension_numbers<[1], [0], [0], [1], [0, 0, 1, 1], [], []>} : vector<8x128xf32>, vector<128x512xf32>, vector<8x512xf32> -> vector<8x512xf32>
    %498 = arith.addf %496, %497 : vector<8x512xf32>
    %499 = vector.extract_strided_slice %498 {offsets = [0, 0], sizes = [8, 128], strides = [1, 1]} : vector<8x512xf32> to vector<8x128xf32>
    %500 = arith.negf %499 : vector<8x128xf32>
    %501 = math.exp %500 : vector<8x128xf32>
    %cst_170 = arith.constant 1.000000e+00 : f32
    %502 = vector.broadcast %cst_170 : f32 to vector<8x128xf32>
    %503 = arith.addf %502, %501 : vector<8x128xf32>
    %504 = arith.divf %502, %503 : vector<8x128xf32>
    %505 = vector.extract_strided_slice %498 {offsets = [0, 128], sizes = [8, 128], strides = [1, 1]} : vector<8x512xf32> to vector<8x128xf32>
    %506 = arith.negf %505 : vector<8x128xf32>
    %507 = math.exp %506 : vector<8x128xf32>
    %cst_171 = arith.constant 1.000000e+00 : f32
    %508 = vector.broadcast %cst_171 : f32 to vector<8x128xf32>
    %509 = arith.addf %508, %507 : vector<8x128xf32>
    %510 = arith.divf %508, %509 : vector<8x128xf32>
    %511 = vector.extract_strided_slice %498 {offsets = [0, 256], sizes = [8, 128], strides = [1, 1]} : vector<8x512xf32> to vector<8x128xf32>
    %512 = math.tanh %511 : vector<8x128xf32>
    %513 = vector.extract_strided_slice %498 {offsets = [0, 384], sizes = [8, 128], strides = [1, 1]} : vector<8x512xf32> to vector<8x128xf32>
    %514 = arith.negf %513 : vector<8x128xf32>
    %515 = math.exp %514 : vector<8x128xf32>
    %cst_172 = arith.constant 1.000000e+00 : f32
    %516 = vector.broadcast %cst_172 : f32 to vector<8x128xf32>
    %517 = arith.addf %516, %515 : vector<8x128xf32>
    %518 = arith.divf %516, %517 : vector<8x128xf32>
    %519 = arith.mulf %510, %491 : vector<8x128xf32>
    %520 = arith.mulf %504, %512 : vector<8x128xf32>
    %521 = arith.addf %519, %520 : vector<8x128xf32>
    %522 = math.tanh %521 : vector<8x128xf32>
    %523 = arith.mulf %518, %522 : vector<8x128xf32>
    %c56_173 = arith.constant 56 : index
    %c0_174 = arith.constant 0 : index
    %524 = vector.load %arg10[%c56_173, %c0_174] : memref<64x512xf32, #tpu.memory_space<vmem>>, vector<8x512xf32>
    %c0_175 = arith.constant 0 : index
    %c0_176 = arith.constant 0 : index
    %525 = vector.load %arg10[%c0_175, %c0_176] : memref<64x512xf32, #tpu.memory_space<vmem>>, vector<8x512xf32>
    %526 = arith.select %18, %524, %525 : vector<8x512xi1>, vector<8x512xf32>
    %cst_177 = arith.constant dense<0.000000e+00> : vector<8x512xf32>
    %527 = tpu.matmul %523, %311, %cst_177 {dimension_numbers = #tpu.dot_dimension_numbers<[1], [0], [0], [1], [0, 0, 1, 1], [], []>} : vector<8x128xf32>, vector<128x512xf32>, vector<8x512xf32> -> vector<8x512xf32>
    %528 = arith.addf %526, %527 : vector<8x512xf32>
    %529 = vector.extract_strided_slice %528 {offsets = [0, 0], sizes = [8, 128], strides = [1, 1]} : vector<8x512xf32> to vector<8x128xf32>
    %530 = arith.negf %529 : vector<8x128xf32>
    %531 = math.exp %530 : vector<8x128xf32>
    %cst_178 = arith.constant 1.000000e+00 : f32
    %532 = vector.broadcast %cst_178 : f32 to vector<8x128xf32>
    %533 = arith.addf %532, %531 : vector<8x128xf32>
    %534 = arith.divf %532, %533 : vector<8x128xf32>
    %535 = vector.extract_strided_slice %528 {offsets = [0, 128], sizes = [8, 128], strides = [1, 1]} : vector<8x512xf32> to vector<8x128xf32>
    %536 = arith.negf %535 : vector<8x128xf32>
    %537 = math.exp %536 : vector<8x128xf32>
    %cst_179 = arith.constant 1.000000e+00 : f32
    %538 = vector.broadcast %cst_179 : f32 to vector<8x128xf32>
    %539 = arith.addf %538, %537 : vector<8x128xf32>
    %540 = arith.divf %538, %539 : vector<8x128xf32>
    %541 = vector.extract_strided_slice %528 {offsets = [0, 256], sizes = [8, 128], strides = [1, 1]} : vector<8x512xf32> to vector<8x128xf32>
    %542 = math.tanh %541 : vector<8x128xf32>
    %543 = vector.extract_strided_slice %528 {offsets = [0, 384], sizes = [8, 128], strides = [1, 1]} : vector<8x512xf32> to vector<8x128xf32>
    %544 = arith.negf %543 : vector<8x128xf32>
    %545 = math.exp %544 : vector<8x128xf32>
    %cst_180 = arith.constant 1.000000e+00 : f32
    %546 = vector.broadcast %cst_180 : f32 to vector<8x128xf32>
    %547 = arith.addf %546, %545 : vector<8x128xf32>
    %548 = arith.divf %546, %547 : vector<8x128xf32>
    %549 = arith.mulf %540, %521 : vector<8x128xf32>
    %550 = arith.mulf %534, %542 : vector<8x128xf32>
    %551 = arith.addf %549, %550 : vector<8x128xf32>
    %552 = math.tanh %551 : vector<8x128xf32>
    %553 = arith.mulf %548, %552 : vector<8x128xf32>
    %554 = arith.select %21, %553, %343 : vector<8x128xi1>, vector<8x128xf32>
    %c0_181 = arith.constant 0 : index
    %c0_182 = arith.constant 0 : index
    %555 = vector.load %arg7[%c0_181, %c0_182] : memref<128x8xf32, #tpu.memory_space<vmem>>, vector<128x8xf32>
    %cst_183 = arith.constant dense<0.000000e+00> : vector<8x8xf32>
    %556 = tpu.matmul %554, %555, %cst_183 {dimension_numbers = #tpu.dot_dimension_numbers<[1], [0], [0], [1], [0, 0, 1, 1], [], []>} : vector<8x128xf32>, vector<128x8xf32>, vector<8x8xf32> -> vector<8x8xf32>
    %c0_184 = arith.constant 0 : index
    %c0_185 = arith.constant 0 : index
    %557 = vector.load %arg8[%c0_184, %c0_185] : memref<1x8xf32, #tpu.memory_space<vmem>>, vector<1x8xf32>
    %558 = vector.broadcast %557 : vector<1x8xf32> to vector<8x8xf32>
    %559 = arith.addf %556, %558 : vector<8x8xf32>
    %c0_186 = arith.constant 0 : index
    %c0_187 = arith.constant 0 : index
    %560 = vector.load %arg9[%c0_186, %c0_187] : memref<8x8xf32, #tpu.memory_space<vmem>>, vector<8x8xf32>
    tpu.vector_store %arg9[%c0_186, %c0_187], %559 {strides = array<i32>} : memref<8x8xf32, #tpu.memory_space<vmem>>, vector<8x8xf32>,
    return
  }
}

</mosaic_0001>

<bundles_post_ra>
// kernel: tpu_custom_call.1
= control target key start
LH: loop header
LB: loop body
LE: loop exit
PB: predicated region body
PF: predicated region fallthrough
CT: control target
= control target key end

     0   :  { %14 = vsyncpa [#allocation5], 0  ;;  %s6523_s0 = inlined_call_operand.vmem [shape: f32[64,16], index: 0, kind: input, shape index: {}]   ;;  %s6524_s1 = inlined_call_operand.vmem [shape: f32[16,512], index: 1, kind: input, shape index: {}]   ;;  %s6525_s2 = inlined_call_operand.hbm [shape: f32[128,512], index: 2, kind: input, shape index: {}]   ;;  %s6526_s3 = inlined_call_operand.vmem [shape: f32[1,512], index: 3, kind: input, shape index: {}]   ;;  %s6527_s4 = inlined_call_operand.hbm [shape: f32[64,512], index: 4, kind: input, shape index: {}]   ;;  %s6528_s5 = inlined_call_operand.hbm [shape: f32[128,512], index: 5, kind: input, shape index: {}]   ;;  %s6529_s6 = inlined_call_operand.vmem [shape: f32[1,512], index: 6, kind: input, shape index: {}]   ;;  %s6530_s7 = inlined_call_operand.vmem [shape: f32[128,8], index: 7, kind: input, shape index: {}]   ;;  %s6531_s8 = inlined_call_operand.vmem [shape: f32[1,8], index: 8, kind: input, shape index: {}]   ;;  %s6532_s9 = inlined_call_operand.hbm [shape: f32[8,8], index: 9, kind: output, shape index: {}]  }
   0x1   :  { %15 = vsyncpa [#allocation8], 0 }
   0x2   :  { %16 = vsyncpa [#allocation6], 0  ;;  %s40_s11 = sshll.u32 %s6527_s4, 4  ;;  %s3992_s12 = smov [#allocation7]   ;;  %s41_s11 = int_to_ptr.hbm [resolvable:$true] %s40_s11 }
   0x3   :  { %s42_s13 = sshll.u32 %s3992_s12, 4  ;;  %s25_s16 = sshll.u32 %s6525_s2, 4  ;;  %s43_s13 = int_to_ptr.vmem [resolvable:$true] %s42_s13  ;;  %s26_s16 = int_to_ptr.hbm [resolvable:$true] %s25_s16 }
   0x4   :  { %s3993_s17 = smov 512   ;;  %s3994_s18 = smov 32  }
   0x5   :  { %48 = dma.hbm_to_vmem [thread:$0]  %s41_s11, 4096, %s43_s13, [#allocation8], %s3993_s17, %s3993_s17, %s3994_s18  }
   0x6   :  { %s3995_s19 = smov [#allocation4]   ;;  %s53_s23 = sshll.u32 %s6528_s5, 4  ;;  %s54_s23 = int_to_ptr.hbm [resolvable:$true] %s53_s23 }
   0x7   :  { %s27_s20 = sshll.u32 %s3995_s19, 4  ;;  %s3996_s4 = smov [#allocation9]   ;;  %s28_s20 = int_to_ptr.vmem [resolvable:$true] %s27_s20 }
   0x8   :  { %33 = dma.hbm_to_vmem [thread:$0]  %s26_s16, 8192, %s28_s20, [#allocation5], %s3993_s17, %s3993_s17, %s3994_s18  }
   0x9   :  { %s55_s24 = sshll.u32 %s3996_s4, 4  ;;  %s56_s24 = int_to_ptr.vmem [resolvable:$true] %s55_s24 }
   0xa   :  { %61 = dma.hbm_to_vmem [thread:$0]  %s54_s23, 8192, %s56_s24, [#allocation8], %s3993_s17, %s3993_s17, %s3994_s18  }
   0xb   :  { %3986 = dma.done.wait [#allocation5], 8192  }
   0xc   :  { %3987 = vsyncadd [#allocation5], 4294959104 }
   0xd   :  { %3988 = dma.done.wait [#allocation8], 12288  }
   0xe   :  { %3989 = vsyncadd [#allocation8], 4294955008  ;;  %v150_v0 = vld [vmem:[%s6524_s1 + $0x20] sm:$0xff]  ;;  %vm164_vm0 = vcmask 130048   ;;  %v4070_v3 = vld [vmem:[%s6523_s0 + $0x28] sm:$0xff]  ;;  %s3998_s15 = smov [#allocation10]  }
   0xf   :  { %v146_v1 = vld [vmem:[%s6524_s1] sm:$0xff]  ;;  %203 = vmatpush.msra.mxu0 %v150_v0  ;;  %3487 = vmatpush.msra.mxu1 %v150_v0  ;;  %v4075_v4 = vld [vmem:[%s6523_s0 + $0x30] sm:$0xff]  ;;  %v4080_v5 = vld [vmem:[%s6523_s0 + $0x38] sm:$0xff]  ;;  %s3362_s16 = sshll.u32 %s3998_s15, 4  ;;  %s3364_s19 = sshll.u32 %s6532_s9, 4  ;;  %s3363_s16 = int_to_ptr.vmem [resolvable:$true] %s3362_s16  ;;  %s3365_s19 = int_to_ptr.hbm [resolvable:$true] %s3364_s19 }
  0x10   :  { %3488 = vmatpush.msra.mxu2 %v150_v0  ;;  %3489 = vmatpush.msra.mxu3 %v150_v0  ;;  %v138_v2 = vld [vmem:[%s6523_s0] sm:$0xff]  ;;  %v151_v6 = vld [vmem:[%s6524_s1 + $0x28] sm:$0xff]  ;;  %v152_v7 = vld [vmem:[%s6524_s1 + $0x30] sm:$0xff] }
  0x11   :  { %204 = vmatpush.msra.mxu0 %v146_v1  ;;  %3490 = vmatpush.msra.mxu1 %v146_v1  ;;  %v153_v8 = vld [vmem:[%s6524_s1 + $0x38] sm:$0xff]  ;;  %v4094_v9 = vld [vmem:[#allocation4 + $0x1e0] sm:$0xff]  ;;  %v147_v10 = vld [vmem:[%s6524_s1 + $0x8] sm:$0xff] }
  0x12   :  { %3491 = vmatpush.msra.mxu2 %v146_v1  ;;  %3492 = vmatpush.msra.mxu3 %v146_v1  ;;  %v148_v11 = vld [vmem:[%s6524_s1 + $0x10] sm:$0xff]  ;;  %v149_v12 = vld [vmem:[%s6524_s1 + $0x18] sm:$0xff]  ;;  %v4109_v13 = vld [vmem:[#allocation4 + $0x1e8] sm:$0xff] }
  0x13   :  { %3375 = vmatmul.msk.f32.vlgmr.msra.gmra.mxu0 %vm164_vm0, %v138_v2  ;;  %3380 = vmatmul.msk.f32.vlgmr.msra.gmra.mxu1 %vm164_vm0, %v4070_v3  ;;  %v4112_v14 = vld [vmem:[#allocation4 + $0x1c0] sm:$0xff]  ;;  %v4114_v15 = vld [vmem:[#allocation4 + $0x1f8] sm:$0xff]  ;;  %v4116_v16 = vld [vmem:[#allocation4 + $0x1c8] sm:$0xff] }
  0x14   :  { %3381 = vmatmul.msk.f32.vlgmr.msra.gmra.mxu2 %vm164_vm0, %v4075_v4  ;;  %3382 = vmatmul.msk.f32.vlgmr.msra.gmra.mxu3 %vm164_vm0, %v4080_v5  ;;  %v4118_v17 = vld [vmem:[#allocation4 + $0x1f0] sm:$0xff]  ;;  %v139_v18 = vld [vmem:[%s6523_s0 + $0x8] sm:$0xff]  ;;  %v4127_v19 = vld [vmem:[#allocation4 + $0x1a0] sm:$0xff] }
  0x15   :  { %244 = vmatpush.msrb.mxu1 %v151_v6  ;;  %285 = vmatpush.msrb.mxu2 %v152_v7  ;;  %v4129_v20 = vld [vmem:[#allocation4 + $0x1a8] sm:$0xff]  ;;  %v4134_v21 = vld [vmem:[#allocation4 + $0x1d8] sm:$0xff]  ;;  %v4136_v22 = vld [vmem:[#allocation4 + $0x1d0] sm:$0xff] }
  0x16   :  { %326 = vmatpush.msrb.mxu3 %v153_v8  ;;  %461 = vmatpush.msrb.mxu0 %v4094_v9  ;;  %v4140_v23 = vld [vmem:[#allocation4 + $0x180] sm:$0xff]  ;;  %v4142_v24 = vld [vmem:[#allocation4 + $0x188] sm:$0xff]  ;;  %v4146_v25 = vld [vmem:[#allocation4 + $0x1b8] sm:$0xff] }
  0x17   :  { %245 = vmatpush.msrb.mxu1 %v147_v10  ;;  %286 = vmatpush.msrb.mxu2 %v148_v11  ;;  %v4148_v26 = vld [vmem:[#allocation4 + $0x1b0] sm:$0xff]  ;;  %v4150_v27 = vld [vmem:[#allocation4 + $0x160] sm:$0xff]  ;;  %v4153_v28 = vld [vmem:[#allocation4 + $0x168] sm:$0xff] }
  0x18   :  { %327 = vmatpush.msrb.mxu3 %v149_v12  ;;  %462 = vmatpush.msrb.mxu0 %v4112_v14  ;;  %v4158_v29 = vld [vmem:[#allocation4 + $0x198] sm:$0xff]  ;;  %v4160_v30 = vld [vmem:[#allocation4 + $0x190] sm:$0xff]  ;;  %v4169_v32 = vld [vmem:[#allocation4 + $0x140] sm:$0xff] }
  0x19   :  { %481 = vmatpush.msra.mxu1 %v4109_v13  ;;  %501 = vmatpush.msra.mxu2 %v4118_v17  ;;  %v140_v31 = vld [vmem:[%s6523_s0 + $0x10] sm:$0xff]  ;;  %v4172_v33 = vld [vmem:[#allocation4 + $0x148] sm:$0xff]  ;;  %v4177_v34 = vld [vmem:[#allocation4 + $0x178] sm:$0xff] }
  0x1a   :  { %521 = vmatpush.msra.mxu3 %v4114_v15  ;;  %463 = vmatpush.msrb.mxu0 %v4127_v19  ;;  %v4179_v35 = vld [vmem:[#allocation4 + $0x170] sm:$0xff]  ;;  %v4183_v36 = vld [vmem:[#allocation4 + $0x120] sm:$0xff]  ;;  %v4185_v37 = vld [vmem:[#allocation4 + $0x128] sm:$0xff] }
  0x1b   :  { %482 = vmatpush.msra.mxu1 %v4116_v16  ;;  %3376 = vmatmul.msk.f32.gmra.mxu0 %vm164_vm0, %v139_v18  ;;  %v4189_v38 = vld [vmem:[#allocation4 + $0x158] sm:$0xff]  ;;  %v4191_v39 = vld [vmem:[#allocation4 + $0x150] sm:$0xff]  ;;  %v4193_v40 = vld [vmem:[#allocation4 + $0x100] sm:$0xff] }
  0x1c   :  { %3383 = vmatmul.msk.f32.vlgmr.msrb.gmra.mxu1 %vm164_vm0, %v138_v2  ;;  %3391 = vmatmul.msk.f32.vlgmr.msrb.gmra.mxu2 %vm164_vm0, %v138_v2  ;;  %v4196_v41 = vld [vmem:[#allocation4 + $0x108] sm:$0xff]  ;;  %v4201_v42 = vld [vmem:[#allocation4 + $0x138] sm:$0xff]  ;;  %v4203_v43 = vld [vmem:[#allocation4 + $0x130] sm:$0xff] }
  0x1d   :  { %3399 = vmatmul.msk.f32.vlgmr.msrb.gmra.mxu3 %vm164_vm0, %v138_v2  ;;  %483 = vmatpush.msra.mxu1 %v4129_v20  ;;  %v141_v44 = vld [vmem:[%s6523_s0 + $0x18] sm:$0xff]  ;;  %v4212_v45 = vld [vmem:[#allocation4 + $0xe0] sm:$0xff]  ;;  %v4215_v46 = vld [vmem:[#allocation4 + $0xe8] sm:$0xff] }
  0x1e   :  { %522 = vmatpush.msra.mxu3 %v4134_v21  ;;  %502 = vmatpush.msra.mxu2 %v4136_v22  ;;  %6810 = vst [vmem:[#allocation14_spill] sm:$0xff] %v4212_v45  ;;  %v4220_v47 = vld [vmem:[#allocation4 + $0x118] sm:$0xff]  ;;  %v4222_v48 = vld [vmem:[#allocation4 + $0x110] sm:$0xff]  ;;  %v4226_v49 = vld [vmem:[#allocation4 + $0xc0] sm:$0xff] }
  0x1f   :  { %464 = vmatpush.msrb.mxu0 %v4140_v23  ;;  %484 = vmatpush.msra.mxu1 %v4142_v24  ;;  %6811 = vst [vmem:[#allocation15_spill] sm:$0xff] %v4215_v46  ;;  %v4228_v50 = vld [vmem:[#allocation4 + $0xc8] sm:$0xff]  ;;  %v4232_v51 = vld [vmem:[#allocation4 + $0xf8] sm:$0xff]  ;;  %v4234_v52 = vld [vmem:[#allocation4 + $0xf0] sm:$0xff] }
  0x20   :  { %523 = vmatpush.msra.mxu3 %v4146_v25  ;;  %503 = vmatpush.msra.mxu2 %v4148_v26  ;;  %6812 = vst [vmem:[#allocation16_spill] sm:$0xff] %v4220_v47  ;;  %v4236_v53 = vld [vmem:[#allocation4 + $0xa0] sm:$0xff]  ;;  %v4239_v54 = vld [vmem:[#allocation4 + $0xa8] sm:$0xff]  ;;  %v4244_v55 = vld [vmem:[#allocation4 + $0xd8] sm:$0xff] }
  0x21   :  { %465 = vmatpush.msrb.mxu0 %v4150_v27  ;;  %485 = vmatpush.msra.mxu1 %v4153_v28  ;;  %6813 = vst [vmem:[#allocation17_spill] sm:$0xff] %v4226_v49  ;;  %v4246_v56 = vld [vmem:[#allocation4 + $0xd0] sm:$0xff]  ;;  %v4248_v57 = vld [vmem:[#allocation4 + $0x80] sm:$0xff]  ;;  %v4263_v60 = vld [vmem:[#allocation4 + $0x88] sm:$0xff] }
  0x22   :  { %524 = vmatpush.msra.mxu3 %v4158_v29  ;;  %504 = vmatpush.msra.mxu2 %v4160_v30  ;;  %6814 = vst [vmem:[#allocation18_spill] sm:$0xff] %v4228_v50  ;;  %v142_v58 = vld [vmem:[%s6523_s0 + $0x20] sm:$0xff]  ;;  %v4265_v61 = vld [vmem:[#allocation4 + $0xb8] sm:$0xff]  ;;  %v4271_v63 = vld [vmem:[#allocation4 + $0xb0] sm:$0xff] }
  0x23   :  { %3377 = vmatmul.msk.f32.gmra.mxu0 %vm164_vm0, %v140_v31  ;;  %486 = vmatpush.msra.mxu1 %v4172_v33  ;;  %6815 = vst [vmem:[#allocation19_spill] sm:$0xff] %v4232_v51  ;;  %v4257_v59 = vld [vmem:[#allocation4 + $0x60] sm:$0xff]  ;;  %v4275_v0 = vld [vmem:[#allocation4 + $0x68] sm:$0xff]  ;;  %v4277_v1 = vld [vmem:[#allocation4 + $0x98] sm:$0xff] }
  0x24   :  { %3384 = vmatmul.msk.f32.gmra.mxu1 %vm164_vm0, %v139_v18  ;;  %3392 = vmatmul.msk.f32.gmra.mxu2 %vm164_vm0, %v139_v18  ;;  %6816 = vst [vmem:[#allocation20_spill] sm:$0xff] %v4234_v52  ;;  %v4269_v62 = vld [vmem:[#allocation4 + $0x40] sm:$0xff]  ;;  %v4283_v6 = vld [vmem:[#allocation4 + $0x90] sm:$0xff]  ;;  %v4286_v7 = vld [vmem:[#allocation4 + $0x48] sm:$0xff] }
  0x25   :  { %3400 = vmatmul.msk.f32.gmra.mxu3 %vm164_vm0, %v139_v18  ;;  %466 = vmatpush.msrb.mxu0 %v4169_v32  ;;  %6817 = vst [vmem:[#allocation21_spill] sm:$0xff] %v4236_v53  ;;  %v4279_v2 = vld [vmem:[#allocation4 + $0x20] sm:$0xff]  ;;  %v4289_v8 = vld [vmem:[#allocation4 + $0x78] sm:$0xff]  ;;  %v4299_v11 = vld [vmem:[#allocation4 + $0x28] sm:$0xff] }
  0x26   :  { %525 = vmatpush.msra.mxu3 %v4177_v34  ;;  %505 = vmatpush.msra.mxu2 %v4179_v35  ;;  %6818 = vst [vmem:[#allocation22_spill] sm:$0xff] %v4239_v54  ;;  %v4291_v10 = vld [vmem:[#allocation4] sm:$0xff]  ;;  %v4303_v12 = vld [vmem:[#allocation4 + $0x70] sm:$0xff]  ;;  %v4305_v18 = vld [vmem:[#allocation4 + $0x58] sm:$0xff] }
  0x27   :  { %467 = vmatpush.msrb.mxu0 %v4183_v36  ;;  %487 = vmatpush.msra.mxu1 %v4185_v37  ;;  %6819 = vst [vmem:[#allocation23_spill] sm:$0xff] %v4244_v55 }
  0x28   :  { %526 = vmatpush.msra.mxu3 %v4189_v38  ;;  %506 = vmatpush.msra.mxu2 %v4191_v39  ;;  %6820 = vst [vmem:[#allocation24_spill] sm:$0xff] %v4246_v56 }
  0x29   :  { %468 = vmatpush.msrb.mxu0 %v4193_v40  ;;  %488 = vmatpush.msra.mxu1 %v4196_v41  ;;  %6821 = vst [vmem:[#allocation25_spill] sm:$0xff] %v4248_v57 }
  0x2a   :  { %527 = vmatpush.msra.mxu3 %v4201_v42  ;;  %507 = vmatpush.msra.mxu2 %v4203_v43  ;;  %6822 = vst [vmem:[#allocation26_spill] sm:$0xff] %v4257_v59 }
  0x2b   :  { %3378 = vmatmul.msk.f32.gmra.mxu0 %vm164_vm0, %v141_v44  ;;  %489 = vmatpush.msra.mxu1 %v4215_v46  ;;  %6823 = vst [vmem:[#allocation27_spill] sm:$0xff] %v4263_v60 }
  0x2c   :  { %3385 = vmatmul.msk.f32.gmra.mxu1 %vm164_vm0, %v140_v31  ;;  %3393 = vmatmul.msk.f32.gmra.mxu2 %vm164_vm0, %v140_v31  ;;  %6824 = vst [vmem:[#allocation28_spill] sm:$0xff] %v4265_v61 }
  0x2d   :  { %3401 = vmatmul.msk.f32.gmra.mxu3 %vm164_vm0, %v140_v31  ;;  %469 = vmatpush.msrb.mxu0 %v4212_v45  ;;  %6825 = vst [vmem:[#allocation29_spill] sm:$0xff] %v4269_v62  ;;  %v6541_v31 = vmov 0.0  }
  0x2e   :  { %528 = vmatpush.msra.mxu3 %v4220_v47  ;;  %508 = vmatpush.msra.mxu2 %v4222_v48  ;;  %6826 = vst [vmem:[#allocation30_spill] sm:$0xff] %v4271_v63 }
  0x2f   :  { %470 = vmatpush.msrb.mxu0 %v4226_v49  ;;  %490 = vmatpush.msra.mxu1 %v4228_v50  ;;  %6827 = vst [vmem:[#allocation31_spill] sm:$0xff] %v4275_v0 }
  0x30   :  { %529 = vmatpush.msra.mxu3 %v4232_v51  ;;  %509 = vmatpush.msra.mxu2 %v4234_v52  ;;  %6828 = vst [vmem:[#allocation32_spill] sm:$0xff] %v4277_v1 }
  0x31   :  { %471 = vmatpush.msrb.mxu0 %v4236_v53  ;;  %491 = vmatpush.msra.mxu1 %v4239_v54  ;;  %6829 = vst [vmem:[#allocation33_spill] sm:$0xff] %v4279_v2 }
  0x32   :  { %530 = vmatpush.msra.mxu3 %v4244_v55  ;;  %510 = vmatpush.msra.mxu2 %v4246_v56  ;;  %6830 = vst [vmem:[#allocation34_spill] sm:$0xff] %v4283_v6 }
  0x33   :  { %472 = vmatpush.msrb.mxu0 %v4248_v57  ;;  %492 = vmatpush.msra.mxu1 %v4263_v60  ;;  %6831 = vst [vmem:[#allocation35_spill] sm:$0xff] %v4286_v7 }
  0x34   :  { %3386 = vmatmul.msk.f32.gmra.mxu1 %vm164_vm0, %v141_v44  ;;  %3379 = vmatmul.msk.f32.gmra.mxu0 %vm164_vm0, %v142_v58  ;;  %6832 = vst [vmem:[#allocation36_spill] sm:$0xff] %v4289_v8 }
  0x35   :  { %3394 = vmatmul.msk.f32.gmra.mxu2 %vm164_vm0, %v141_v44  ;;  %3402 = vmatmul.msk.f32.gmra.mxu3 %vm164_vm0, %v141_v44  ;;  %6833 = vst [vmem:[#allocation37_spill] sm:$0xff] %v4291_v10  ;;  %v4309_v44 = vld [vmem:[#allocation4 + $0x8] sm:$0xff] }
  0x36   :  { %473 = vmatpush.msrb.mxu0 %v4257_v59  ;;  %531 = vmatpush.msra.mxu3 %v4265_v61  ;;  %6834 = vst [vmem:[#allocation38_spill] sm:$0xff] %v4299_v11 }
  0x37   :  { %511 = vmatpush.msra.mxu2 %v4271_v63  ;;  %493 = vmatpush.msra.mxu1 %v4275_v0  ;;  %6835 = vst [vmem:[#allocation39_spill] sm:$0xff] %v4303_v12 }
  0x38   :  { %474 = vmatpush.msrb.mxu0 %v4269_v62  ;;  %532 = vmatpush.msra.mxu3 %v4277_v1  ;;  %6836 = vst [vmem:[#allocation40_spill] sm:$0xff] %v4305_v18 }
  0x39   :  { %512 = vmatpush.msra.mxu2 %v4283_v6  ;;  %494 = vmatpush.msra.mxu1 %v4286_v7  ;;  %6837 = vst [vmem:[#allocation41_spill] sm:$0xff] %v4309_v44  ;;  %v4320_v7 = vld [vmem:[#allocation4 + $0x30] sm:$0xff] }
  0x3a   :  { %475 = vmatpush.msrb.mxu0 %v4279_v2  ;;  %533 = vmatpush.msra.mxu3 %v4289_v8  ;;  %v4313_v2 = vld [vmem:[#allocation4 + $0x50] sm:$0xff]  ;;  %6840 = vst [vmem:[#allocation44_spill] sm:$0xff] %v4320_v7  ;;  %v4322_v8 = vld [vmem:[#allocation4 + $0x18] sm:$0xff] }
  0x3b   :  { %495 = vmatpush.msra.mxu1 %v4299_v11  ;;  %6838 = vst [vmem:[#allocation42_spill] sm:$0xff] %v4313_v2  ;;  %513 = vmatpush.msra.mxu2 %v4303_v12 }
  0x3c   :  { %476 = vmatpush.msrb.mxu0 %v4291_v10  ;;  %3387 = vmatmul.msk.f32.gmra.mxu1 %vm164_vm0, %v142_v58  ;;  %v4315_v10 = vld [vmem:[#allocation4 + $0x38] sm:$0xff]  ;;  %6841 = vst [vmem:[#allocation45_spill] sm:$0xff] %v4322_v8 }
  0x3d   :  { %3395 = vmatmul.msk.f32.gmra.mxu2 %vm164_vm0, %v142_v58  ;;  %477 = vmatmul.f32.vlgmr.msrb.gmra.mxu0 %v6541_v31  ;;  %6839 = vst [vmem:[#allocation43_spill] sm:$0xff] %v4315_v10 }
  0x3e   :  { %3403 = vmatmul.msk.f32.gmra.mxu3 %vm164_vm0, %v142_v58  ;;  %496 = vmatpush.msra.mxu1 %v4309_v44  ;;  %v4330_v58 = vld [vmem:[#allocation4 + $0x10] sm:$0xff] }
  0x3f   :  { %534 = vmatpush.msra.mxu3 %v4305_v18  ;;  %624 = vmatpush.msra.mxu0 %v4094_v9  ;;  %6842 = vst [vmem:[#allocation46_spill] sm:$0xff] %v4330_v58 }
  0x40   :  { %514 = vmatpush.msra.mxu2 %v4313_v2  ;;  %644 = vmatpush.msrb.mxu1 %v4109_v13 }
  0x41   :  { %535 = vmatpush.msra.mxu3 %v4315_v10  ;;  %625 = vmatpush.msra.mxu0 %v4112_v14 }
  0x42   :  { %515 = vmatpush.msra.mxu2 %v4320_v7  ;;  %645 = vmatpush.msrb.mxu1 %v4116_v16 }
  0x43   :  { %536 = vmatpush.msra.mxu3 %v4322_v8  ;;  %626 = vmatpush.msra.mxu0 %v4127_v19 }
  0x44   :  { %3388 = vmatmul.msk.f32.gmra.mxu1 %vm164_vm0, %v4070_v3  ;;  %516 = vmatpush.msra.mxu2 %v4330_v58 }
  0x45   :  { %684 = vmatpush.msrb.mxu3 %v4114_v15  ;;  %3396 = vmatmul.msk.f32.gmra.mxu2 %vm164_vm0, %v4070_v3 }
  0x46   :  { %3404 = vmatmul.msk.f32.gmra.mxu3 %vm164_vm0, %v4070_v3  ;;  %664 = vmatpush.msrb.mxu2 %v4118_v17  ;;  %v6843_v3 = vld [vmem:[#allocation36_spill] sm:$0xff] }
  0x47   :  { %685 = vmatpush.msrb.mxu3 %v4134_v21  ;;  %646 = vmatpush.msrb.mxu1 %v4129_v20 }
  0x48   :  { %665 = vmatpush.msrb.mxu2 %v4136_v22  ;;  %627 = vmatpush.msra.mxu0 %v4140_v23 }
  0x49   :  { %686 = vmatpush.msrb.mxu3 %v4146_v25  ;;  %647 = vmatpush.msrb.mxu1 %v4142_v24 }
  0x4a   :  { %666 = vmatpush.msrb.mxu2 %v4148_v26  ;;  %628 = vmatpush.msra.mxu0 %v4150_v27 }
  0x4b   :  { %687 = vmatpush.msrb.mxu3 %v4158_v29  ;;  %648 = vmatpush.msrb.mxu1 %v4153_v28 }
  0x4c   :  { %3389 = vmatmul.msk.f32.gmra.mxu1 %vm164_vm0, %v4075_v4  ;;  %667 = vmatpush.msrb.mxu2 %v4160_v30 }
  0x4d   :  { %3397 = vmatmul.msk.f32.gmra.mxu2 %vm164_vm0, %v4075_v4  ;;  %688 = vmatpush.msrb.mxu3 %v4177_v34 }
  0x4e   :  { %3405 = vmatmul.msk.f32.gmra.mxu3 %vm164_vm0, %v4075_v4  ;;  %629 = vmatpush.msra.mxu0 %v4169_v32  ;;  %v6844_v4 = vld [vmem:[#allocation35_spill] sm:$0xff] }
  0x4f   :  { %668 = vmatpush.msrb.mxu2 %v4179_v35  ;;  %649 = vmatpush.msrb.mxu1 %v4172_v33 }
  0x50   :  { %689 = vmatpush.msrb.mxu3 %v4189_v38  ;;  %630 = vmatpush.msra.mxu0 %v4183_v36 }
  0x51   :  { %669 = vmatpush.msrb.mxu2 %v4191_v39  ;;  %650 = vmatpush.msrb.mxu1 %v4185_v37 }
  0x52   :  { %690 = vmatpush.msrb.mxu3 %v4201_v42  ;;  %631 = vmatpush.msra.mxu0 %v4193_v40 }
  0x53   :  { %670 = vmatpush.msrb.mxu2 %v4203_v43  ;;  %651 = vmatpush.msrb.mxu1 %v4196_v41 }
  0x54   :  { %3390 = vmatmul.msk.f32.gmra.mxu1 %vm164_vm0, %v4080_v5  ;;  %691 = vmatpush.msrb.mxu3 %v4220_v47 }
  0x55   :  { %3398 = vmatmul.msk.f32.gmra.mxu2 %vm164_vm0, %v4080_v5  ;;  %632 = vmatpush.msra.mxu0 %v4212_v45 }
  0x56   :  { %3406 = vmatmul.msk.f32.gmra.mxu3 %vm164_vm0, %v4080_v5  ;;  %671 = vmatpush.msrb.mxu2 %v4222_v48  ;;  %v6845_v5 = vld [vmem:[#allocation33_spill] sm:$0xff] }
  0x57   :  { %652 = vmatpush.msrb.mxu1 %v4215_v46  ;;  %692 = vmatpush.msrb.mxu3 %v4232_v51 }
  0x58   :  { %672 = vmatpush.msrb.mxu2 %v4234_v52  ;;  %633 = vmatpush.msra.mxu0 %v4226_v49 }
  0x59   :  { %653 = vmatpush.msrb.mxu1 %v4228_v50  ;;  %693 = vmatpush.msrb.mxu3 %v4244_v55 }
  0x5a   :  { %673 = vmatpush.msrb.mxu2 %v4246_v56  ;;  %634 = vmatpush.msra.mxu0 %v4236_v53 }
  0x5b   :  { %654 = vmatpush.msrb.mxu1 %v4239_v54  ;;  %694 = vmatpush.msrb.mxu3 %v4265_v61 }
  0x5c   :  { %497 = vmatmul.f32.vlgmr.msra.gmra.mxu1 %v6541_v31  ;;  %674 = vmatpush.msrb.mxu2 %v4271_v63 }
  0x5d   :  { %517 = vmatmul.f32.vlgmr.msra.gmra.mxu2 %v6541_v31  ;;  %635 = vmatpush.msra.mxu0 %v4248_v57 }
  0x5e   :  { %537 = vmatmul.f32.vlgmr.msra.gmra.mxu3 %v6541_v31  ;;  %655 = vmatpush.msrb.mxu1 %v4263_v60  ;;  %v6846_v31 = vld [vmem:[#allocation37_spill] sm:$0xff] }
  0x5f   :  { %675 = vmatpush.msrb.mxu2 %v4283_v6  ;;  %636 = vmatpush.msra.mxu0 %v4257_v59 }
  0x60   :  { %695 = vmatpush.msrb.mxu3 %v4277_v1  ;;  %656 = vmatpush.msrb.mxu1 %v4275_v0 }
  0x61   :  { %676 = vmatpush.msrb.mxu2 %v4303_v12  ;;  %637 = vmatpush.msra.mxu0 %v4269_v62 }
  0x62   :  { %696 = vmatpush.msrb.mxu3 %v6843_v3  ;;  %657 = vmatpush.msrb.mxu1 %v6844_v4 }
  0x63   :  { %677 = vmatpush.msrb.mxu2 %v4313_v2  ;;  %638 = vmatpush.msra.mxu0 %v6845_v5 }
  0x64   :  { %697 = vmatpush.msrb.mxu3 %v4305_v18  ;;  %658 = vmatpush.msrb.mxu1 %v4299_v11 }
  0x65   :  { %678 = vmatpush.msrb.mxu2 %v4320_v7  ;;  %639 = vmatpush.msra.mxu0 %v6846_v31 }
  0x66   :  { %698 = vmatpush.msrb.mxu3 %v4315_v10  ;;  %659 = vmatpush.msrb.mxu1 %v4309_v44 }
  0x67   :  { %679 = vmatpush.msrb.mxu2 %v4330_v58  ;;  %785 = vmatpush.msrb.mxu0 %v4094_v9 }
  0x68   :  { %699 = vmatpush.msrb.mxu3 %v4322_v8  ;;  %805 = vmatpush.msra.mxu1 %v4109_v13 }
  0x69   :  { %825 = vmatpush.msra.mxu2 %v4118_v17  ;;  %786 = vmatpush.msrb.mxu0 %v4112_v14 }
  0x6a   :  { %845 = vmatpush.msra.mxu3 %v4114_v15  ;;  %806 = vmatpush.msra.mxu1 %v4116_v16 }
  0x6b   :  { %826 = vmatpush.msra.mxu2 %v4136_v22  ;;  %787 = vmatpush.msrb.mxu0 %v4127_v19 }
  0x6c   :  { %846 = vmatpush.msra.mxu3 %v4134_v21  ;;  %807 = vmatpush.msra.mxu1 %v4129_v20 }
  0x6d   :  { %827 = vmatpush.msra.mxu2 %v4148_v26  ;;  %788 = vmatpush.msrb.mxu0 %v4140_v23 }
  0x6e   :  { %847 = vmatpush.msra.mxu3 %v4146_v25  ;;  %808 = vmatpush.msra.mxu1 %v4142_v24 }
  0x6f   :  { %828 = vmatpush.msra.mxu2 %v4160_v30  ;;  %789 = vmatpush.msrb.mxu0 %v4150_v27 }
  0x70   :  { %848 = vmatpush.msra.mxu3 %v4158_v29  ;;  %809 = vmatpush.msra.mxu1 %v4153_v28 }
  0x71   :  { %829 = vmatpush.msra.mxu2 %v4179_v35  ;;  %790 = vmatpush.msrb.mxu0 %v4169_v32 }
  0x72   :  { %849 = vmatpush.msra.mxu3 %v4177_v34  ;;  %810 = vmatpush.msra.mxu1 %v4172_v33 }
  0x73   :  { %830 = vmatpush.msra.mxu2 %v4191_v39  ;;  %791 = vmatpush.msrb.mxu0 %v4183_v36 }
  0x74   :  { %850 = vmatpush.msra.mxu3 %v4189_v38  ;;  %811 = vmatpush.msra.mxu1 %v4185_v37 }
  0x75   :  { %831 = vmatpush.msra.mxu2 %v4203_v43  ;;  %792 = vmatpush.msrb.mxu0 %v4193_v40 }
  0x76   :  { %851 = vmatpush.msra.mxu3 %v4201_v42  ;;  %812 = vmatpush.msra.mxu1 %v4196_v41 }
  0x77   :  { %832 = vmatpush.msra.mxu2 %v4222_v48  ;;  %793 = vmatpush.msrb.mxu0 %v4212_v45 }
  0x78   :  { %852 = vmatpush.msra.mxu3 %v4220_v47  ;;  %813 = vmatpush.msra.mxu1 %v4215_v46  ;;  %v6864_v46 = vmov 0 }
  0x79   :  { %833 = vmatpush.msra.mxu2 %v4234_v52  ;;  %794 = vmatpush.msrb.mxu0 %v4226_v49 }
  0x7a   :  { %853 = vmatpush.msra.mxu3 %v4232_v51  ;;  %814 = vmatpush.msra.mxu1 %v4228_v50  ;;  %v6858_v50 = vmov 0 }
  0x7b   :  { %834 = vmatpush.msra.mxu2 %v4246_v56  ;;  %795 = vmatpush.msrb.mxu0 %v4236_v53 }
  0x7c   :  { %854 = vmatpush.msra.mxu3 %v4244_v55  ;;  %815 = vmatpush.msra.mxu1 %v4239_v54 }
  0x7d   :  { %835 = vmatpush.msra.mxu2 %v4271_v63  ;;  %796 = vmatpush.msrb.mxu0 %v4248_v57 }
  0x7e   :  { %855 = vmatpush.msra.mxu3 %v4265_v61  ;;  %816 = vmatpush.msra.mxu1 %v4263_v60 }
  0x7f   :  { %836 = vmatpush.msra.mxu2 %v4283_v6  ;;  %797 = vmatpush.msrb.mxu0 %v4257_v59 }
  0x80   :  { %856 = vmatpush.msra.mxu3 %v4277_v1  ;;  %817 = vmatpush.msra.mxu1 %v4275_v0 }
  0x81   :  { %837 = vmatpush.msra.mxu2 %v4303_v12  ;;  %798 = vmatpush.msrb.mxu0 %v4269_v62 }
  0x82   :  { %857 = vmatpush.msra.mxu3 %v6843_v3  ;;  %818 = vmatpush.msra.mxu1 %v6844_v4  ;;  %v80_v4 = vlaneseq }
  0x83   :  { %838 = vmatpush.msra.mxu2 %v4313_v2  ;;  %799 = vmatpush.msrb.mxu0 %v6845_v5  ;;  %v154_v5 = vld [vmem:[%s6526_s3] sm:$0xf] }
  0x84   :  { %858 = vmatpush.msra.mxu3 %v4305_v18  ;;  %819 = vmatpush.msra.mxu1 %v4299_v11  ;;  %v4483_v11 = vand.u32 127, %v80_v4 }
  0x85   :  { %839 = vmatpush.msra.mxu2 %v4320_v7  ;;  %800 = vmatpush.msrb.mxu0 %v6846_v31  ;;  %v156_v7 = vperm.slane %v154_v5, 0 }
  0x86   :  { %859 = vmatpush.msra.mxu3 %v4315_v10  ;;  %820 = vmatpush.msra.mxu1 %v4309_v44  ;;  %6847 = vst [vmem:[#allocation47_spill] sm:$0xff] %v4483_v11  ;;  %vm133_vm1 = vcmp.lt.s32.totalorder %v4483_v11, 32  ;;  %v83_v55 = vadd.s32 256, %v4483_v11 }
  0x87   :  { %840 = vmatpush.msra.mxu2 %v4330_v58 }
  0x88   :  { %860 = vmatpush.msra.mxu3 %v4322_v8  ;;  %v103_v49 = vand.u32 127, %v83_v55  ;;  %v6868_v55 = vmov 0 }
  0x8a   :  { %vm4545_vm3 = vcmp.lt.s32.totalorder %v103_v49, 32 }
  0x8b   :  { %v6865_v46 = vsel %vm4545_vm3, 4294967295, %v6864_v46 }
  0x8c   :  { %6866 = vst [vmem:[#allocation62_spill] sm:$0xff] %v6865_v46 }
  0x90   :  { %v206_v2 = vpop.f32.mrf.mxu0  ;;  %v221_v62 = vpop.f32.mrf.mxu1 }
  0x91   :  { %v207_v18 = vadd.f32 %v206_v2, %v156_v7  ;;  %v4506_v1 = vadd.f32 %v221_v62, %v156_v7  ;;  %v82_v62 = vadd.s32 128, %v4483_v11 }
  0x93   :  { %6852 = vst [vmem:[#allocation52_spill] sm:$0xff] %v4506_v1  ;;  %v96_v53 = vand.u32 127, %v82_v62 }
  0x95   :  { %vm4530_vm2 = vcmp.lt.s32.totalorder %v96_v53, 32  ;;  %v159_v53 = vperm.slane %v154_v5, 3 }
  0x96   :  { %v6859_v50 = vsel %vm4530_vm2, 4294967295, %v6858_v50 }
  0x97   :  { %v224_v10 = vpop.f32.mrf.mxu2  ;;  %v227_v3 = vpop.f32.mrf.mxu3  ;;  %6860 = vst [vmem:[#allocation58_spill] sm:$0xff] %v6859_v50 }
  0x98   :  { %v4486_v44 = vadd.f32 %v224_v10, %v156_v7  ;;  %v228_v58 = vadd.f32 %v227_v3, %v156_v7  ;;  %v209_v31 = vpop.f32.mrf.mxu0 }
  0x99   :  { %v4488_v8 = vpop.f32.mrf.mxu1  ;;  %v4490_v12 = vadd.f32 %v209_v31, %v156_v7 }
  0x9a   :  { %6848 = vst [vmem:[#allocation48_spill] sm:$0xff] %v4486_v44  ;;  %v4494_v0 = vsel %vm133_vm1, %v228_v58, %v207_v18 }
  0x9b   :  { %6849 = vst [vmem:[#allocation49_spill] sm:$0xff] %v4490_v12  ;;  %v4500_v2 = vsel %vm133_vm1, %v4486_v44, %v4490_v12 }
  0x9c   :  { %6850 = vst [vmem:[#allocation50_spill] sm:$0xff] %v4494_v0 }
  0x9d   :  { %6851 = vst [vmem:[#allocation51_spill] sm:$0xff] %v4500_v2 }
  0x9f   :  { %v4502_v4 = vpop.f32.mrf.mxu2 }
  0xa0   :  { %v4504_v10 = vpop.f32.mrf.mxu3  ;;  %v212_v3 = vpop.f32.mrf.mxu0 }
  0xa1   :  { %v250_v59 = vpop.f32.mrf.mxu1  ;;  %v4508_v31 = vadd.f32 %v212_v3, %v156_v7 }
  0xa3   :  { %6853 = vst [vmem:[#allocation53_spill] sm:$0xff] %v4508_v31  ;;  %v4514_v0 = vsel %vm133_vm1, %v4506_v1, %v4508_v31  ;;  %v157_v31 = vperm.slane %v154_v5, 1 }
  0xa4   :  { %6854 = vst [vmem:[#allocation54_spill] sm:$0xff] %v4514_v0 }
  0xa7   :  { %v291_v6 = vpop.f32.mrf.mxu2 }
  0xa8   :  { %v4516_v60 = vpop.f32.mrf.mxu3  ;;  %v215_v2 = vpop.f32.mrf.mxu0 }
  0xa9   :  { %v253_v12 = vpop.f32.mrf.mxu1  ;;  %v4518_v61 = vadd.f32 %v215_v2, %v156_v7 }
  0xaa   :  { %v4555_v47 = vadd.f32 %v253_v12, %v157_v31 }
  0xab   :  { %6855 = vst [vmem:[#allocation55_spill] sm:$0xff] %v4518_v61 }
  0xac   :  { %6871 = vst [vmem:[#allocation65_spill] sm:$0xff] %v4555_v47 }
  0xaf   :  { %v294_v44 = vpop.f32.mrf.mxu2 }
  0xb0   :  { %v335_v57 = vpop.f32.mrf.mxu3 }
  0xb1   :  { %v256_v63 = vpop.f32.mrf.mxu1  ;;  %v218_v3 = vpop.f32.mrf.mxu0 }
  0xb2   :  { %v4521_v54 = vadd.f32 %v218_v3, %v156_v7  ;;  %v84_v7 = vadd.s32 384, %v4483_v11  ;;  %v4535_v3 = vadd.f32 %v256_v63, %v157_v31 }
  0xb4   :  { %6856 = vst [vmem:[#allocation56_spill] sm:$0xff] %v4521_v54  ;;  %v4527_v0 = vsel %vm133_vm1, %v4521_v54, %v4518_v61  ;;  %v158_v61 = vperm.slane %v154_v5, 2  ;;  %v110_v54 = vand.u32 127, %v84_v7 }
  0xb5   :  { %6857 = vst [vmem:[#allocation57_spill] sm:$0xff] %v4527_v0 }
  0xb6   :  { %6861 = vst [vmem:[#allocation59_spill] sm:$0xff] %v4535_v3  ;;  %vm4551_vm4 = vcmp.lt.s32.totalorder %v110_v54, 32  ;;  %v4579_v3 = vadd.f32 %v294_v44, %v158_v61  ;;  %v4601_v44 = vadd.f32 %v291_v6, %v158_v61 }
  0xb7   :  { %v6869_v55 = vsel %vm4551_vm4, 4294967295, %v6868_v55 }
  0xb8   :  { %v297_v1 = vpop.f32.mrf.mxu2  ;;  %v338_v56 = vpop.f32.mrf.mxu3  ;;  %6870 = vst [vmem:[#allocation64_spill] sm:$0xff] %v6869_v55 }
  0xb9   :  { %v259_v2 = vpop.f32.mrf.mxu1  ;;  %v4543_v51 = vadd.f32 %v297_v1, %v158_v61  ;;  %v4557_v0 = vadd.f32 %v338_v56, %v159_v53  ;;  %6876 = vst [vmem:[#allocation70_spill] sm:$0xff] %v4579_v3 }
  0xba   :  { %v4537_v62 = vadd.f32 %v259_v2, %v157_v31  ;;  %v478_v49 = vpop.f32.mrf.mxu0  ;;  %6881 = vst [vmem:[#allocation75_spill] sm:$0xff] %v4601_v44 }
  0xbb   :  { %6863 = vst [vmem:[#allocation61_spill] sm:$0xff] %v4543_v51 }
  0xbc   :  { %6862 = vst [vmem:[#allocation60_spill] sm:$0xff] %v4537_v62  ;;  %v4583_v62 = vadd.f32 %v335_v57, %v159_v53 }
  0xbd   :  { %6872 = vst [vmem:[#allocation66_spill] sm:$0xff] %v4557_v0 }
  0xbe   :  { %6878 = vst [vmem:[#allocation72_spill] sm:$0xff] %v4583_v62 }
  0xc0   :  { %v300_v52 = vpop.f32.mrf.mxu2 }
  0xc1   :  { %v4549_v63 = vadd.f32 %v300_v52, %v158_v61  ;;  %v341_v2 = vpop.f32.mrf.mxu3  ;;  %v262_v45 = vpop.f32.mrf.mxu1 }
  0xc2   :  { %v4559_v1 = vadd.f32 %v341_v2, %v159_v53  ;;  %v4561_v5 = vadd.f32 %v262_v45, %v157_v31  ;;  %v457_v45 = vsel %vm133_vm1, %v207_v18, %v228_v58  ;;  %v4577_v2 = vadd.f32 %v250_v59, %v157_v31 }
  0xc3   :  { %6867 = vst [vmem:[#allocation63_spill] sm:$0xff] %v4549_v63  ;;  %v541_v12 = vadd.f32 %v478_v49, %v457_v45  ;;  %v4606_v45 = vadd.f32 %v4488_v8, %v157_v31 }
  0xc4   :  { %6873 = vst [vmem:[#allocation67_spill] sm:$0xff] %v4559_v1 }
  0xc5   :  { %6874 = vst [vmem:[#allocation68_spill] sm:$0xff] %v4561_v5  ;;  %v3407_v54 = vmul.f32 -1.442695, %v541_v12  ;;  %v4609_v12 = vadd.f32 %v4516_v60, %v159_v53 }
  0xc6   :  { %6875 = vst [vmem:[#allocation69_spill] sm:$0xff] %v4577_v2 }
  0xc7   :  { %3501 = vpow2.f32 %v3407_v54  ;;  %6883 = vst [vmem:[#allocation77_spill] sm:$0xff] %v4606_v45 }
  0xc8   :  { %v303_v7 = vpop.f32.mrf.mxu2  ;;  %6884 = vst [vmem:[#allocation78_spill] sm:$0xff] %v4609_v12 }
  0xc9   :  { %v4581_v52 = vadd.f32 %v303_v7, %v158_v61  ;;  %v344_v51 = vpop.f32.mrf.mxu3  ;;  %v265_v63 = vpop.f32.mrf.mxu1 }
  0xca   :  { %v4585_v0 = vadd.f32 %v344_v51, %v159_v53  ;;  %v4587_v1 = vadd.f32 %v265_v63, %v157_v31 }
  0xcb   :  { %6877 = vst [vmem:[#allocation71_spill] sm:$0xff] %v4581_v52 }
  0xcc   :  { %6879 = vst [vmem:[#allocation73_spill] sm:$0xff] %v4585_v0 }
  0xcd   :  { %6880 = vst [vmem:[#allocation74_spill] sm:$0xff] %v4587_v1  ;;  %v3502_v54 = vpop.eup %3501 }
  0xce   :  { %v548_v8 = vadd.f32 1.0, %v3502_v54 }
  0xd0   :  { %v306_v51 = vpop.f32.mrf.mxu2  ;;  %3503 = vrcp.f32 %v548_v8  ;;  %vm554_vm6 = vweird.f32 %v548_v8 }
  0xd1   :  { %v4603_v58 = vadd.f32 %v306_v51, %v158_v61  ;;  %v347_v63 = vpop.f32.mrf.mxu3  ;;  %v268_v49 = vpop.f32.mrf.mxu1  ;;  %v4637_v51 = vadd.f32 %v4504_v10, %v159_v53 }
  0xd2   :  { %v4611_v7 = vadd.f32 %v347_v63, %v159_v53  ;;  %v4613_v18 = vadd.f32 %v268_v49, %v157_v31  ;;  %v4628_v31 = vadd.f32 %v4502_v4, %v158_v61 }
  0xd3   :  { %6882 = vst [vmem:[#allocation76_spill] sm:$0xff] %v4603_v58 }
  0xd4   :  { %6885 = vst [vmem:[#allocation79_spill] sm:$0xff] %v4611_v7  ;;  %v458_v6 = vsel %vm4530_vm2, %v4606_v45, %v4613_v18 }
  0xd5   :  { %6886 = vst [vmem:[#allocation80_spill] sm:$0xff] %v4613_v18 }
  0xd6   :  { %6887 = vst [vmem:[#allocation81_spill] sm:$0xff] %v4628_v31 }
  0xd7   :  { %6889 = vst [vmem:[#allocation83_spill] sm:$0xff] %v4637_v51 }
  0xd8   :  { %v309_v63 = vpop.f32.mrf.mxu2 }
  0xd9   :  { %v4630_v49 = vadd.f32 %v309_v63, %v158_v61  ;;  %v350_v57 = vpop.f32.mrf.mxu3  ;;  %v498_v59 = vpop.f32.mrf.mxu1 }
  0xda   :  { %v4639_v56 = vadd.f32 %v350_v57, %v159_v53  ;;  %v542_v60 = vadd.f32 %v498_v59, %v458_v6  ;;  %v3504_v63 = vpop.eup %3503 }
  0xdb   :  { %6888 = vst [vmem:[#allocation82_spill] sm:$0xff] %v4630_v49  ;;  %v550_v6 = vmul.f32 %v3504_v63, %v548_v8  ;;  %vm555_vm5 = vweird.f32 %v3504_v63 }
  0xdc   :  { %6890 = vst [vmem:[#allocation84_spill] sm:$0xff] %v4639_v56  ;;  %v3408_v4 = vmul.f32 -1.442695, %v542_v60  ;;  %v460_v10 = vsel %vm4551_vm4, %v4637_v51, %v4639_v56  ;;  %vm556_vm8 = vmor %vm554_vm6, %vm555_vm5  ;;  %vm608_vm5 = vcmask 261120   ;;  %vm610_vm6 = vcmask 523520  }
  0xdd   :  { %v551_v61 = vsub.f32 1.0, %v550_v6  ;;  %v558_v6 = vand.u32 2147483647, %v548_v8 }
  0xde   :  { %3505 = vpow2.f32 %v3408_v4  ;;  %v459_v4 = vsel %vm4545_vm3, %v4628_v31, %v4630_v49 }
  0xdf   :  { %v552_v52 = vmul.f32 %v3504_v63, %v551_v61  ;;  %vm559_vm11 = vcmp.eq.f32.partialorder %v558_v6, 8.507059e+37  ;;  %v621_v6 = vsel %vm4530_vm2, %v4577_v2, %v4587_v1  ;;  %v4919_v2 = vld [vmem:[#allocation4 + $0x28] sm:$0xff]  ;;  %v4922_v1 = vld [vmem:[#allocation4 + $0x30] sm:$0xff] }
  0xe0   :  { %v518_v60 = vpop.f32.mrf.mxu2 }
  0xe1   :  { %v538_v53 = vpop.f32.mrf.mxu3  ;;  %v543_v54 = vadd.f32 %v518_v60, %v459_v4 }
  0xe2   :  { %v544_v59 = vadd.f32 %v538_v53, %v460_v10  ;;  %v553_v53 = vadd.f32 %v3504_v63, %v552_v52 }
  0xe4   :  { %v3506_v57 = vpop.eup %3505  ;;  %v3409_v45 = vmul.f32 -1.442695, %v544_v59  ;;  %v560_v59 = vand.u32 2147483648, %v548_v8  ;;  %v557_v60 = vsel %vm556_vm8, %v3504_v63, %v553_v53 }
  0xe5   :  { %v567_v18 = vadd.f32 1.0, %v3506_v57 }
  0xe6   :  { %3507 = vpow2.f32 %v3409_v45  ;;  %v561_v49 = vor.u32 1.1754944e-38, %v560_v59 }
  0xe7   :  { %3509 = vrcp.f32 %v567_v18  ;;  %v579_v45 = vand.u32 2147483648, %v567_v18  ;;  %v577_v0 = vand.u32 2147483647, %v567_v18  ;;  %vm573_vm9 = vweird.f32 %v567_v18 }
  0xe8   :  { %3511 = vtanh.f32 %v543_v54  ;;  %v562_v54 = vsel %vm559_vm11, %v561_v49, %v557_v60 }
  0xe9   :  { %vm578_vm12 = vcmp.eq.f32.partialorder %v577_v0, 8.507059e+37 }
  0xec   :  { %v3508_v3 = vpop.eup %3507 }
  0xed   :  { %v3510_v62 = vpop.eup %3509  ;;  %v587_v51 = vadd.f32 1.0, %v3508_v3  ;;  %v580_v3 = vor.u32 1.1754944e-38, %v579_v45 }
  0xee   :  { %v569_v56 = vmul.f32 %v3510_v62, %v567_v18  ;;  %vm574_vm7 = vweird.f32 %v3510_v62  ;;  %v3512_v31 = vpop.eup %3511 }
  0xef   :  { %3513 = vrcp.f32 %v587_v51  ;;  %vm575_vm10 = vmor %vm573_vm9, %vm574_vm7  ;;  %v599_v63 = vand.u32 2147483648, %v587_v51  ;;  %vm593_vm14 = vweird.f32 %v587_v51  ;;  %v597_v53 = vand.u32 2147483647, %v587_v51 }
  0xf0   :  { %v570_v10 = vsub.f32 1.0, %v569_v56 }
  0xf1   :  { %vm598_vm0 = vcmp.eq.f32.partialorder %v597_v53, 8.507059e+37 }
  0xf2   :  { %v571_v57 = vmul.f32 %v3510_v62, %v570_v10  ;;  %v604_v10 = vmul.f32 %v3512_v31, %v562_v54  ;;  %v6925_v31 = vld [vmem:[#allocation49_spill] sm:$0xff] }
  0xf4   :  { %v572_v61 = vadd.f32 %v3510_v62, %v571_v57 }
  0xf5   :  { %v3514_v4 = vpop.eup %3513 }
  0xf6   :  { %v576_v56 = vsel %vm575_vm10, %v3510_v62, %v572_v61  ;;  %v589_v52 = vmul.f32 %v3514_v4, %v587_v51  ;;  %vm594_vm13 = vweird.f32 %v3514_v4  ;;  %v600_v62 = vor.u32 1.1754944e-38, %v599_v63  ;;  %v6924_v51 = vld [vmem:[#allocation48_spill] sm:$0xff] }
  0xf7   :  { %v581_v47 = vsel %vm578_vm12, %v580_v3, %v576_v56  ;;  %vm595_vm15 = vmor %vm593_vm14, %vm594_vm13  ;;  %v620_v59 = vsel %vm133_vm1, %v6925_v31, %v6924_v51 }
  0xf8   :  { %v603_v5 = vmul.f32 0.0, %v581_v47  ;;  %v590_v8 = vsub.f32 1.0, %v589_v52  ;;  %v623_v52 = vsel %vm4551_vm4, %v4609_v12, %v4611_v7  ;;  %v4913_v12 = vld [vmem:[#allocation4 + $0x58] sm:$0xff]  ;;  %v4916_v7 = vld [vmem:[#allocation4 + $0x20] sm:$0xff] }
  0xfa   :  { %v4657_v46 = vadd.f32 %v604_v10, %v603_v5  ;;  %v591_v44 = vmul.f32 %v3514_v4, %v590_v8  ;;  %v6922_v5 = vld [vmem:[#allocation46_spill] sm:$0xff] }
  0xfc   :  { %3515 = vtanh.f32 %v4657_v46  ;;  %v592_v18 = vadd.f32 %v3514_v4, %v591_v44  ;;  %v6923_v44 = vld [vmem:[#allocation45_spill] sm:$0xff] }
  0xfe   :  { %v596_v45 = vsel %vm595_vm15, %v3514_v4, %v592_v18 }
  0xff   :  { %v601_v49 = vsel %vm598_vm0, %v600_v62, %v596_v45 }
 0x102   :  { %v3516_v0 = vpop.eup %3515 }
 0x103   :  { %v607_v47 = vmul.f32 %v3516_v0, %v601_v49  ;;  %v6926_v49 = vld [vmem:[#allocation75_spill] sm:$0xff] }
 0x105   :  { %640 = vmatmul.f32.vlgmr.msra.gmra.mxu0 %v607_v47  ;;  %660 = vmatmul.f32.vlgmr.msrb.gmra.mxu1 %v607_v47  ;;  %609 = vst.msk [vmem:[#allocation3] sm:$0xff] %vm608_vm5, %v607_v47 }
 0x106   :  { %680 = vmatmul.f32.vlgmr.msrb.gmra.mxu2 %v607_v47  ;;  %700 = vmatmul.f32.vlgmr.msrb.gmra.mxu3 %v607_v47  ;;  %611 = vst.msk [vmem:[#allocation3 + $0x38] sm:$0xff] %vm610_vm6, %v607_v47 }
 0x107   :  { %946 = vmatpush.msra.mxu0 %v4094_v9  ;;  %966 = vmatpush.msrb.mxu1 %v4109_v13  ;;  %v6891_v9 = vld [vmem:[#allocation16_spill] sm:$0xff]  ;;  %v6892_v13 = vld [vmem:[#allocation14_spill] sm:$0xff] }
 0x108   :  { %986 = vmatpush.msrb.mxu2 %v4118_v17  ;;  %1006 = vmatpush.msrb.mxu3 %v4114_v15  ;;  %v6894_v15 = vld [vmem:[#allocation20_spill] sm:$0xff]  ;;  %v6896_v17 = vld [vmem:[#allocation17_spill] sm:$0xff] }
 0x109   :  { %947 = vmatpush.msra.mxu0 %v4112_v14  ;;  %967 = vmatpush.msrb.mxu1 %v4116_v16  ;;  %v6893_v14 = vld [vmem:[#allocation15_spill] sm:$0xff] }
 0x10a   :  { %987 = vmatpush.msrb.mxu2 %v4136_v22  ;;  %1007 = vmatpush.msrb.mxu3 %v4134_v21  ;;  %v6895_v16 = vld [vmem:[#allocation19_spill] sm:$0xff]  ;;  %v6900_v22 = vld [vmem:[#allocation21_spill] sm:$0xff] }
 0x10b   :  { %948 = vmatpush.msra.mxu0 %v4127_v19  ;;  %968 = vmatpush.msrb.mxu1 %v4129_v20  ;;  %v6897_v19 = vld [vmem:[#allocation18_spill] sm:$0xff]  ;;  %v6898_v20 = vld [vmem:[#allocation24_spill] sm:$0xff]  ;;  %v6899_v21 = vld [vmem:[#allocation23_spill] sm:$0xff] }
 0x10c   :  { %988 = vmatpush.msrb.mxu2 %v4148_v26  ;;  %1008 = vmatpush.msrb.mxu3 %v4146_v25  ;;  %v6903_v25 = vld [vmem:[#allocation28_spill] sm:$0xff]  ;;  %v6904_v26 = vld [vmem:[#allocation25_spill] sm:$0xff] }
 0x10d   :  { %949 = vmatpush.msra.mxu0 %v4140_v23  ;;  %969 = vmatpush.msrb.mxu1 %v4142_v24  ;;  %v6901_v23 = vld [vmem:[#allocation22_spill] sm:$0xff] }
 0x10e   :  { %989 = vmatpush.msrb.mxu2 %v4160_v30  ;;  %1009 = vmatpush.msrb.mxu3 %v4158_v29  ;;  %v6902_v24 = vld [vmem:[#allocation30_spill] sm:$0xff]  ;;  %v6907_v29 = vld [vmem:[#allocation32_spill] sm:$0xff] }
 0x10f   :  { %950 = vmatpush.msra.mxu0 %v4150_v27  ;;  %970 = vmatpush.msrb.mxu1 %v4153_v28  ;;  %v6905_v27 = vld [vmem:[#allocation27_spill] sm:$0xff]  ;;  %v6906_v28 = vld [vmem:[#allocation34_spill] sm:$0xff] }
 0x110   :  { %990 = vmatpush.msrb.mxu2 %v4179_v35  ;;  %1010 = vmatpush.msrb.mxu3 %v4177_v34  ;;  %v6908_v30 = vld [vmem:[#allocation26_spill] sm:$0xff]  ;;  %v6911_v34 = vld [vmem:[#allocation36_spill] sm:$0xff]  ;;  %v6912_v35 = vld [vmem:[#allocation29_spill] sm:$0xff] }
 0x111   :  { %951 = vmatpush.msra.mxu0 %v4169_v32  ;;  %971 = vmatpush.msrb.mxu1 %v4172_v33  ;;  %v6909_v32 = vld [vmem:[#allocation31_spill] sm:$0xff]  ;;  %6945 = vst [vmem:[#allocation26_spill] sm:$0xff] %v4913_v12 }
 0x112   :  { %991 = vmatpush.msrb.mxu2 %v4191_v39  ;;  %1011 = vmatpush.msrb.mxu3 %v4189_v38  ;;  %v6910_v33 = vld [vmem:[#allocation39_spill] sm:$0xff]  ;;  %v6915_v38 = vld [vmem:[#allocation40_spill] sm:$0xff]  ;;  %v6916_v39 = vld [vmem:[#allocation33_spill] sm:$0xff]  ;;  %6946 = vst [vmem:[#allocation31_spill] sm:$0xff] %v4916_v7 }
 0x113   :  { %952 = vmatpush.msra.mxu0 %v4183_v36  ;;  %972 = vmatpush.msrb.mxu1 %v4185_v37  ;;  %v6913_v36 = vld [vmem:[#allocation35_spill] sm:$0xff]  ;;  %v6914_v37 = vld [vmem:[#allocation42_spill] sm:$0xff]  ;;  %6947 = vst [vmem:[#allocation39_spill] sm:$0xff] %v4919_v2 }
 0x114   :  { %992 = vmatpush.msrb.mxu2 %v4203_v43  ;;  %1012 = vmatpush.msrb.mxu3 %v4201_v42  ;;  %v6919_v42 = vld [vmem:[#allocation43_spill] sm:$0xff]  ;;  %v6920_v43 = vld [vmem:[#allocation37_spill] sm:$0xff]  ;;  %6948 = vst [vmem:[#allocation36_spill] sm:$0xff] %v4922_v1 }
 0x115   :  { %953 = vmatpush.msra.mxu0 %v4193_v40  ;;  %973 = vmatpush.msrb.mxu1 %v4196_v41  ;;  %v6917_v40 = vld [vmem:[#allocation38_spill] sm:$0xff]  ;;  %v6918_v41 = vld [vmem:[#allocation44_spill] sm:$0xff] }
 0x116   :  { %993 = vmatpush.msrb.mxu2 %v4222_v48  ;;  %1013 = vmatpush.msrb.mxu3 %v6891_v9  ;;  %v6921_v48 = vld [vmem:[#allocation41_spill] sm:$0xff]  ;;  %v622_v9 = vsel %vm4545_vm3, %v6926_v49, %v4603_v58  ;;  %v4907_v49 = vld [vmem:[#allocation4 + $0x48] sm:$0xff]  ;;  %v4910_v58 = vld [vmem:[#allocation4 + $0x50] sm:$0xff] }
 0x117   :  { %954 = vmatpush.msra.mxu0 %v6892_v13  ;;  %974 = vmatpush.msrb.mxu1 %v6893_v14  ;;  %6943 = vst [vmem:[#allocation34_spill] sm:$0xff] %v4907_v49 }
 0x118   :  { %994 = vmatpush.msrb.mxu2 %v6894_v15  ;;  %1014 = vmatpush.msrb.mxu3 %v6895_v16  ;;  %6944 = vst [vmem:[#allocation32_spill] sm:$0xff] %v4910_v58 }
 0x119   :  { %955 = vmatpush.msra.mxu0 %v6896_v17  ;;  %975 = vmatpush.msrb.mxu1 %v6897_v19 }
 0x11a   :  { %995 = vmatpush.msrb.mxu2 %v6898_v20  ;;  %1015 = vmatpush.msrb.mxu3 %v6899_v21 }
 0x11b   :  { %956 = vmatpush.msra.mxu0 %v6900_v22  ;;  %976 = vmatpush.msrb.mxu1 %v6901_v23 }
 0x11c   :  { %996 = vmatpush.msrb.mxu2 %v6902_v24  ;;  %1016 = vmatpush.msrb.mxu3 %v6903_v25 }
 0x11d   :  { %957 = vmatpush.msra.mxu0 %v6904_v26  ;;  %977 = vmatpush.msrb.mxu1 %v6905_v27 }
 0x11e   :  { %997 = vmatpush.msrb.mxu2 %v6906_v28  ;;  %1017 = vmatpush.msrb.mxu3 %v6907_v29 }
 0x11f   :  { %958 = vmatpush.msra.mxu0 %v6908_v30  ;;  %978 = vmatpush.msrb.mxu1 %v6909_v32 }
 0x120   :  { %998 = vmatpush.msrb.mxu2 %v6910_v33  ;;  %1018 = vmatpush.msrb.mxu3 %v6911_v34 }
 0x121   :  { %959 = vmatpush.msra.mxu0 %v6912_v35  ;;  %979 = vmatpush.msrb.mxu1 %v6913_v36 }
 0x122   :  { %999 = vmatpush.msrb.mxu2 %v6914_v37  ;;  %1019 = vmatpush.msrb.mxu3 %v6915_v38 }
 0x123   :  { %960 = vmatpush.msra.mxu0 %v6916_v39  ;;  %980 = vmatpush.msrb.mxu1 %v6917_v40 }
 0x124   :  { %1000 = vmatpush.msrb.mxu2 %v6918_v41  ;;  %1020 = vmatpush.msrb.mxu3 %v6919_v42 }
 0x125   :  { %961 = vmatpush.msra.mxu0 %v6920_v43  ;;  %981 = vmatpush.msrb.mxu1 %v6921_v48 }
 0x126   :  { %1001 = vmatpush.msrb.mxu2 %v6922_v5  ;;  %1021 = vmatpush.msrb.mxu3 %v6923_v44 }
 0x182   :  { %v641_v57 = vpop.f32.mrf.mxu0  ;;  %v661_v60 = vpop.f32.mrf.mxu1 }
 0x183   :  { %v704_v61 = vadd.f32 %v641_v57, %v620_v59  ;;  %v705_v4 = vadd.f32 %v661_v60, %v621_v6 }
 0x185   :  { %v3410_v3 = vmul.f32 -1.442695, %v704_v61  ;;  %v3411_v56 = vmul.f32 -1.442695, %v705_v4  ;;  %v4751_v61 = vld [vmem:[#allocation4 + $0x1e8] sm:$0xff]  ;;  %v4754_v4 = vld [vmem:[#allocation4 + $0x1f0] sm:$0xff] }
 0x187   :  { %3517 = vpow2.f32 %v3410_v3  ;;  %v4757_v3 = vld [vmem:[#allocation4 + $0x1f8] sm:$0xff] }
 0x188   :  { %3519 = vpow2.f32 %v3411_v56  ;;  %v4760_v56 = vld [vmem:[#allocation4 + $0x1c0] sm:$0xff] }
 0x189   :  { %v701_v54 = vpop.f32.mrf.mxu3  ;;  %v681_v62 = vpop.f32.mrf.mxu2 }
 0x18a   :  { %v707_v10 = vadd.f32 %v701_v54, %v623_v52  ;;  %v706_v15 = vadd.f32 %v681_v62, %v622_v9  ;;  %v4763_v52 = vld [vmem:[#allocation4 + $0x1c8] sm:$0xff]  ;;  %v4766_v54 = vld [vmem:[#allocation4 + $0x1d0] sm:$0xff]  ;;  %v4793_v9 = vld [vmem:[#allocation4 + $0x198] sm:$0xff] }
 0x18b   :  { %v4787_v62 = vld [vmem:[#allocation4 + $0x188] sm:$0xff] }
 0x18c   :  { %v3412_v8 = vmul.f32 -1.442695, %v707_v10  ;;  %v4769_v10 = vld [vmem:[#allocation4 + $0x1d8] sm:$0xff] }
 0x18d   :  { %v3518_v18 = vpop.eup %3517 }
 0x18e   :  { %v3520_v63 = vpop.eup %3519  ;;  %v711_v53 = vadd.f32 1.0, %v3518_v18  ;;  %3521 = vpow2.f32 %v3412_v8  ;;  %v4772_v8 = vld [vmem:[#allocation4 + $0x1a0] sm:$0xff]  ;;  %v4775_v18 = vld [vmem:[#allocation4 + $0x1a8] sm:$0xff] }
 0x18f   :  { %v730_v45 = vadd.f32 1.0, %v3520_v63  ;;  %v4778_v63 = vld [vmem:[#allocation4 + $0x1b0] sm:$0xff] }
 0x190   :  { %3523 = vrcp.f32 %v711_v53  ;;  %v723_v22 = vand.u32 2147483648, %v711_v53  ;;  %v721_v25 = vand.u32 2147483647, %v711_v53  ;;  %vm717_vm9 = vweird.f32 %v711_v53 }
 0x191   :  { %3525 = vrcp.f32 %v730_v45  ;;  %v742_v23 = vand.u32 2147483648, %v730_v45  ;;  %v740_v27 = vand.u32 2147483647, %v730_v45  ;;  %vm736_vm10 = vweird.f32 %v730_v45 }
 0x192   :  { %v724_v30 = vor.u32 1.1754944e-38, %v723_v22  ;;  %vm722_vm13 = vcmp.eq.f32.partialorder %v721_v25, 8.507059e+37  ;;  %v4820_v22 = vld [vmem:[#allocation4 + $0x120] sm:$0xff]  ;;  %v4829_v25 = vld [vmem:[#allocation4 + $0x138] sm:$0xff] }
 0x193   :  { %v743_v34 = vor.u32 1.1754944e-38, %v742_v23  ;;  %vm741_vm14 = vcmp.eq.f32.partialorder %v740_v27, 8.507059e+37  ;;  %v4823_v23 = vld [vmem:[#allocation4 + $0x128] sm:$0xff] }
 0x194   :  { %v3522_v0 = vpop.eup %3521  ;;  %v4835_v27 = vld [vmem:[#allocation4 + $0x108] sm:$0xff] }
 0x195   :  { %v750_v13 = vadd.f32 1.0, %v3522_v0  ;;  %v4790_v0 = vld [vmem:[#allocation4 + $0x190] sm:$0xff] }
 0x196   :  { %v3524_v14 = vpop.eup %3523 }
 0x197   :  { %v3526_v16 = vpop.eup %3525  ;;  %v713_v17 = vmul.f32 %v3524_v14, %v711_v53  ;;  %3527 = vrcp.f32 %v750_v13  ;;  %vm718_vm7 = vweird.f32 %v3524_v14  ;;  %v762_v44 = vand.u32 2147483648, %v750_v13  ;;  %v4781_v53 = vld [vmem:[#allocation4 + $0x1b8] sm:$0xff] }
 0x198   :  { %v732_v19 = vmul.f32 %v3526_v16, %v730_v45  ;;  %3529 = vtanh.f32 %v706_v15  ;;  %vm737_vm8 = vweird.f32 %v3526_v16  ;;  %vm719_vm11 = vmor %vm717_vm9, %vm718_vm7  ;;  %vm756_vm0 = vweird.f32 %v750_v13  ;;  %v4784_v45 = vld [vmem:[#allocation4 + $0x180] sm:$0xff]  ;;  %v4802_v15 = vld [vmem:[#allocation4 + $0x170] sm:$0xff] }
 0x199   :  { %v714_v20 = vsub.f32 1.0, %v713_v17  ;;  %vm738_vm12 = vmor %vm736_vm10, %vm737_vm8  ;;  %v760_v51 = vand.u32 2147483647, %v750_v13  ;;  %v763_v59 = vor.u32 1.1754944e-38, %v762_v44  ;;  %v4808_v17 = vld [vmem:[#allocation4 + $0x140] sm:$0xff]  ;;  %v4886_v44 = vld [vmem:[#allocation4 + $0x90] sm:$0xff] }
 0x19a   :  { %v733_v21 = vsub.f32 1.0, %v732_v19  ;;  %v4811_v19 = vld [vmem:[#allocation4 + $0x148] sm:$0xff]  ;;  %6936 = vst [vmem:[#allocation23_spill] sm:$0xff] %v4886_v44 }
 0x19b   :  { %v715_v24 = vmul.f32 %v3524_v14, %v714_v20  ;;  %vm761_vm8 = vcmp.eq.f32.partialorder %v760_v51, 8.507059e+37  ;;  %v4814_v20 = vld [vmem:[#allocation4 + $0x150] sm:$0xff]  ;;  %v4889_v51 = vld [vmem:[#allocation4 + $0x98] sm:$0xff] }
 0x19c   :  { %v734_v26 = vmul.f32 %v3526_v16, %v733_v21  ;;  %v4817_v21 = vld [vmem:[#allocation4 + $0x158] sm:$0xff]  ;;  %6937 = vst [vmem:[#allocation21_spill] sm:$0xff] %v4889_v51 }
 0x19d   :  { %v3528_v28 = vpop.eup %3527  ;;  %v716_v29 = vadd.f32 %v3524_v14, %v715_v24  ;;  %v4826_v24 = vld [vmem:[#allocation4 + $0x130] sm:$0xff] }
 0x19e   :  { %v735_v32 = vadd.f32 %v3526_v16, %v734_v26  ;;  %v752_v33 = vmul.f32 %v3528_v28, %v750_v13  ;;  %v3530_v36 = vpop.eup %3529  ;;  %vm757_vm15 = vweird.f32 %v3528_v28  ;;  %v4796_v13 = vld [vmem:[#allocation4 + $0x160] sm:$0xff] }
 0x19f   :  { %v720_v35 = vsel %vm719_vm11, %v3524_v14, %v716_v29  ;;  %vm758_vm7 = vmor %vm756_vm0, %vm757_vm15  ;;  %v4799_v14 = vld [vmem:[#allocation4 + $0x168] sm:$0xff]  ;;  %v4832_v26 = vld [vmem:[#allocation4 + $0x100] sm:$0xff] }
 0x1a0   :  { %v725_v37 = vsel %vm722_vm13, %v724_v30, %v720_v35  ;;  %v739_v38 = vsel %vm738_vm12, %v3526_v16, %v735_v32  ;;  %v753_v39 = vsub.f32 1.0, %v752_v33  ;;  %v4805_v16 = vld [vmem:[#allocation4 + $0x178] sm:$0xff]  ;;  %v4844_v30 = vld [vmem:[#allocation4 + $0xe0] sm:$0xff]  ;;  %v4847_v32 = vld [vmem:[#allocation4 + $0xe8] sm:$0xff] }
 0x1a1   :  { %v744_v40 = vsel %vm741_vm14, %v743_v34, %v739_v38  ;;  %v767_v41 = vmul.f32 %v3530_v36, %v725_v37  ;;  %v4841_v29 = vld [vmem:[#allocation4 + $0x118] sm:$0xff]  ;;  %v4850_v33 = vld [vmem:[#allocation4 + $0xf0] sm:$0xff]  ;;  %v4856_v35 = vld [vmem:[#allocation4 + $0xc0] sm:$0xff] }
 0x1a2   :  { %v766_v42 = vmul.f32 %v744_v40, %v4657_v46  ;;  %v754_v43 = vmul.f32 %v3528_v28, %v753_v39  ;;  %v4748_v46 = vld [vmem:[#allocation4 + $0x1e0] sm:$0xff]  ;;  %v4853_v34 = vld [vmem:[#allocation4 + $0xf8] sm:$0xff]  ;;  %v4859_v36 = vld [vmem:[#allocation4 + $0xc8] sm:$0xff] }
 0x1a3   :  { %v4862_v37 = vld [vmem:[#allocation4 + $0xd0] sm:$0xff]  ;;  %v4865_v38 = vld [vmem:[#allocation4 + $0xd8] sm:$0xff]  ;;  %v4868_v39 = vld [vmem:[#allocation4 + $0xa0] sm:$0xff] }
 0x1a4   :  { %v4743_v48 = vadd.f32 %v767_v41, %v766_v42  ;;  %v755_v5 = vadd.f32 %v3528_v28, %v754_v43  ;;  %6928 = vst [vmem:[#allocation16_spill] sm:$0xff] %v4862_v37  ;;  %v4871_v40 = vld [vmem:[#allocation4 + $0xa8] sm:$0xff]  ;;  %v4874_v41 = vld [vmem:[#allocation4 + $0xb0] sm:$0xff]  ;;  %v4877_v42 = vld [vmem:[#allocation4 + $0xb8] sm:$0xff] }
 0x1a5   :  { %6929 = vst [vmem:[#allocation14_spill] sm:$0xff] %v4865_v38  ;;  %v4880_v43 = vld [vmem:[#allocation4 + $0x80] sm:$0xff] }
 0x1a6   :  { %3531 = vtanh.f32 %v4743_v48  ;;  %v759_v31 = vsel %vm758_vm7, %v3528_v28, %v755_v5  ;;  %v4838_v28 = vld [vmem:[#allocation4 + $0x110] sm:$0xff]  ;;  %6930 = vst [vmem:[#allocation15_spill] sm:$0xff] %v4868_v39  ;;  %v4883_v5 = vld [vmem:[#allocation4 + $0x88] sm:$0xff] }
 0x1a7   :  { %v764_v6 = vsel %vm761_vm8, %v763_v59, %v759_v31  ;;  %6931 = vst [vmem:[#allocation20_spill] sm:$0xff] %v4871_v40  ;;  %v4892_v31 = vld [vmem:[#allocation4 + $0x60] sm:$0xff]  ;;  %v4895_v59 = vld [vmem:[#allocation4 + $0x68] sm:$0xff] }
 0x1a8   :  { %6932 = vst [vmem:[#allocation19_spill] sm:$0xff] %v4874_v41 }
 0x1a9   :  { %6933 = vst [vmem:[#allocation17_spill] sm:$0xff] %v4877_v42 }
 0x1aa   :  { %6934 = vst [vmem:[#allocation18_spill] sm:$0xff] %v4880_v43 }
 0x1ab   :  { %6935 = vst [vmem:[#allocation24_spill] sm:$0xff] %v4883_v5 }
 0x1ac   :  { %v3532_v57 = vpop.eup %3531  ;;  %6938 = vst [vmem:[#allocation22_spill] sm:$0xff] %v4892_v31 }
 0x1ad   :  { %v770_v60 = vmul.f32 %v3532_v57, %v764_v6  ;;  %6939 = vst [vmem:[#allocation30_spill] sm:$0xff] %v4895_v59  ;;  %v4898_v57 = vld [vmem:[#allocation4 + $0x70] sm:$0xff]  ;;  %v4901_v6 = vld [vmem:[#allocation4 + $0x78] sm:$0xff] }
 0x1ae   :  { %6940 = vst [vmem:[#allocation28_spill] sm:$0xff] %v4898_v57 }
 0x1af   :  { %771 = vst.msk [vmem:[#allocation3 + $0x8] sm:$0xff] %vm608_vm5, %v770_v60  ;;  %801 = vmatmul.f32.vlgmr.msrb.gmra.mxu0 %v770_v60  ;;  %821 = vmatmul.f32.vlgmr.msra.gmra.mxu1 %v770_v60 }
 0x1b0   :  { %772 = vst.msk [vmem:[#allocation3 + $0x30] sm:$0xff] %vm610_vm6, %v770_v60  ;;  %841 = vmatmul.f32.vlgmr.msra.gmra.mxu2 %v770_v60  ;;  %861 = vmatmul.f32.vlgmr.msra.gmra.mxu3 %v770_v60  ;;  %v4904_v60 = vld [vmem:[#allocation4 + $0x40] sm:$0xff] }
 0x1b1   :  { %1107 = vmatpush.msrb.mxu0 %v4748_v46  ;;  %1127 = vmatpush.msra.mxu1 %v4751_v61  ;;  %6941 = vst [vmem:[#allocation25_spill] sm:$0xff] %v4901_v6 }
 0x1b2   :  { %1147 = vmatpush.msra.mxu2 %v4754_v4  ;;  %1167 = vmatpush.msra.mxu3 %v4757_v3  ;;  %6942 = vst [vmem:[#allocation27_spill] sm:$0xff] %v4904_v60 }
 0x1b3   :  { %1108 = vmatpush.msrb.mxu0 %v4760_v56  ;;  %1128 = vmatpush.msra.mxu1 %v4763_v52 }
 0x1b4   :  { %1148 = vmatpush.msra.mxu2 %v4766_v54  ;;  %1168 = vmatpush.msra.mxu3 %v4769_v10 }
 0x1b5   :  { %1109 = vmatpush.msrb.mxu0 %v4772_v8  ;;  %1129 = vmatpush.msra.mxu1 %v4775_v18 }
 0x1b6   :  { %1149 = vmatpush.msra.mxu2 %v4778_v63  ;;  %1169 = vmatpush.msra.mxu3 %v4781_v53 }
 0x1b7   :  { %1110 = vmatpush.msrb.mxu0 %v4784_v45  ;;  %1130 = vmatpush.msra.mxu1 %v4787_v62 }
 0x1b8   :  { %1150 = vmatpush.msra.mxu2 %v4790_v0  ;;  %1170 = vmatpush.msra.mxu3 %v4793_v9 }
 0x1b9   :  { %1111 = vmatpush.msrb.mxu0 %v4796_v13  ;;  %1131 = vmatpush.msra.mxu1 %v4799_v14 }
 0x1ba   :  { %1151 = vmatpush.msra.mxu2 %v4802_v15  ;;  %1171 = vmatpush.msra.mxu3 %v4805_v16 }
 0x1bb   :  { %1112 = vmatpush.msrb.mxu0 %v4808_v17  ;;  %1132 = vmatpush.msra.mxu1 %v4811_v19 }
 0x1bc   :  { %1152 = vmatpush.msra.mxu2 %v4814_v20  ;;  %1172 = vmatpush.msra.mxu3 %v4817_v21 }
 0x1bd   :  { %1113 = vmatpush.msrb.mxu0 %v4820_v22  ;;  %1133 = vmatpush.msra.mxu1 %v4823_v23 }
 0x1be   :  { %1153 = vmatpush.msra.mxu2 %v4826_v24  ;;  %1173 = vmatpush.msra.mxu3 %v4829_v25 }
 0x1bf   :  { %1114 = vmatpush.msrb.mxu0 %v4832_v26  ;;  %1134 = vmatpush.msra.mxu1 %v4835_v27 }
 0x1c0   :  { %1154 = vmatpush.msra.mxu2 %v4838_v28  ;;  %1174 = vmatpush.msra.mxu3 %v4841_v29 }
 0x1c1   :  { %1115 = vmatpush.msrb.mxu0 %v4844_v30  ;;  %1135 = vmatpush.msra.mxu1 %v4847_v32 }
 0x1c2   :  { %1155 = vmatpush.msra.mxu2 %v4850_v33  ;;  %1175 = vmatpush.msra.mxu3 %v4853_v34 }
 0x1c3   :  { %1116 = vmatpush.msrb.mxu0 %v4856_v35  ;;  %1136 = vmatpush.msra.mxu1 %v4859_v36 }
 0x1c4   :  { %1156 = vmatpush.msra.mxu2 %v4862_v37  ;;  %1176 = vmatpush.msra.mxu3 %v4865_v38 }
 0x1c5   :  { %1117 = vmatpush.msrb.mxu0 %v4868_v39  ;;  %1137 = vmatpush.msra.mxu1 %v4871_v40 }
 0x1c6   :  { %1157 = vmatpush.msra.mxu2 %v4874_v41  ;;  %1177 = vmatpush.msra.mxu3 %v4877_v42 }
 0x1c7   :  { %1118 = vmatpush.msrb.mxu0 %v4880_v43  ;;  %1138 = vmatpush.msra.mxu1 %v4883_v5  ;;  %v6958_v5 = vld [vmem:[#allocation73_spill] sm:$0xff] }
 0x1c8   :  { %1158 = vmatpush.msra.mxu2 %v4886_v44  ;;  %1178 = vmatpush.msra.mxu3 %v4889_v51 }
 0x1c9   :  { %1119 = vmatpush.msrb.mxu0 %v4892_v31  ;;  %1139 = vmatpush.msra.mxu1 %v4895_v59 }
 0x1ca   :  { %1159 = vmatpush.msra.mxu2 %v4898_v57  ;;  %1179 = vmatpush.msra.mxu3 %v4901_v6  ;;  %v6956_v57 = vld [vmem:[#allocation68_spill] sm:$0xff] }
 0x1cb   :  { %1120 = vmatpush.msrb.mxu0 %v4904_v60  ;;  %1140 = vmatpush.msra.mxu1 %v4907_v49  ;;  %v4925_v49 = vld [vmem:[#allocation4 + $0x38] sm:$0xff]  ;;  %v6955_v60 = vld [vmem:[#allocation53_spill] sm:$0xff] }
 0x1cc   :  { %1160 = vmatpush.msra.mxu2 %v4910_v58  ;;  %1180 = vmatpush.msra.mxu3 %v4913_v12  ;;  %6949 = vst [vmem:[#allocation29_spill] sm:$0xff] %v4925_v49  ;;  %v4928_v58 = vld [vmem:[#allocation4] sm:$0xff]  ;;  %v4931_v12 = vld [vmem:[#allocation4 + $0x8] sm:$0xff] }
 0x1cd   :  { %1121 = vmatpush.msrb.mxu0 %v4916_v7  ;;  %1141 = vmatpush.msra.mxu1 %v4919_v2  ;;  %6950 = vst [vmem:[#allocation35_spill] sm:$0xff] %v4928_v58  ;;  %v4934_v7 = vld [vmem:[#allocation4 + $0x10] sm:$0xff]  ;;  %v4937_v2 = vld [vmem:[#allocation4 + $0x18] sm:$0xff] }
 0x1ce   :  { %1161 = vmatpush.msra.mxu2 %v4922_v1  ;;  %1181 = vmatpush.msra.mxu3 %v4925_v49  ;;  %6951 = vst [vmem:[#allocation42_spill] sm:$0xff] %v4931_v12  ;;  %v6954_v1 = vld [vmem:[#allocation52_spill] sm:$0xff] }
 0x1cf   :  { %1122 = vmatpush.msrb.mxu0 %v4928_v58  ;;  %1142 = vmatpush.msra.mxu1 %v4931_v12  ;;  %6952 = vst [vmem:[#allocation40_spill] sm:$0xff] %v4934_v7  ;;  %v781_v49 = vsel %vm133_vm1, %v6955_v60, %v6954_v1  ;;  %v6957_v58 = vld [vmem:[#allocation65_spill] sm:$0xff] }
 0x1d0   :  { %1162 = vmatpush.msra.mxu2 %v4934_v7  ;;  %6953 = vst [vmem:[#allocation33_spill] sm:$0xff] %v4937_v2  ;;  %1182 = vmatpush.msra.mxu3 %v4937_v2  ;;  %v782_v59 = vsel %vm4530_vm2, %v6957_v58, %v6956_v57  ;;  %v6959_v2 = vld [vmem:[#allocation72_spill] sm:$0xff] }
 0x1d1   :  { %v784_v43 = vsel %vm4551_vm4, %v6959_v2, %v6958_v5 }
 0x22c   :  { %v802_v6 = vpop.f32.mrf.mxu0  ;;  %v822_v12 = vpop.f32.mrf.mxu1 }
 0x22d   :  { %v865_v31 = vadd.f32 %v802_v6, %v781_v49  ;;  %v866_v51 = vadd.f32 %v822_v12, %v782_v59 }
 0x22f   :  { %v3413_v44 = vmul.f32 -1.442695, %v865_v31  ;;  %v3414_v7 = vmul.f32 -1.442695, %v866_v51  ;;  %v6960_v51 = vld [vmem:[#allocation71_spill] sm:$0xff] }
 0x231   :  { %3533 = vpow2.f32 %v3413_v44  ;;  %v6961_v44 = vld [vmem:[#allocation70_spill] sm:$0xff] }
 0x232   :  { %3535 = vpow2.f32 %v3414_v7  ;;  %v783_v7 = vsel %vm4545_vm3, %v6961_v44, %v6960_v51 }
 0x233   :  { %v862_v11 = vpop.f32.mrf.mxu3  ;;  %v842_v12 = vpop.f32.mrf.mxu2 }
 0x234   :  { %v868_v1 = vadd.f32 %v862_v11, %v784_v43  ;;  %v867_v6 = vadd.f32 %v842_v12, %v783_v7 }
 0x236   :  { %v3415_v60 = vmul.f32 -1.442695, %v868_v1 }
 0x237   :  { %v3534_v42 = vpop.eup %3533 }
 0x238   :  { %v3536_v41 = vpop.eup %3535  ;;  %v872_v40 = vadd.f32 1.0, %v3534_v42  ;;  %3537 = vpow2.f32 %v3415_v60 }
 0x239   :  { %v891_v58 = vadd.f32 1.0, %v3536_v41 }
 0x23a   :  { %3539 = vrcp.f32 %v872_v40  ;;  %v884_v60 = vand.u32 2147483648, %v872_v40  ;;  %v882_v57 = vand.u32 2147483647, %v872_v40  ;;  %vm878_vm11 = vweird.f32 %v872_v40 }
 0x23b   :  { %3541 = vrcp.f32 %v891_v58  ;;  %v903_v41 = vand.u32 2147483648, %v891_v58  ;;  %v901_v50 = vand.u32 2147483647, %v891_v58  ;;  %vm897_vm12 = vweird.f32 %v891_v58 }
 0x23c   :  { %v885_v12 = vor.u32 1.1754944e-38, %v884_v60  ;;  %vm883_vm15 = vcmp.eq.f32.partialorder %v882_v57, 8.507059e+37 }
 0x23d   :  { %vm902_vm0 = vcmp.eq.f32.partialorder %v901_v50, 8.507059e+37 }
 0x23e   :  { %v3538_v49 = vpop.eup %3537 }
 0x23f   :  { %v911_v31 = vadd.f32 1.0, %v3538_v49 }
 0x240   :  { %v3540_v59 = vpop.eup %3539 }
 0x241   :  { %v3542_v2 = vpop.eup %3541  ;;  %v874_v11 = vmul.f32 %v3540_v59, %v872_v40  ;;  %3543 = vrcp.f32 %v911_v31  ;;  %vm879_vm9 = vweird.f32 %v3540_v59  ;;  %vm917_vm8 = vweird.f32 %v911_v31 }
 0x242   :  { %v893_v43 = vmul.f32 %v3542_v2, %v891_v58  ;;  %3545 = vtanh.f32 %v867_v6  ;;  %vm898_vm10 = vweird.f32 %v3542_v2  ;;  %vm880_vm13 = vmor %vm878_vm11, %vm879_vm9 }
 0x243   :  { %v875_v1 = vsub.f32 1.0, %v874_v11  ;;  %vm899_vm14 = vmor %vm897_vm12, %vm898_vm10  ;;  %v904_v11 = vor.u32 1.1754944e-38, %v903_v41  ;;  %v6969_v41 = vld [vmem:[#allocation24_spill] sm:$0xff] }
 0x244   :  { %v894_v42 = vsub.f32 1.0, %v893_v43 }
 0x245   :  { %v876_v5 = vmul.f32 %v3540_v59, %v875_v1 }
 0x246   :  { %v895_v55 = vmul.f32 %v3542_v2, %v894_v42 }
 0x247   :  { %v3544_v47 = vpop.eup %3543  ;;  %v877_v44 = vadd.f32 %v3540_v59, %v876_v5 }
 0x248   :  { %v896_v49 = vadd.f32 %v3542_v2, %v895_v55  ;;  %v913_v7 = vmul.f32 %v3544_v47, %v911_v31  ;;  %v3546_v6 = vpop.eup %3545  ;;  %vm918_vm7 = vweird.f32 %v3544_v47  ;;  %v923_v55 = vand.u32 2147483648, %v911_v31 }
 0x249   :  { %v881_v43 = vsel %vm880_vm13, %v3540_v59, %v877_v44  ;;  %v921_v44 = vand.u32 2147483647, %v911_v31  ;;  %vm919_vm9 = vmor %vm917_vm8, %vm918_vm7  ;;  %v6968_v31 = vld [vmem:[#allocation18_spill] sm:$0xff] }
 0x24a   :  { %v886_v51 = vsel %vm883_vm15, %v885_v12, %v881_v43  ;;  %v900_v1 = vsel %vm899_vm14, %v3542_v2, %v896_v49  ;;  %v914_v39 = vsub.f32 1.0, %v913_v7  ;;  %v924_v59 = vor.u32 1.1754944e-38, %v923_v55  ;;  %v6970_v12 = vld [vmem:[#allocation23_spill] sm:$0xff]  ;;  %v6971_v49 = vld [vmem:[#allocation21_spill] sm:$0xff]  ;;  %v6972_v7 = vld [vmem:[#allocation22_spill] sm:$0xff] }
 0x24b   :  { %v905_v42 = vsel %vm902_vm0, %v904_v11, %v900_v1  ;;  %v928_v38 = vmul.f32 %v3546_v6, %v886_v51  ;;  %vm922_vm10 = vcmp.eq.f32.partialorder %v921_v44, 8.507059e+37  ;;  %v6967_v51 = vld [vmem:[#allocation17_spill] sm:$0xff]  ;;  %v6973_v11 = vld [vmem:[#allocation30_spill] sm:$0xff]  ;;  %v6974_v43 = vld [vmem:[#allocation28_spill] sm:$0xff] }
 0x24c   :  { %v927_v37 = vmul.f32 %v905_v42, %v4743_v48  ;;  %v915_v5 = vmul.f32 %v3544_v47, %v914_v39  ;;  %v6963_v48 = vld [vmem:[#allocation14_spill] sm:$0xff]  ;;  %v6966_v39 = vld [vmem:[#allocation19_spill] sm:$0xff]  ;;  %v6975_v6 = vld [vmem:[#allocation25_spill] sm:$0xff] }
 0x24d   :  { %v6976_v1 = vld [vmem:[#allocation27_spill] sm:$0xff]  ;;  %v6977_v42 = vld [vmem:[#allocation34_spill] sm:$0xff] }
 0x24e   :  { %v4957_v40 = vadd.f32 %v928_v38, %v927_v37  ;;  %v916_v58 = vadd.f32 %v3544_v47, %v915_v5  ;;  %v6964_v37 = vld [vmem:[#allocation15_spill] sm:$0xff]  ;;  %v6965_v38 = vld [vmem:[#allocation20_spill] sm:$0xff] }
 0x24f   :  { %v6978_v5 = vld [vmem:[#allocation32_spill] sm:$0xff]  ;;  %v6980_v55 = vld [vmem:[#allocation31_spill] sm:$0xff] }
 0x250   :  { %3547 = vtanh.f32 %v4957_v40  ;;  %v920_v57 = vsel %vm919_vm9, %v3544_v47, %v916_v58  ;;  %v6962_v47 = vld [vmem:[#allocation16_spill] sm:$0xff]  ;;  %v6979_v58 = vld [vmem:[#allocation26_spill] sm:$0xff]  ;;  %v6981_v44 = vld [vmem:[#allocation39_spill] sm:$0xff] }
 0x251   :  { %v925_v2 = vsel %vm922_vm10, %v924_v59, %v920_v57  ;;  %v6982_v57 = vld [vmem:[#allocation36_spill] sm:$0xff]  ;;  %v6983_v59 = vld [vmem:[#allocation29_spill] sm:$0xff] }
 0x256   :  { %v3548_v50 = vpop.eup %3547 }
 0x257   :  { %v931_v60 = vmul.f32 %v3548_v50, %v925_v2  ;;  %v6984_v50 = vld [vmem:[#allocation35_spill] sm:$0xff]  ;;  %v6985_v2 = vld [vmem:[#allocation42_spill] sm:$0xff] }
 0x259   :  { %932 = vst.msk [vmem:[#allocation3 + $0x10] sm:$0xff] %vm608_vm5, %v931_v60  ;;  %962 = vmatmul.f32.vlgmr.msra.gmra.mxu0 %v931_v60  ;;  %982 = vmatmul.f32.vlgmr.msrb.gmra.mxu1 %v931_v60 }
 0x25a   :  { %933 = vst.msk [vmem:[#allocation3 + $0x28] sm:$0xff] %vm610_vm6, %v931_v60  ;;  %1002 = vmatmul.f32.vlgmr.msrb.gmra.mxu2 %v931_v60  ;;  %1022 = vmatmul.f32.vlgmr.msrb.gmra.mxu3 %v931_v60  ;;  %v6986_v60 = vld [vmem:[#allocation40_spill] sm:$0xff] }
 0x25b   :  { %1268 = vmatpush.msra.mxu0 %v4748_v46  ;;  %1288 = vmatpush.msrb.mxu1 %v4751_v61 }
 0x25c   :  { %1308 = vmatpush.msrb.mxu2 %v4754_v4  ;;  %1328 = vmatpush.msrb.mxu3 %v4757_v3 }
 0x25d   :  { %1269 = vmatpush.msra.mxu0 %v4760_v56  ;;  %1289 = vmatpush.msrb.mxu1 %v4763_v52 }
 0x25e   :  { %1309 = vmatpush.msrb.mxu2 %v4766_v54  ;;  %1329 = vmatpush.msrb.mxu3 %v4769_v10 }
 0x25f   :  { %1270 = vmatpush.msra.mxu0 %v4772_v8  ;;  %1290 = vmatpush.msrb.mxu1 %v4775_v18 }
 0x260   :  { %1310 = vmatpush.msrb.mxu2 %v4778_v63  ;;  %1330 = vmatpush.msrb.mxu3 %v4781_v53 }
 0x261   :  { %1271 = vmatpush.msra.mxu0 %v4784_v45  ;;  %1291 = vmatpush.msrb.mxu1 %v4787_v62 }
 0x262   :  { %1311 = vmatpush.msrb.mxu2 %v4790_v0  ;;  %1331 = vmatpush.msrb.mxu3 %v4793_v9 }
 0x263   :  { %1272 = vmatpush.msra.mxu0 %v4796_v13  ;;  %1292 = vmatpush.msrb.mxu1 %v4799_v14 }
 0x264   :  { %1312 = vmatpush.msrb.mxu2 %v4802_v15  ;;  %1332 = vmatpush.msrb.mxu3 %v4805_v16 }
 0x265   :  { %1273 = vmatpush.msra.mxu0 %v4808_v17  ;;  %1293 = vmatpush.msrb.mxu1 %v4811_v19 }
 0x266   :  { %1313 = vmatpush.msrb.mxu2 %v4814_v20  ;;  %1333 = vmatpush.msrb.mxu3 %v4817_v21 }
 0x267   :  { %1274 = vmatpush.msra.mxu0 %v4820_v22  ;;  %1294 = vmatpush.msrb.mxu1 %v4823_v23 }
 0x268   :  { %1314 = vmatpush.msrb.mxu2 %v4826_v24  ;;  %1334 = vmatpush.msrb.mxu3 %v4829_v25 }
 0x269   :  { %1275 = vmatpush.msra.mxu0 %v4832_v26  ;;  %1295 = vmatpush.msrb.mxu1 %v4835_v27 }
 0x26a   :  { %1315 = vmatpush.msrb.mxu2 %v4838_v28  ;;  %1335 = vmatpush.msrb.mxu3 %v4841_v29 }
 0x26b   :  { %1276 = vmatpush.msra.mxu0 %v4844_v30  ;;  %1296 = vmatpush.msrb.mxu1 %v4847_v32 }
 0x26c   :  { %1316 = vmatpush.msrb.mxu2 %v4850_v33  ;;  %1336 = vmatpush.msrb.mxu3 %v4853_v34 }
 0x26d   :  { %1277 = vmatpush.msra.mxu0 %v4856_v35  ;;  %1297 = vmatpush.msrb.mxu1 %v4859_v36 }
 0x26e   :  { %1317 = vmatpush.msrb.mxu2 %v6962_v47  ;;  %1337 = vmatpush.msrb.mxu3 %v6963_v48 }
 0x26f   :  { %1278 = vmatpush.msra.mxu0 %v6964_v37  ;;  %1298 = vmatpush.msrb.mxu1 %v6965_v38 }
 0x270   :  { %1318 = vmatpush.msrb.mxu2 %v6966_v39  ;;  %1338 = vmatpush.msrb.mxu3 %v6967_v51 }
 0x271   :  { %1279 = vmatpush.msra.mxu0 %v6968_v31  ;;  %1299 = vmatpush.msrb.mxu1 %v6969_v41 }
 0x272   :  { %1319 = vmatpush.msrb.mxu2 %v6970_v12  ;;  %1339 = vmatpush.msrb.mxu3 %v6971_v49 }
 0x273   :  { %1280 = vmatpush.msra.mxu0 %v6972_v7  ;;  %1300 = vmatpush.msrb.mxu1 %v6973_v11 }
 0x274   :  { %1320 = vmatpush.msrb.mxu2 %v6974_v43  ;;  %1340 = vmatpush.msrb.mxu3 %v6975_v6  ;;  %v6991_v43 = vld [vmem:[#allocation60_spill] sm:$0xff] }
 0x275   :  { %1281 = vmatpush.msra.mxu0 %v6976_v1  ;;  %1301 = vmatpush.msrb.mxu1 %v6977_v42  ;;  %v6987_v1 = vld [vmem:[#allocation33_spill] sm:$0xff]  ;;  %v6988_v42 = vld [vmem:[#allocation56_spill] sm:$0xff] }
 0x276   :  { %1321 = vmatpush.msrb.mxu2 %v6978_v5  ;;  %1341 = vmatpush.msrb.mxu3 %v6979_v58  ;;  %v6989_v5 = vld [vmem:[#allocation55_spill] sm:$0xff] }
 0x277   :  { %1282 = vmatpush.msra.mxu0 %v6980_v55  ;;  %1302 = vmatpush.msrb.mxu1 %v6981_v44  ;;  %v942_v58 = vsel %vm133_vm1, %v6989_v5, %v6988_v42  ;;  %v6992_v44 = vld [vmem:[#allocation59_spill] sm:$0xff] }
 0x278   :  { %1322 = vmatpush.msrb.mxu2 %v6982_v57  ;;  %1342 = vmatpush.msrb.mxu3 %v6983_v59  ;;  %v943_v57 = vsel %vm4530_vm2, %v6992_v44, %v6991_v43 }
 0x279   :  { %1283 = vmatpush.msra.mxu0 %v6984_v50  ;;  %1303 = vmatpush.msrb.mxu1 %v6985_v2 }
 0x27a   :  { %1323 = vmatpush.msrb.mxu2 %v6986_v60  ;;  %1343 = vmatpush.msrb.mxu3 %v6987_v1  ;;  %v6994_v60 = vld [vmem:[#allocation67_spill] sm:$0xff]  ;;  %v6995_v1 = vld [vmem:[#allocation66_spill] sm:$0xff] }
 0x27b   :  { %v945_v41 = vsel %vm4551_vm4, %v6995_v1, %v6994_v60 }
 0x2d6   :  { %v963_v55 = vpop.f32.mrf.mxu0  ;;  %v983_v59 = vpop.f32.mrf.mxu1 }
 0x2d7   :  { %v1026_v7 = vadd.f32 %v963_v55, %v942_v58  ;;  %v1027_v50 = vadd.f32 %v983_v59, %v943_v57  ;;  %v6997_v55 = vld [vmem:[#allocation63_spill] sm:$0xff] }
 0x2d9   :  { %v3416_v49 = vmul.f32 -1.442695, %v1026_v7  ;;  %v3417_v2 = vmul.f32 -1.442695, %v1027_v50 }
 0x2db   :  { %3549 = vpow2.f32 %v3416_v49  ;;  %v6998_v49 = vld [vmem:[#allocation61_spill] sm:$0xff] }
 0x2dc   :  { %3551 = vpow2.f32 %v3417_v2  ;;  %v944_v59 = vsel %vm4545_vm3, %v6998_v49, %v6997_v55 }
 0x2dd   :  { %v1023_v6 = vpop.f32.mrf.mxu3  ;;  %v1003_v58 = vpop.f32.mrf.mxu2 }
 0x2de   :  { %v1029_v42 = vadd.f32 %v1023_v6, %v945_v41  ;;  %v1028_v1 = vadd.f32 %v1003_v58, %v944_v59 }
 0x2e0   :  { %v3418_v5 = vmul.f32 -1.442695, %v1029_v42 }
 0x2e1   :  { %v3550_v31 = vpop.eup %3549 }
 0x2e2   :  { %v3552_v51 = vpop.eup %3551  ;;  %v1033_v39 = vadd.f32 1.0, %v3550_v31  ;;  %3553 = vpow2.f32 %v3418_v5 }
 0x2e3   :  { %v1052_v44 = vadd.f32 1.0, %v3552_v51 }
 0x2e4   :  { %3555 = vrcp.f32 %v1033_v39  ;;  %v1045_v5 = vand.u32 2147483648, %v1033_v39  ;;  %v1043_v43 = vand.u32 2147483647, %v1033_v39  ;;  %vm1039_vm13 = vweird.f32 %v1033_v39 }
 0x2e5   :  { %3557 = vrcp.f32 %v1052_v44  ;;  %v1064_v51 = vand.u32 2147483648, %v1052_v44  ;;  %v1062_v38 = vand.u32 2147483647, %v1052_v44  ;;  %vm1058_vm14 = vweird.f32 %v1052_v44 }
 0x2e6   :  { %v1046_v58 = vor.u32 1.1754944e-38, %v1045_v5  ;;  %vm1044_vm7 = vcmp.eq.f32.partialorder %v1043_v43, 8.507059e+37 }
 0x2e7   :  { %vm1063_vm8 = vcmp.eq.f32.partialorder %v1062_v38, 8.507059e+37 }
 0x2e8   :  { %v3554_v7 = vpop.eup %3553 }
 0x2e9   :  { %v1072_v50 = vadd.f32 1.0, %v3554_v7 }
 0x2ea   :  { %v3556_v2 = vpop.eup %3555 }
 0x2eb   :  { %v3558_v60 = vpop.eup %3557  ;;  %v1035_v41 = vmul.f32 %v3556_v2, %v1033_v39  ;;  %3559 = vrcp.f32 %v1072_v50  ;;  %vm1040_vm11 = vweird.f32 %v3556_v2  ;;  %vm1078_vm10 = vweird.f32 %v1072_v50 }
 0x2ec   :  { %v1054_v6 = vmul.f32 %v3558_v60, %v1052_v44  ;;  %3561 = vtanh.f32 %v1028_v1  ;;  %vm1059_vm12 = vweird.f32 %v3558_v60  ;;  %vm1041_vm15 = vmor %vm1039_vm13, %vm1040_vm11 }
 0x2ed   :  { %v1036_v42 = vsub.f32 1.0, %v1035_v41  ;;  %vm1060_vm0 = vmor %vm1058_vm14, %vm1059_vm12  ;;  %v1065_v41 = vor.u32 1.1754944e-38, %v1064_v51  ;;  %v7007_v51 = vld [vmem:[#allocation24_spill] sm:$0xff] }
 0x2ee   :  { %v1055_v31 = vsub.f32 1.0, %v1054_v6 }
 0x2ef   :  { %v1037_v12 = vmul.f32 %v3556_v2, %v1036_v42 }
 0x2f0   :  { %v1056_v11 = vmul.f32 %v3558_v60, %v1055_v31 }
 0x2f1   :  { %v3560_v57 = vpop.eup %3559  ;;  %v1038_v49 = vadd.f32 %v3556_v2, %v1037_v12 }
 0x2f2   :  { %v1057_v7 = vadd.f32 %v3558_v60, %v1056_v11  ;;  %v1074_v59 = vmul.f32 %v3560_v57, %v1072_v50  ;;  %v3562_v1 = vpop.eup %3561  ;;  %vm1079_vm9 = vweird.f32 %v3560_v57  ;;  %v1084_v11 = vand.u32 2147483648, %v1072_v50 }
 0x2f3   :  { %v1042_v6 = vsel %vm1041_vm15, %v3556_v2, %v1038_v49  ;;  %v1082_v49 = vand.u32 2147483647, %v1072_v50  ;;  %vm1080_vm11 = vmor %vm1078_vm10, %vm1079_vm9  ;;  %v7006_v50 = vld [vmem:[#allocation18_spill] sm:$0xff] }
 0x2f4   :  { %v1047_v55 = vsel %vm1044_vm7, %v1046_v58, %v1042_v6  ;;  %v1061_v42 = vsel %vm1060_vm0, %v3558_v60, %v1057_v7  ;;  %v1075_v37 = vsub.f32 1.0, %v1074_v59  ;;  %v1085_v2 = vor.u32 1.1754944e-38, %v1084_v11  ;;  %v7008_v58 = vld [vmem:[#allocation23_spill] sm:$0xff]  ;;  %v7009_v7 = vld [vmem:[#allocation21_spill] sm:$0xff]  ;;  %v7010_v59 = vld [vmem:[#allocation22_spill] sm:$0xff] }
 0x2f5   :  { %v1066_v31 = vsel %vm1063_vm8, %v1065_v41, %v1061_v42  ;;  %v1089_v48 = vmul.f32 %v3562_v1, %v1047_v55  ;;  %vm1083_vm12 = vcmp.eq.f32.partialorder %v1082_v49, 8.507059e+37  ;;  %v7004_v55 = vld [vmem:[#allocation19_spill] sm:$0xff]  ;;  %v7011_v41 = vld [vmem:[#allocation30_spill] sm:$0xff]  ;;  %v7012_v6 = vld [vmem:[#allocation28_spill] sm:$0xff] }
 0x2f6   :  { %v1088_v47 = vmul.f32 %v1066_v31, %v4957_v40  ;;  %v1076_v12 = vmul.f32 %v3560_v57, %v1075_v37  ;;  %v7000_v40 = vld [vmem:[#allocation16_spill] sm:$0xff]  ;;  %v7013_v1 = vld [vmem:[#allocation25_spill] sm:$0xff]  ;;  %v7014_v42 = vld [vmem:[#allocation27_spill] sm:$0xff] }
 0x2f7   :  { %v7003_v37 = vld [vmem:[#allocation20_spill] sm:$0xff]  ;;  %v7015_v31 = vld [vmem:[#allocation34_spill] sm:$0xff]  ;;  %v7018_v11 = vld [vmem:[#allocation31_spill] sm:$0xff] }
 0x2f8   :  { %v5043_v39 = vadd.f32 %v1089_v48, %v1088_v47  ;;  %v1077_v44 = vadd.f32 %v3560_v57, %v1076_v12  ;;  %v7001_v47 = vld [vmem:[#allocation14_spill] sm:$0xff]  ;;  %v7002_v48 = vld [vmem:[#allocation15_spill] sm:$0xff]  ;;  %v7016_v12 = vld [vmem:[#allocation32_spill] sm:$0xff] }
 0x2f9   :  { %v7019_v49 = vld [vmem:[#allocation39_spill] sm:$0xff] }
 0x2fa   :  { %3563 = vtanh.f32 %v5043_v39  ;;  %v1081_v43 = vsel %vm1080_vm11, %v3560_v57, %v1077_v44  ;;  %v7005_v57 = vld [vmem:[#allocation17_spill] sm:$0xff]  ;;  %v7017_v44 = vld [vmem:[#allocation26_spill] sm:$0xff] }
 0x2fb   :  { %v1086_v60 = vsel %vm1083_vm12, %v1085_v2, %v1081_v43  ;;  %v7020_v43 = vld [vmem:[#allocation36_spill] sm:$0xff]  ;;  %v7021_v2 = vld [vmem:[#allocation29_spill] sm:$0xff] }
 0x300   :  { %v3564_v38 = vpop.eup %3563 }
 0x301   :  { %v1092_v5 = vmul.f32 %v3564_v38, %v1086_v60  ;;  %v7022_v38 = vld [vmem:[#allocation35_spill] sm:$0xff]  ;;  %v7023_v60 = vld [vmem:[#allocation42_spill] sm:$0xff] }
 0x303   :  { %1093 = vst.msk [vmem:[#allocation3 + $0x18] sm:$0xff] %vm608_vm5, %v1092_v5  ;;  %1123 = vmatmul.f32.vlgmr.msrb.gmra.mxu0 %v1092_v5  ;;  %1143 = vmatmul.f32.vlgmr.msra.gmra.mxu1 %v1092_v5 }
 0x304   :  { %1094 = vst.msk [vmem:[#allocation3 + $0x20] sm:$0xff] %vm610_vm6, %v1092_v5  ;;  %1163 = vmatmul.f32.vlgmr.msra.gmra.mxu2 %v1092_v5  ;;  %1183 = vmatmul.f32.vlgmr.msra.gmra.mxu3 %v1092_v5  ;;  %v7024_v5 = vld [vmem:[#allocation40_spill] sm:$0xff] }
 0x305   :  { %1429 = vmatpush.msrb.mxu0 %v4748_v46  ;;  %1449 = vmatpush.msra.mxu1 %v4751_v61 }
 0x306   :  { %1469 = vmatpush.msra.mxu2 %v4754_v4  ;;  %1489 = vmatpush.msra.mxu3 %v4757_v3 }
 0x307   :  { %1430 = vmatpush.msrb.mxu0 %v4760_v56  ;;  %1450 = vmatpush.msra.mxu1 %v4763_v52 }
 0x308   :  { %1470 = vmatpush.msra.mxu2 %v4766_v54  ;;  %1490 = vmatpush.msra.mxu3 %v4769_v10 }
 0x309   :  { %1431 = vmatpush.msrb.mxu0 %v4772_v8  ;;  %1451 = vmatpush.msra.mxu1 %v4775_v18 }
 0x30a   :  { %1471 = vmatpush.msra.mxu2 %v4778_v63  ;;  %1491 = vmatpush.msra.mxu3 %v4781_v53 }
 0x30b   :  { %1432 = vmatpush.msrb.mxu0 %v4784_v45  ;;  %1452 = vmatpush.msra.mxu1 %v4787_v62 }
 0x30c   :  { %1472 = vmatpush.msra.mxu2 %v4790_v0  ;;  %1492 = vmatpush.msra.mxu3 %v4793_v9 }
 0x30d   :  { %1433 = vmatpush.msrb.mxu0 %v4796_v13  ;;  %1453 = vmatpush.msra.mxu1 %v4799_v14 }
 0x30e   :  { %1473 = vmatpush.msra.mxu2 %v4802_v15  ;;  %1493 = vmatpush.msra.mxu3 %v4805_v16 }
 0x30f   :  { %1434 = vmatpush.msrb.mxu0 %v4808_v17  ;;  %1454 = vmatpush.msra.mxu1 %v4811_v19 }
 0x310   :  { %1474 = vmatpush.msra.mxu2 %v4814_v20  ;;  %1494 = vmatpush.msra.mxu3 %v4817_v21 }
 0x311   :  { %1435 = vmatpush.msrb.mxu0 %v4820_v22  ;;  %1455 = vmatpush.msra.mxu1 %v4823_v23 }
 0x312   :  { %1475 = vmatpush.msra.mxu2 %v4826_v24  ;;  %1495 = vmatpush.msra.mxu3 %v4829_v25 }
 0x313   :  { %1436 = vmatpush.msrb.mxu0 %v4832_v26  ;;  %1456 = vmatpush.msra.mxu1 %v4835_v27 }
 0x314   :  { %1476 = vmatpush.msra.mxu2 %v4838_v28  ;;  %1496 = vmatpush.msra.mxu3 %v4841_v29 }
 0x315   :  { %1437 = vmatpush.msrb.mxu0 %v4844_v30  ;;  %1457 = vmatpush.msra.mxu1 %v4847_v32 }
 0x316   :  { %1477 = vmatpush.msra.mxu2 %v4850_v33  ;;  %1497 = vmatpush.msra.mxu3 %v4853_v34 }
 0x317   :  { %1438 = vmatpush.msrb.mxu0 %v4856_v35  ;;  %1458 = vmatpush.msra.mxu1 %v4859_v36 }
 0x318   :  { %1478 = vmatpush.msra.mxu2 %v7000_v40  ;;  %1498 = vmatpush.msra.mxu3 %v7001_v47 }
 0x319   :  { %1439 = vmatpush.msrb.mxu0 %v7002_v48  ;;  %1459 = vmatpush.msra.mxu1 %v7003_v37 }
 0x31a   :  { %1479 = vmatpush.msra.mxu2 %v7004_v55  ;;  %1499 = vmatpush.msra.mxu3 %v7005_v57 }
 0x31b   :  { %1440 = vmatpush.msrb.mxu0 %v7006_v50  ;;  %1460 = vmatpush.msra.mxu1 %v7007_v51 }
 0x31c   :  { %1480 = vmatpush.msra.mxu2 %v7008_v58  ;;  %1500 = vmatpush.msra.mxu3 %v7009_v7  ;;  %v7033_v7 = vld [vmem:[#allocation66_spill] sm:$0xff] }
 0x31d   :  { %1441 = vmatpush.msrb.mxu0 %v7010_v59  ;;  %1461 = vmatpush.msra.mxu1 %v7011_v41 }
 0x31e   :  { %1481 = vmatpush.msra.mxu2 %v7012_v6  ;;  %1501 = vmatpush.msra.mxu3 %v7013_v1  ;;  %v7026_v1 = vld [vmem:[#allocation57_spill] sm:$0xff] }
 0x31f   :  { %1442 = vmatpush.msrb.mxu0 %v7014_v42  ;;  %1462 = vmatpush.msra.mxu1 %v7015_v31  ;;  %v7025_v42 = vld [vmem:[#allocation33_spill] sm:$0xff] }
 0x320   :  { %1482 = vmatpush.msra.mxu2 %v7016_v12  ;;  %1502 = vmatpush.msra.mxu3 %v7017_v44 }
 0x321   :  { %1443 = vmatpush.msrb.mxu0 %v7018_v11  ;;  %1463 = vmatpush.msra.mxu1 %v7019_v49  ;;  %v7028_v11 = vld [vmem:[#allocation60_spill] sm:$0xff]  ;;  %v7029_v49 = vld [vmem:[#allocation59_spill] sm:$0xff] }
 0x322   :  { %1483 = vmatpush.msra.mxu2 %v7020_v43  ;;  %1503 = vmatpush.msra.mxu3 %v7021_v2  ;;  %v7030_v41 = vsel %vm4530_vm2, %v7028_v11, %v7029_v49  ;;  %v7036_v49 = vld [vmem:[#allocation63_spill] sm:$0xff] }
 0x323   :  { %1444 = vmatpush.msrb.mxu0 %v7022_v38  ;;  %1464 = vmatpush.msra.mxu1 %v7023_v60 }
 0x324   :  { %1484 = vmatpush.msra.mxu2 %v7024_v5  ;;  %1504 = vmatpush.msra.mxu3 %v7025_v42  ;;  %v7032_v5 = vld [vmem:[#allocation67_spill] sm:$0xff] }
 0x325   :  { %v7034_v42 = vsel %vm4551_vm4, %v7032_v5, %v7033_v7 }
 0x380   :  { %v1124_v31 = vpop.f32.mrf.mxu0  ;;  %v1144_v12 = vpop.f32.mrf.mxu1 }
 0x381   :  { %v1187_v44 = vadd.f32 %v1124_v31, %v7026_v1  ;;  %v1188_v43 = vadd.f32 %v1144_v12, %v7030_v41 }
 0x383   :  { %v3419_v59 = vmul.f32 -1.442695, %v1187_v44  ;;  %v3420_v2 = vmul.f32 -1.442695, %v1188_v43  ;;  %v7037_v43 = vld [vmem:[#allocation61_spill] sm:$0xff] }
 0x385   :  { %3565 = vpow2.f32 %v3419_v59 }
 0x386   :  { %3567 = vpow2.f32 %v3420_v2  ;;  %v7038_v2 = vsel %vm4545_vm3, %v7036_v49, %v7037_v43 }
 0x387   :  { %v1184_v38 = vpop.f32.mrf.mxu3  ;;  %v1164_v41 = vpop.f32.mrf.mxu2 }
 0x388   :  { %v1190_v58 = vadd.f32 %v1184_v38, %v7034_v42  ;;  %v1189_v60 = vadd.f32 %v1164_v41, %v7038_v2 }
 0x38a   :  { %v3421_v51 = vmul.f32 -1.442695, %v1190_v58 }
 0x38b   :  { %v3566_v50 = vpop.eup %3565 }
 0x38c   :  { %v3568_v1 = vpop.eup %3567  ;;  %v1194_v31 = vadd.f32 1.0, %v3566_v50  ;;  %3569 = vpow2.f32 %v3421_v51 }
 0x38d   :  { %v1213_v6 = vadd.f32 1.0, %v3568_v1 }
 0x38e   :  { %3571 = vrcp.f32 %v1194_v31  ;;  %v1206_v51 = vand.u32 2147483648, %v1194_v31  ;;  %v1204_v57 = vand.u32 2147483647, %v1194_v31  ;;  %vm1200_vm15 = vweird.f32 %v1194_v31 }
 0x38f   :  { %3573 = vrcp.f32 %v1213_v6  ;;  %v1225_v5 = vand.u32 2147483648, %v1213_v6  ;;  %v1223_v55 = vand.u32 2147483647, %v1213_v6  ;;  %vm1219_vm0 = vweird.f32 %v1213_v6 }
 0x390   :  { %v1207_v41 = vor.u32 1.1754944e-38, %v1206_v51  ;;  %vm1205_vm9 = vcmp.eq.f32.partialorder %v1204_v57, 8.507059e+37 }
 0x391   :  { %v1226_v2 = vor.u32 1.1754944e-38, %v1225_v5  ;;  %vm1224_vm10 = vcmp.eq.f32.partialorder %v1223_v55, 8.507059e+37 }
 0x392   :  { %v3570_v12 = vpop.eup %3569 }
 0x393   :  { %v1233_v44 = vadd.f32 1.0, %v3570_v12 }
 0x394   :  { %v3572_v59 = vpop.eup %3571 }
 0x395   :  { %v3574_v7 = vpop.eup %3573  ;;  %v1196_v42 = vmul.f32 %v3572_v59, %v1194_v31  ;;  %3575 = vrcp.f32 %v1233_v44  ;;  %vm1201_vm13 = vweird.f32 %v3572_v59  ;;  %v1245_v51 = vand.u32 2147483648, %v1233_v44 }
 0x396   :  { %v1215_v58 = vmul.f32 %v3574_v7, %v1213_v6  ;;  %3577 = vtanh.f32 %v1189_v60  ;;  %vm1220_vm14 = vweird.f32 %v3574_v7  ;;  %vm1202_vm7 = vmor %vm1200_vm15, %vm1201_vm13  ;;  %vm1239_vm12 = vweird.f32 %v1233_v44 }
 0x397   :  { %v1197_v38 = vsub.f32 1.0, %v1196_v42  ;;  %vm1221_vm8 = vmor %vm1219_vm0, %vm1220_vm14 }
 0x398   :  { %v1216_v50 = vsub.f32 1.0, %v1215_v58 }
 0x399   :  { %v1198_v1 = vmul.f32 %v3572_v59, %v1197_v38 }
 0x39a   :  { %v1217_v12 = vmul.f32 %v3574_v7, %v1216_v50 }
 0x39b   :  { %v3576_v11 = vpop.eup %3575  ;;  %v1199_v37 = vadd.f32 %v3572_v59, %v1198_v1 }
 0x39c   :  { %v1218_v49 = vadd.f32 %v3574_v7, %v1217_v12  ;;  %v1235_v43 = vmul.f32 %v3576_v11, %v1233_v44  ;;  %v3578_v60 = vpop.eup %3577  ;;  %vm1240_vm11 = vweird.f32 %v3576_v11 }
 0x39d   :  { %v1203_v42 = vsel %vm1202_vm7, %v3572_v59, %v1199_v37  ;;  %v1243_v37 = vand.u32 2147483647, %v1233_v44  ;;  %vm1241_vm13 = vmor %vm1239_vm12, %vm1240_vm11  ;;  %v1246_v59 = vor.u32 1.1754944e-38, %v1245_v51 }
 0x39e   :  { %v1208_v58 = vsel %vm1205_vm9, %v1207_v41, %v1203_v42  ;;  %v1222_v38 = vsel %vm1221_vm8, %v3574_v7, %v1218_v49  ;;  %v1236_v48 = vsub.f32 1.0, %v1235_v43 }
 0x39f   :  { %v1227_v50 = vsel %vm1224_vm10, %v1226_v2, %v1222_v38  ;;  %v1250_v47 = vmul.f32 %v3578_v60, %v1208_v58  ;;  %vm1244_vm14 = vcmp.eq.f32.partialorder %v1243_v37, 8.507059e+37  ;;  %v5487_v38 = vld [vmem:[#allocation9 + $0x18] sm:$0xff] }
 0x3a0   :  { %v1249_v40 = vmul.f32 %v1227_v50, %v5043_v39  ;;  %v1237_v1 = vmul.f32 %v3576_v11, %v1236_v48  ;;  %v7075_v50 = vld [vmem:[#allocation71_spill] sm:$0xff] }
 0x3a1   :  { %v5485_v39 = vld [vmem:[#allocation9 + $0x30] sm:$0xff] }
 0x3a2   :  { %v5129_v31 = vadd.f32 %v1250_v47, %v1249_v40  ;;  %v1238_v6 = vadd.f32 %v3576_v11, %v1237_v1  ;;  %v7071_v40 = vld [vmem:[#allocation73_spill] sm:$0xff]  ;;  %v7072_v47 = vld [vmem:[#allocation72_spill] sm:$0xff]  ;;  %v7076_v1 = vld [vmem:[#allocation70_spill] sm:$0xff] }
 0x3a3   :  { %v7073_v48 = vsel %vm4551_vm4, %v7071_v40, %v7072_v47 }
 0x3a4   :  { %3579 = vtanh.f32 %v5129_v31  ;;  %v1242_v57 = vsel %vm1241_vm13, %v3576_v11, %v1238_v6  ;;  %v7077_v6 = vsel %vm4545_vm3, %v7075_v50, %v7076_v1 }
 0x3a5   :  { %v1247_v7 = vsel %vm1244_vm14, %v1246_v59, %v1242_v57 }
 0x3aa   :  { %v3580_v55 = vpop.eup %3579 }
 0x3ab   :  { %v1253_v5 = vmul.f32 %v3580_v55, %v1247_v7 }
 0x3ad   :  { %1284 = vmatmul.f32.vlgmr.msra.gmra.mxu0 %v1253_v5  ;;  %1254 = vst.msk [vmem:[#allocation3 + $0x20] sm:$0xff] %vm608_vm5, %v1253_v5  ;;  %1304 = vmatmul.f32.vlgmr.msrb.gmra.mxu1 %v1253_v5 }
 0x3ae   :  { %1255 = vst.msk [vmem:[#allocation3 + $0x18] sm:$0xff] %vm610_vm6, %v1253_v5  ;;  %1324 = vmatmul.f32.vlgmr.msrb.gmra.mxu2 %v1253_v5  ;;  %1344 = vmatmul.f32.vlgmr.msrb.gmra.mxu3 %v1253_v5 }
 0x3af   :  { %1590 = vmatpush.msra.mxu0 %v4748_v46  ;;  %1610 = vmatpush.msrb.mxu1 %v4751_v61  ;;  %v7039_v46 = vld [vmem:[#allocation16_spill] sm:$0xff]  ;;  %v7040_v61 = vld [vmem:[#allocation14_spill] sm:$0xff] }
 0x3b0   :  { %1630 = vmatpush.msrb.mxu2 %v4754_v4  ;;  %1650 = vmatpush.msrb.mxu3 %v4757_v3  ;;  %v7041_v4 = vld [vmem:[#allocation15_spill] sm:$0xff]  ;;  %v7042_v3 = vld [vmem:[#allocation20_spill] sm:$0xff] }
 0x3b1   :  { %1591 = vmatpush.msra.mxu0 %v4760_v56  ;;  %1611 = vmatpush.msrb.mxu1 %v4763_v52  ;;  %v7043_v56 = vld [vmem:[#allocation19_spill] sm:$0xff]  ;;  %v7044_v52 = vld [vmem:[#allocation17_spill] sm:$0xff] }
 0x3b2   :  { %1631 = vmatpush.msrb.mxu2 %v4766_v54  ;;  %1651 = vmatpush.msrb.mxu3 %v4769_v10  ;;  %v7045_v54 = vld [vmem:[#allocation18_spill] sm:$0xff]  ;;  %v7046_v10 = vld [vmem:[#allocation24_spill] sm:$0xff]  ;;  %7125 = vst [vmem:[#allocation17_spill] sm:$0xff] %v5485_v39 }
 0x3b3   :  { %1592 = vmatpush.msra.mxu0 %v4772_v8  ;;  %1612 = vmatpush.msrb.mxu1 %v4775_v18  ;;  %v7047_v8 = vld [vmem:[#allocation23_spill] sm:$0xff]  ;;  %v7048_v18 = vld [vmem:[#allocation21_spill] sm:$0xff]  ;;  %7126 = vst [vmem:[#allocation18_spill] sm:$0xff] %v5487_v38 }
 0x3b4   :  { %1632 = vmatpush.msrb.mxu2 %v4778_v63  ;;  %1652 = vmatpush.msrb.mxu3 %v4781_v53  ;;  %v7049_v63 = vld [vmem:[#allocation22_spill] sm:$0xff] }
 0x3b5   :  { %1593 = vmatpush.msra.mxu0 %v4784_v45  ;;  %1613 = vmatpush.msrb.mxu1 %v4787_v62  ;;  %v7050_v53 = vld [vmem:[#allocation30_spill] sm:$0xff]  ;;  %v7051_v45 = vld [vmem:[#allocation28_spill] sm:$0xff]  ;;  %v7052_v62 = vld [vmem:[#allocation25_spill] sm:$0xff] }
 0x3b6   :  { %1633 = vmatpush.msrb.mxu2 %v4790_v0  ;;  %1653 = vmatpush.msrb.mxu3 %v4793_v9  ;;  %v7053_v0 = vld [vmem:[#allocation27_spill] sm:$0xff]  ;;  %v7054_v9 = vld [vmem:[#allocation34_spill] sm:$0xff] }
 0x3b7   :  { %1594 = vmatpush.msra.mxu0 %v4796_v13  ;;  %1614 = vmatpush.msrb.mxu1 %v4799_v14  ;;  %v7055_v13 = vld [vmem:[#allocation32_spill] sm:$0xff]  ;;  %v7056_v14 = vld [vmem:[#allocation26_spill] sm:$0xff] }
 0x3b8   :  { %1634 = vmatpush.msrb.mxu2 %v4802_v15  ;;  %1654 = vmatpush.msrb.mxu3 %v4805_v16  ;;  %v7057_v15 = vld [vmem:[#allocation31_spill] sm:$0xff] }
 0x3b9   :  { %1595 = vmatpush.msra.mxu0 %v4808_v17  ;;  %1615 = vmatpush.msrb.mxu1 %v4811_v19  ;;  %v7058_v16 = vld [vmem:[#allocation39_spill] sm:$0xff]  ;;  %v7059_v17 = vld [vmem:[#allocation36_spill] sm:$0xff]  ;;  %v7060_v19 = vld [vmem:[#allocation29_spill] sm:$0xff] }
 0x3ba   :  { %1635 = vmatpush.msrb.mxu2 %v4814_v20  ;;  %1655 = vmatpush.msrb.mxu3 %v4817_v21  ;;  %v7061_v20 = vld [vmem:[#allocation35_spill] sm:$0xff]  ;;  %v7062_v21 = vld [vmem:[#allocation42_spill] sm:$0xff] }
 0x3bb   :  { %1596 = vmatpush.msra.mxu0 %v4820_v22  ;;  %1616 = vmatpush.msrb.mxu1 %v4823_v23  ;;  %v7063_v22 = vld [vmem:[#allocation40_spill] sm:$0xff]  ;;  %v7064_v23 = vld [vmem:[#allocation33_spill] sm:$0xff] }
 0x3bc   :  { %1636 = vmatpush.msrb.mxu2 %v4826_v24  ;;  %1656 = vmatpush.msrb.mxu3 %v4829_v25 }
 0x3bd   :  { %1597 = vmatpush.msra.mxu0 %v4832_v26  ;;  %1617 = vmatpush.msrb.mxu1 %v4835_v27  ;;  %v7065_v26 = vld [vmem:[#allocation54_spill] sm:$0xff] }
 0x3be   :  { %1637 = vmatpush.msrb.mxu2 %v4838_v28  ;;  %1657 = vmatpush.msrb.mxu3 %v4841_v29  ;;  %v7067_v29 = vld [vmem:[#allocation68_spill] sm:$0xff]  ;;  %v1743_v28 = vld [vmem:[#allocation3 + $0x20] sm:$0xff] }
 0x3bf   :  { %1598 = vmatpush.msra.mxu0 %v4844_v30  ;;  %1618 = vmatpush.msrb.mxu1 %v4847_v32  ;;  %v7068_v30 = vld [vmem:[#allocation65_spill] sm:$0xff] }
 0x3c0   :  { %1638 = vmatpush.msrb.mxu2 %v4850_v33  ;;  %1658 = vmatpush.msrb.mxu3 %v4853_v34  ;;  %v7069_v32 = vsel %vm4530_vm2, %v7067_v29, %v7068_v30  ;;  %v7078_v29 = vld [vmem:[#allocation51_spill] sm:$0xff] }
 0x3c1   :  { %1599 = vmatpush.msra.mxu0 %v4856_v35  ;;  %1619 = vmatpush.msrb.mxu1 %v4859_v36 }
 0x3c2   :  { %1639 = vmatpush.msrb.mxu2 %v7039_v46  ;;  %1659 = vmatpush.msrb.mxu3 %v7040_v61 }
 0x3c3   :  { %1600 = vmatpush.msra.mxu0 %v7041_v4  ;;  %1620 = vmatpush.msrb.mxu1 %v7042_v3 }
 0x3c4   :  { %1640 = vmatpush.msrb.mxu2 %v7043_v56  ;;  %1660 = vmatpush.msrb.mxu3 %v7044_v52 }
 0x3c5   :  { %1601 = vmatpush.msra.mxu0 %v7045_v54  ;;  %1621 = vmatpush.msrb.mxu1 %v7046_v10 }
 0x3c6   :  { %1641 = vmatpush.msrb.mxu2 %v7047_v8  ;;  %1661 = vmatpush.msrb.mxu3 %v7048_v18 }
 0x3c7   :  { %1602 = vmatpush.msra.mxu0 %v7049_v63  ;;  %1622 = vmatpush.msrb.mxu1 %v7050_v53 }
 0x3c8   :  { %1642 = vmatpush.msrb.mxu2 %v7051_v45  ;;  %1662 = vmatpush.msrb.mxu3 %v7052_v62 }
 0x3c9   :  { %1603 = vmatpush.msra.mxu0 %v7053_v0  ;;  %1623 = vmatpush.msrb.mxu1 %v7054_v9 }
 0x3ca   :  { %1643 = vmatpush.msrb.mxu2 %v7055_v13  ;;  %1663 = vmatpush.msrb.mxu3 %v7056_v14 }
 0x3cb   :  { %1604 = vmatpush.msra.mxu0 %v7057_v15  ;;  %1624 = vmatpush.msrb.mxu1 %v7058_v16 }
 0x3cc   :  { %1644 = vmatpush.msrb.mxu2 %v7059_v17  ;;  %1664 = vmatpush.msrb.mxu3 %v7060_v19 }
 0x3cd   :  { %1605 = vmatpush.msra.mxu0 %v7061_v20  ;;  %1625 = vmatpush.msrb.mxu1 %v7062_v21 }
 0x3ce   :  { %1645 = vmatpush.msrb.mxu2 %v7063_v22  ;;  %1665 = vmatpush.msrb.mxu3 %v7064_v23 }
 0x42a   :  { %v1285_v24 = vpop.f32.mrf.mxu0  ;;  %v1305_v25 = vpop.f32.mrf.mxu1 }
 0x42b   :  { %v1348_v27 = vadd.f32 %v1285_v24, %v7065_v26  ;;  %v1349_v33 = vadd.f32 %v1305_v25, %v7069_v32  ;;  %v7079_v32 = vld [vmem:[#allocation74_spill] sm:$0xff] }
 0x42d   :  { %v3422_v34 = vmul.f32 -1.442695, %v1348_v27  ;;  %v3423_v35 = vmul.f32 -1.442695, %v1349_v33  ;;  %v7080_v33 = vld [vmem:[#allocation69_spill] sm:$0xff] }
 0x42f   :  { %3581 = vpow2.f32 %v3422_v34  ;;  %v7081_v34 = vsel %vm4530_vm2, %v7079_v32, %v7080_v33  ;;  %v7088_v32 = vld [vmem:[#allocation50_spill] sm:$0xff] }
 0x430   :  { %3583 = vpow2.f32 %v3423_v35 }
 0x431   :  { %v1345_v36 = vpop.f32.mrf.mxu3  ;;  %v1325_v2 = vpop.f32.mrf.mxu2 }
 0x432   :  { %v1351_v44 = vadd.f32 %v1345_v36, %v7073_v48  ;;  %v1350_v51 = vadd.f32 %v1325_v2, %v7077_v6  ;;  %v7082_v48 = vld [vmem:[#allocation79_spill] sm:$0xff]  ;;  %v7085_v6 = vld [vmem:[#allocation76_spill] sm:$0xff] }
 0x434   :  { %v3424_v11 = vmul.f32 -1.442695, %v1351_v44  ;;  %v7083_v44 = vld [vmem:[#allocation78_spill] sm:$0xff] }
 0x435   :  { %v3582_v12 = vpop.eup %3581 }
 0x436   :  { %v3584_v41 = vpop.eup %3583  ;;  %v1355_v49 = vadd.f32 1.0, %v3582_v12  ;;  %3585 = vpow2.f32 %v3424_v11  ;;  %v7084_v11 = vsel %vm4551_vm4, %v7082_v48, %v7083_v44  ;;  %v1775_v44 = vld [vmem:[#allocation7 + $0xe0] sm:$0xff] }
 0x437   :  { %v1374_v43 = vadd.f32 1.0, %v3584_v41 }
 0x438   :  { %3587 = vrcp.f32 %v1355_v49  ;;  %v1367_v5 = vand.u32 2147483648, %v1355_v49  ;;  %v1365_v4 = vand.u32 2147483647, %v1355_v49  ;;  %vm1361_vm7 = vweird.f32 %v1355_v49 }
 0x439   :  { %3589 = vrcp.f32 %v1374_v43  ;;  %v1386_v46 = vand.u32 2147483648, %v1374_v43  ;;  %v1384_v56 = vand.u32 2147483647, %v1374_v43  ;;  %vm1380_vm8 = vweird.f32 %v1374_v43 }
 0x43a   :  { %v1368_v10 = vor.u32 1.1754944e-38, %v1367_v5  ;;  %vm1366_vm11 = vcmp.eq.f32.partialorder %v1365_v4, 8.507059e+37 }
 0x43b   :  { %v1387_v63 = vor.u32 1.1754944e-38, %v1386_v46  ;;  %vm1385_vm12 = vcmp.eq.f32.partialorder %v1384_v56, 8.507059e+37 }
 0x43c   :  { %v3586_v42 = vpop.eup %3585 }
 0x43d   :  { %v1394_v60 = vadd.f32 1.0, %v3586_v42 }
 0x43e   :  { %v3588_v58 = vpop.eup %3587 }
 0x43f   :  { %v3590_v37 = vpop.eup %3589  ;;  %v1357_v57 = vmul.f32 %v3588_v58, %v1355_v49  ;;  %3591 = vrcp.f32 %v1394_v60  ;;  %vm1362_vm15 = vweird.f32 %v3588_v58  ;;  %v1406_v20 = vand.u32 2147483648, %v1394_v60 }
 0x440   :  { %v1376_v59 = vmul.f32 %v3590_v37, %v1374_v43  ;;  %3593 = vtanh.f32 %v1350_v51  ;;  %vm1381_vm0 = vweird.f32 %v3590_v37  ;;  %vm1363_vm9 = vmor %vm1361_vm7, %vm1362_vm15  ;;  %vm1400_vm14 = vweird.f32 %v1394_v60  ;;  %v7086_v51 = vld [vmem:[#allocation75_spill] sm:$0xff] }
 0x441   :  { %v1358_v55 = vsub.f32 1.0, %v1357_v57  ;;  %vm1382_vm10 = vmor %vm1380_vm8, %vm1381_vm0  ;;  %v1404_v21 = vand.u32 2147483647, %v1394_v60  ;;  %v1407_v23 = vor.u32 1.1754944e-38, %v1406_v20 }
 0x442   :  { %v1377_v7 = vsub.f32 1.0, %v1376_v59 }
 0x443   :  { %v1359_v61 = vmul.f32 %v3588_v58, %v1358_v55  ;;  %vm1405_vm0 = vcmp.eq.f32.partialorder %v1404_v21, 8.507059e+37 }
 0x444   :  { %v1378_v3 = vmul.f32 %v3590_v37, %v1377_v7 }
 0x445   :  { %v3592_v52 = vpop.eup %3591  ;;  %v1360_v54 = vadd.f32 %v3588_v58, %v1359_v61 }
 0x446   :  { %v1379_v8 = vadd.f32 %v3590_v37, %v1378_v3  ;;  %v1396_v18 = vmul.f32 %v3592_v52, %v1394_v60  ;;  %v3594_v45 = vpop.eup %3593  ;;  %vm1401_vm13 = vweird.f32 %v3592_v52 }
 0x447   :  { %v1364_v53 = vsel %vm1363_vm9, %v3588_v58, %v1360_v54  ;;  %vm1402_vm15 = vmor %vm1400_vm14, %vm1401_vm13 }
 0x448   :  { %v1369_v62 = vsel %vm1366_vm11, %v1368_v10, %v1364_v53  ;;  %v1383_v0 = vsel %vm1382_vm10, %v3590_v37, %v1379_v8  ;;  %v1397_v9 = vsub.f32 1.0, %v1396_v18  ;;  %v7087_v37 = vsel %vm4545_vm3, %v7085_v6, %v7086_v51  ;;  %v1774_v6 = vld [vmem:[#allocation7 + $0xd8] sm:$0xff] }
 0x449   :  { %v1388_v13 = vsel %vm1385_vm12, %v1387_v63, %v1383_v0  ;;  %v1411_v14 = vmul.f32 %v3594_v45, %v1369_v62 }
 0x44a   :  { %v1410_v15 = vmul.f32 %v1388_v13, %v5129_v31  ;;  %v1398_v16 = vmul.f32 %v3592_v52, %v1397_v9 }
 0x44c   :  { %v5215_v17 = vadd.f32 %v1411_v14, %v1410_v15  ;;  %v1399_v19 = vadd.f32 %v3592_v52, %v1398_v16 }
 0x44e   :  { %3595 = vtanh.f32 %v5215_v17  ;;  %v1403_v22 = vsel %vm1402_vm15, %v3592_v52, %v1399_v19 }
 0x44f   :  { %v1408_v25 = vsel %vm1405_vm0, %v1407_v23, %v1403_v22 }
 0x454   :  { %v3596_v24 = vpop.eup %3595 }
 0x455   :  { %v1414_v26 = vmul.f32 %v3596_v24, %v1408_v25 }
 0x457   :  { %1445 = vmatmul.f32.vlgmr.msrb.gmra.mxu0 %v1414_v26  ;;  %1415 = vst.msk [vmem:[#allocation3 + $0x28] sm:$0xff] %vm608_vm5, %v1414_v26  ;;  %1465 = vmatmul.f32.vlgmr.msra.gmra.mxu1 %v1414_v26 }
 0x458   :  { %1416 = vst.msk [vmem:[#allocation3 + $0x10] sm:$0xff] %vm610_vm6, %v1414_v26  ;;  %1485 = vmatmul.f32.vlgmr.msra.gmra.mxu2 %v1414_v26  ;;  %1505 = vmatmul.f32.vlgmr.msra.gmra.mxu3 %v1414_v26 }
 0x459   :  { %1822 = vmatpush.msrb.mxu0 %v1775_v44  ;;  %v5280_v44 = vld [vmem:[#allocation9 + $0x1f8] sm:$0xff] }
 0x4d4   :  { %v1446_v31 = vpop.f32.mrf.mxu0  ;;  %v1466_v27 = vpop.f32.mrf.mxu1 }
 0x4d5   :  { %v1509_v30 = vadd.f32 %v1446_v31, %v7078_v29  ;;  %v1510_v35 = vadd.f32 %v1466_v27, %v7081_v34  ;;  %v7089_v34 = vld [vmem:[#allocation80_spill] sm:$0xff] }
 0x4d7   :  { %v3425_v36 = vmul.f32 -1.442695, %v1509_v30  ;;  %v3426_v40 = vmul.f32 -1.442695, %v1510_v35  ;;  %v7090_v35 = vld [vmem:[#allocation77_spill] sm:$0xff] }
 0x4d9   :  { %3597 = vpow2.f32 %v3425_v36  ;;  %v7091_v36 = vsel %vm4530_vm2, %v7089_v34, %v7090_v35  ;;  %v5269_v34 = vld [vmem:[#allocation9 + $0x1e0] sm:$0xff]  ;;  %v5271_v35 = vld [vmem:[#allocation9 + $0x1e8] sm:$0xff] }
 0x4da   :  { %3599 = vpow2.f32 %v3426_v40 }
 0x4db   :  { %v1506_v47 = vpop.f32.mrf.mxu3  ;;  %v1486_v60 = vpop.f32.mrf.mxu2 }
 0x4dc   :  { %v1512_v12 = vadd.f32 %v1506_v47, %v7084_v11  ;;  %v1511_v57 = vadd.f32 %v1486_v60, %v7087_v37  ;;  %v1776_v11 = vld [vmem:[#allocation7 + $0xe8] sm:$0xff]  ;;  %v1767_v37 = vld [vmem:[#allocation7 + $0xa0] sm:$0xff] }
 0x4dd   :  { %1863 = vmatpush.msra.mxu1 %v1776_v11 }
 0x4de   :  { %v3427_v41 = vmul.f32 -1.442695, %v1512_v12  ;;  %v1777_v12 = vld [vmem:[#allocation7 + $0xf0] sm:$0xff] }
 0x4df   :  { %v3598_v49 = vpop.eup %3597  ;;  %1904 = vmatpush.msra.mxu2 %v1777_v12 }
 0x4e0   :  { %v3600_v43 = vpop.eup %3599  ;;  %v1516_v2 = vadd.f32 1.0, %v3598_v49  ;;  %3601 = vpow2.f32 %v3427_v41  ;;  %v1778_v49 = vld [vmem:[#allocation7 + $0xf8] sm:$0xff] }
 0x4e1   :  { %v1535_v42 = vadd.f32 1.0, %v3600_v43  ;;  %v7092_v43 = vld [vmem:[#allocation84_spill] sm:$0xff]  ;;  %1945 = vmatpush.msra.mxu3 %v1778_v49 }
 0x4e2   :  { %3603 = vrcp.f32 %v1516_v2  ;;  %v1528_v61 = vand.u32 2147483648, %v1516_v2  ;;  %v1526_v56 = vand.u32 2147483647, %v1516_v2  ;;  %vm1522_vm9 = vweird.f32 %v1516_v2 }
 0x4e3   :  { %3605 = vrcp.f32 %v1535_v42  ;;  %v1547_v4 = vand.u32 2147483648, %v1535_v42  ;;  %v1545_v54 = vand.u32 2147483647, %v1535_v42  ;;  %vm1541_vm10 = vweird.f32 %v1535_v42  ;;  %1946 = vmatpush.msra.mxu3 %v1774_v6 }
 0x4e4   :  { %v1529_v18 = vor.u32 1.1754944e-38, %v1528_v61  ;;  %vm1527_vm13 = vcmp.eq.f32.partialorder %v1526_v56, 8.507059e+37  ;;  %v1763_v61 = vld [vmem:[#allocation7 + $0x80] sm:$0xff] }
 0x4e5   :  { %v1548_v45 = vor.u32 1.1754944e-38, %v1547_v4  ;;  %vm1546_vm14 = vcmp.eq.f32.partialorder %v1545_v54, 8.507059e+37  ;;  %v1764_v4 = vld [vmem:[#allocation7 + $0x88] sm:$0xff]  ;;  %v1759_v54 = vld [vmem:[#allocation7 + $0x60] sm:$0xff] }
 0x4e6   :  { %v3602_v58 = vpop.eup %3601 }
 0x4e7   :  { %v1555_v50 = vadd.f32 1.0, %v3602_v58  ;;  %v1771_v58 = vld [vmem:[#allocation7 + $0xc0] sm:$0xff] }
 0x4e8   :  { %v3604_v1 = vpop.eup %3603  ;;  %1823 = vmatpush.msrb.mxu0 %v1771_v58 }
 0x4e9   :  { %v3606_v59 = vpop.eup %3605  ;;  %v1518_v55 = vmul.f32 %v3604_v1, %v1516_v2  ;;  %3607 = vrcp.f32 %v1555_v50  ;;  %vm1523_vm7 = vweird.f32 %v3604_v1  ;;  %v1567_v23 = vand.u32 2147483648, %v1555_v50  ;;  %v7093_v2 = vld [vmem:[#allocation83_spill] sm:$0xff] }
 0x4ea   :  { %v1537_v7 = vmul.f32 %v3606_v59, %v1535_v42  ;;  %3609 = vtanh.f32 %v1511_v57  ;;  %vm1542_vm8 = vweird.f32 %v3606_v59  ;;  %vm1524_vm11 = vmor %vm1522_vm9, %vm1523_vm7  ;;  %vm1561_vm0 = vweird.f32 %v1555_v50  ;;  %v1768_v57 = vld [vmem:[#allocation7 + $0xa8] sm:$0xff]  ;;  %1824 = vmatpush.msrb.mxu0 %v1767_v37 }
 0x4eb   :  { %v1519_v5 = vsub.f32 1.0, %v1518_v55  ;;  %vm1543_vm12 = vmor %vm1541_vm10, %vm1542_vm8  ;;  %v1565_v24 = vand.u32 2147483647, %v1555_v50  ;;  %v1568_v26 = vor.u32 1.1754944e-38, %v1567_v23  ;;  %v7094_v42 = vsel %vm4551_vm4, %v7092_v43, %v7093_v2  ;;  %v1749_v23 = vld [vmem:[#allocation7 + $0x10] sm:$0xff] }
 0x4ec   :  { %v1538_v46 = vsub.f32 1.0, %v1537_v7  ;;  %v1770_v7 = vld [vmem:[#allocation7 + $0xb8] sm:$0xff]  ;;  %1825 = vmatpush.msrb.mxu0 %v1763_v61 }
 0x4ed   :  { %v1520_v3 = vmul.f32 %v3604_v1, %v1519_v5  ;;  %vm1566_vm8 = vcmp.eq.f32.partialorder %v1565_v24, 8.507059e+37  ;;  %1947 = vmatpush.msra.mxu3 %v1770_v7  ;;  %v1750_v24 = vld [vmem:[#allocation7 + $0x18] sm:$0xff] }
 0x4ee   :  { %v1539_v52 = vmul.f32 %v3606_v59, %v1538_v46  ;;  %1826 = vmatpush.msrb.mxu0 %v1759_v54  ;;  %v5295_v61 = vld [vmem:[#allocation9 + $0x1d8] sm:$0xff] }
 0x4ef   :  { %v3608_v10 = vpop.eup %3607  ;;  %v1521_v8 = vadd.f32 %v3604_v1, %v1520_v3  ;;  %v1765_v3 = vld [vmem:[#allocation7 + $0x90] sm:$0xff]  ;;  %v5304_v54 = vld [vmem:[#allocation9 + $0x1b8] sm:$0xff] }
 0x4f0   :  { %v1540_v63 = vadd.f32 %v3606_v59, %v1539_v52  ;;  %v1557_v53 = vmul.f32 %v3608_v10, %v1555_v50  ;;  %v3610_v0 = vpop.eup %3609  ;;  %vm1562_vm15 = vweird.f32 %v3608_v10  ;;  %v1772_v50 = vld [vmem:[#allocation7 + $0xc8] sm:$0xff]  ;;  %v1766_v52 = vld [vmem:[#allocation7 + $0x98] sm:$0xff] }
 0x4f1   :  { %v1525_v62 = vsel %vm1524_vm11, %v3604_v1, %v1521_v8  ;;  %vm1563_vm7 = vmor %vm1561_vm0, %vm1562_vm15  ;;  %v1773_v1 = vld [vmem:[#allocation7 + $0xd0] sm:$0xff]  ;;  %1864 = vmatpush.msra.mxu1 %v1772_v50  ;;  %1948 = vmatpush.msra.mxu3 %v1766_v52  ;;  %v5302_v52 = vld [vmem:[#allocation9 + $0x188] sm:$0xff] }
 0x4f2   :  { %v1530_v9 = vsel %vm1527_vm13, %v1529_v18, %v1525_v62  ;;  %v1544_v13 = vsel %vm1543_vm12, %v3606_v59, %v1540_v63  ;;  %v1558_v14 = vsub.f32 1.0, %v1557_v53  ;;  %1905 = vmatpush.msra.mxu2 %v1773_v1  ;;  %v1769_v59 = vld [vmem:[#allocation7 + $0xb0] sm:$0xff]  ;;  %v1762_v18 = vld [vmem:[#allocation7 + $0x78] sm:$0xff]  ;;  %v1755_v63 = vld [vmem:[#allocation7 + $0x40] sm:$0xff] }
 0x4f3   :  { %v1549_v15 = vsel %vm1546_vm14, %v1548_v45, %v1544_v13  ;;  %v1572_v16 = vmul.f32 %v3610_v0, %v1530_v9  ;;  %1865 = vmatpush.msra.mxu1 %v1768_v57  ;;  %v1761_v8 = vld [vmem:[#allocation7 + $0x70] sm:$0xff]  ;;  %v1756_v53 = vld [vmem:[#allocation7 + $0x48] sm:$0xff]  ;;  %1949 = vmatpush.msra.mxu3 %v1762_v18  ;;  %v1758_v62 = vld [vmem:[#allocation7 + $0x58] sm:$0xff] }
 0x4f4   :  { %v1571_v19 = vmul.f32 %v1549_v15, %v5215_v17  ;;  %v1559_v20 = vmul.f32 %v3608_v10, %v1558_v14  ;;  %1906 = vmatpush.msra.mxu2 %v1769_v59  ;;  %v1757_v45 = vld [vmem:[#allocation7 + $0x50] sm:$0xff]  ;;  %v1751_v0 = vld [vmem:[#allocation7 + $0x20] sm:$0xff]  ;;  %1827 = vmatpush.msrb.mxu0 %v1755_v63  ;;  %v1752_v13 = vld [vmem:[#allocation7 + $0x28] sm:$0xff] }
 0x4f5   :  { %1866 = vmatpush.msra.mxu1 %v1764_v4  ;;  %v1753_v14 = vld [vmem:[#allocation7 + $0x30] sm:$0xff]  ;;  %v1754_v15 = vld [vmem:[#allocation7 + $0x38] sm:$0xff]  ;;  %1950 = vmatpush.msra.mxu3 %v1758_v62  ;;  %v5322_v62 = vld [vmem:[#allocation9 + $0x160] sm:$0xff] }
 0x4f6   :  { %v5237_v21 = vadd.f32 %v1572_v16, %v1571_v19  ;;  %v1560_v22 = vadd.f32 %v3608_v10, %v1559_v20  ;;  %1907 = vmatpush.msra.mxu2 %v1765_v3  ;;  %v1747_v19 = vld [vmem:[#allocation7] sm:$0xff]  ;;  %v1748_v20 = vld [vmem:[#allocation7 + $0x8] sm:$0xff]  ;;  %1828 = vmatpush.msrb.mxu0 %v1751_v0 }
 0x4f7   :  { %1951 = vmatpush.msra.mxu3 %v1754_v15  ;;  %v5324_v0 = vld [vmem:[#allocation9 + $0x168] sm:$0xff]  ;;  %v5332_v15 = vld [vmem:[#allocation9 + $0x140] sm:$0xff] }
 0x4f8   :  { %3611 = vtanh.f32 %v5237_v21  ;;  %v1564_v25 = vsel %vm1563_vm7, %v3608_v10, %v1560_v22  ;;  %v1760_v10 = vld [vmem:[#allocation7 + $0x68] sm:$0xff]  ;;  %1908 = vmatpush.msra.mxu2 %v1761_v8  ;;  %1829 = vmatpush.msrb.mxu0 %v1747_v19  ;;  %v5338_v19 = vld [vmem:[#allocation9 + $0x178] sm:$0xff] }
 0x4f9   :  { %v1569_v27 = vsel %vm1566_vm8, %v1568_v26, %v1564_v25  ;;  %1867 = vmatpush.msra.mxu1 %v1760_v10  ;;  %v7095_v26 = vld [vmem:[#allocation82_spill] sm:$0xff]  ;;  %1952 = vmatpush.msra.mxu3 %v1750_v24  ;;  %v5307_v10 = vld [vmem:[#allocation9 + $0x1f0] sm:$0xff] }
 0x4fa   :  { %1909 = vmatpush.msra.mxu2 %v1757_v45 }
 0x4fb   :  { %1868 = vmatpush.msra.mxu1 %v1756_v53  ;;  %v5454_v53 = vld [vmem:[#allocation9 + $0x90] sm:$0xff] }
 0x4fc   :  { %1910 = vmatpush.msra.mxu2 %v1753_v14  ;;  %v5330_v14 = vld [vmem:[#allocation9 + $0x1d0] sm:$0xff]  ;;  %7116 = vst [vmem:[#allocation67_spill] sm:$0xff] %v5454_v53 }
 0x4fd   :  { %1869 = vmatpush.msra.mxu1 %v1752_v13 }
 0x4fe   :  { %v3612_v31 = vpop.eup %3611  ;;  %1911 = vmatpush.msra.mxu2 %v1749_v23 }
 0x4ff   :  { %v1575_v29 = vmul.f32 %v3612_v31, %v1569_v27  ;;  %v7096_v31 = vld [vmem:[#allocation81_spill] sm:$0xff]  ;;  %1870 = vmatpush.msra.mxu1 %v1748_v20  ;;  %v5340_v20 = vld [vmem:[#allocation9 + $0x1b0] sm:$0xff] }
 0x500   :  { %v7097_v27 = vsel %vm4545_vm3, %v7095_v26, %v7096_v31  ;;  %v5350_v26 = vld [vmem:[#allocation9 + $0x128] sm:$0xff]  ;;  %v5352_v31 = vld [vmem:[#allocation9 + $0x158] sm:$0xff] }
 0x501   :  { %1606 = vmatmul.f32.vlgmr.msra.gmra.mxu0 %v1575_v29  ;;  %1576 = vst.msk [vmem:[#allocation3 + $0x30] sm:$0xff] %vm608_vm5, %v1575_v29  ;;  %1626 = vmatmul.f32.vlgmr.msrb.gmra.mxu1 %v1575_v29 }
 0x502   :  { %1577 = vst.msk [vmem:[#allocation3 + $0x8] sm:$0xff] %vm610_vm6, %v1575_v29  ;;  %1646 = vmatmul.f32.vlgmr.msrb.gmra.mxu2 %v1575_v29  ;;  %1666 = vmatmul.f32.vlgmr.msrb.gmra.mxu3 %v1575_v29 }
 0x503   :  { %2086 = vmatpush.msra.mxu0 %v5269_v34  ;;  %2106 = vmatpush.msrb.mxu1 %v5271_v35 }
 0x504   :  { %2146 = vmatpush.msrb.mxu3 %v5280_v44  ;;  %2126 = vmatpush.msrb.mxu2 %v5307_v10 }
 0x506   :  { %2147 = vmatpush.msrb.mxu3 %v5295_v61  ;;  %2127 = vmatpush.msrb.mxu2 %v5330_v14 }
 0x508   :  { %2148 = vmatpush.msrb.mxu3 %v5304_v54  ;;  %2128 = vmatpush.msrb.mxu2 %v5340_v20 }
 0x57e   :  { %v1607_v17 = vpop.f32.mrf.mxu0  ;;  %v1627_v30 = vpop.f32.mrf.mxu1 }
 0x57f   :  { %v1670_v33 = vadd.f32 %v1607_v17, %v7088_v32  ;;  %v1671_v40 = vadd.f32 %v1627_v30, %v7091_v36 }
 0x581   :  { %v3428_v47 = vmul.f32 -1.442695, %v1670_v33  ;;  %v3429_v48 = vmul.f32 -1.442695, %v1671_v40 }
 0x583   :  { %3613 = vpow2.f32 %v3428_v47  ;;  %v5276_v47 = vld [vmem:[#allocation9 + $0x1c0] sm:$0xff] }
 0x584   :  { %3615 = vpow2.f32 %v3429_v48  ;;  %v5278_v48 = vld [vmem:[#allocation9 + $0x1c8] sm:$0xff]  ;;  %2087 = vmatpush.msra.mxu0 %v5276_v47 }
 0x585   :  { %v1667_v41 = vpop.f32.mrf.mxu3  ;;  %v1647_v9 = vpop.f32.mrf.mxu2  ;;  %2107 = vmatpush.msrb.mxu1 %v5278_v48 }
 0x586   :  { %v1673_v60 = vadd.f32 %v1667_v41, %v7094_v42  ;;  %v1672_v29 = vadd.f32 %v1647_v9, %v7097_v27  ;;  %v5326_v9 = vld [vmem:[#allocation9 + $0x198] sm:$0xff]  ;;  %v5356_v27 = vld [vmem:[#allocation9 + $0x190] sm:$0xff] }
 0x587   :  { %2149 = vmatpush.msrb.mxu3 %v5326_v9  ;;  %2129 = vmatpush.msrb.mxu2 %v5356_v27 }
 0x588   :  { %v3430_v51 = vmul.f32 -1.442695, %v1673_v60 }
 0x589   :  { %v3614_v55 = vpop.eup %3613  ;;  %2150 = vmatpush.msrb.mxu3 %v5338_v19 }
 0x58a   :  { %v3616_v5 = vpop.eup %3615  ;;  %v5253_v46 = vadd.f32 1.0, %v3614_v55  ;;  %3617 = vpow2.f32 %v3430_v51 }
 0x58b   :  { %v5255_v56 = vadd.f32 1.0, %v3616_v5  ;;  %v5291_v5 = vld [vmem:[#allocation9 + $0x1a0] sm:$0xff]  ;;  %2151 = vmatpush.msrb.mxu3 %v5352_v31 }
 0x58c   :  { %3619 = vrcp.f32 %v5253_v46  ;;  %v1689_v40 = vand.u32 2147483648, %v5253_v46  ;;  %v1687_v41 = vand.u32 2147483647, %v5253_v46  ;;  %vm1683_vm11 = vweird.f32 %v5253_v46  ;;  %2088 = vmatpush.msra.mxu0 %v5291_v5 }
 0x58d   :  { %3621 = vrcp.f32 %v5255_v56  ;;  %v1708_v11 = vand.u32 2147483648, %v5255_v56  ;;  %v1706_v43 = vand.u32 2147483647, %v5255_v56  ;;  %vm1702_vm12 = vweird.f32 %v5255_v56 }
 0x58e   :  { %v1690_v60 = vor.u32 1.1754944e-38, %v1689_v40  ;;  %vm1688_vm15 = vcmp.eq.f32.partialorder %v1687_v41, 8.507059e+37  ;;  %v5378_v40 = vld [vmem:[#allocation9 + $0xe8] sm:$0xff]  ;;  %v5386_v41 = vld [vmem:[#allocation9 + $0xc0] sm:$0xff] }
 0x58f   :  { %v1709_v1 = vor.u32 1.1754944e-38, %v1708_v11  ;;  %vm1707_vm0 = vcmp.eq.f32.partialorder %v1706_v43, 8.507059e+37  ;;  %v5380_v11 = vld [vmem:[#allocation9 + $0x118] sm:$0xff]  ;;  %7100 = vst [vmem:[#allocation38_spill] sm:$0xff] %v5386_v41 }
 0x590   :  { %v3618_v16 = vpop.eup %3617  ;;  %v5392_v43 = vld [vmem:[#allocation9 + $0xf8] sm:$0xff] }
 0x591   :  { %v5259_v22 = vadd.f32 1.0, %v3618_v16  ;;  %v5334_v16 = vld [vmem:[#allocation9 + $0x148] sm:$0xff] }
 0x592   :  { %v3620_v25 = vpop.eup %3619 }
 0x593   :  { %v3622_v17 = vpop.eup %3621  ;;  %v1679_v30 = vmul.f32 %v3620_v25, %v5253_v46  ;;  %3623 = vrcp.f32 %v5259_v22  ;;  %vm1684_vm9 = vweird.f32 %v3620_v25  ;;  %v5293_v46 = vld [vmem:[#allocation9 + $0x1a8] sm:$0xff]  ;;  %v1728_v18 = vand.u32 2147483648, %v5259_v22 }
 0x594   :  { %v1698_v32 = vmul.f32 %v3622_v17, %v5255_v56  ;;  %3625 = vtanh.f32 %v1672_v29  ;;  %vm1703_vm10 = vweird.f32 %v3622_v17  ;;  %vm1685_vm13 = vmor %vm1683_vm11, %vm1684_vm9  ;;  %2108 = vmatpush.msrb.mxu1 %v5293_v46  ;;  %v5300_v56 = vld [vmem:[#allocation9 + $0x180] sm:$0xff]  ;;  %vm1722_vm8 = vweird.f32 %v5259_v22 }
 0x595   :  { %v1680_v33 = vsub.f32 1.0, %v1679_v30  ;;  %vm1704_vm14 = vmor %vm1702_vm12, %vm1703_vm10  ;;  %2089 = vmatpush.msra.mxu0 %v5300_v56  ;;  %v1726_v63 = vand.u32 2147483647, %v5259_v22  ;;  %v1729_v13 = vor.u32 1.1754944e-38, %v1728_v18  ;;  %v5358_v29 = vld [vmem:[#allocation9 + $0x100] sm:$0xff]  ;;  %v5364_v30 = vld [vmem:[#allocation9 + $0x138] sm:$0xff] }
 0x596   :  { %v1699_v36 = vsub.f32 1.0, %v1698_v32  ;;  %2109 = vmatpush.msrb.mxu1 %v5302_v52  ;;  %v5366_v32 = vld [vmem:[#allocation9 + $0x170] sm:$0xff]  ;;  %2152 = vmatpush.msrb.mxu3 %v5364_v30 }
 0x597   :  { %v1681_v12 = vmul.f32 %v3620_v25, %v1680_v33  ;;  %2090 = vmatpush.msra.mxu0 %v5322_v62  ;;  %vm1727_vm10 = vcmp.eq.f32.partialorder %v1726_v63, 8.507059e+37  ;;  %2130 = vmatpush.msrb.mxu2 %v5366_v32  ;;  %v5448_v18 = vld [vmem:[#allocation9 + $0xb0] sm:$0xff]  ;;  %v5450_v63 = vld [vmem:[#allocation9 + $0x78] sm:$0xff] }
 0x598   :  { %v1700_v49 = vmul.f32 %v3622_v17, %v1699_v36  ;;  %2110 = vmatpush.msrb.mxu1 %v5324_v0  ;;  %v5376_v36 = vld [vmem:[#allocation9 + $0xe0] sm:$0xff]  ;;  %2153 = vmatpush.msrb.mxu3 %v5380_v11  ;;  %7114 = vst [vmem:[#allocation60_spill] sm:$0xff] %v5448_v18 }
 0x599   :  { %v3624_v2 = vpop.eup %3623  ;;  %v1682_v42 = vadd.f32 %v3620_v25, %v1681_v12  ;;  %2091 = vmatpush.msra.mxu0 %v5332_v15  ;;  %v5384_v12 = vld [vmem:[#allocation9 + $0x150] sm:$0xff]  ;;  %7115 = vst [vmem:[#allocation59_spill] sm:$0xff] %v5450_v63 }
 0x59a   :  { %v1701_v58 = vadd.f32 %v3622_v17, %v1700_v49  ;;  %v1718_v50 = vmul.f32 %v3624_v2, %v5259_v22  ;;  %v3626_v51 = vpop.eup %3625  ;;  %vm1723_vm7 = vweird.f32 %v3624_v2  ;;  %2111 = vmatpush.msrb.mxu1 %v5334_v16  ;;  %v5388_v49 = vld [vmem:[#allocation9 + $0xc8] sm:$0xff]  ;;  %2131 = vmatpush.msrb.mxu2 %v5384_v12 }
 0x59b   :  { %v1686_v6 = vsel %vm1685_vm13, %v3620_v25, %v1682_v42  ;;  %vm5316_vm9 = vmor %vm1722_vm8, %vm1723_vm7  ;;  %v5348_v25 = vld [vmem:[#allocation9 + $0x120] sm:$0xff]  ;;  %7101 = vst [vmem:[#allocation44_spill] sm:$0xff] %v5388_v49  ;;  %2154 = vmatpush.msrb.mxu3 %v5392_v43  ;;  %v1740_v42 = vld [vmem:[#allocation3 + $0x8] sm:$0xff] }
 0x59c   :  { %v1691_v37 = vsel %vm1688_vm15, %v1690_v60, %v1686_v6  ;;  %v1705_v57 = vsel %vm1704_vm14, %v3622_v17, %v1701_v58  ;;  %v1719_v59 = vsub.f32 1.0, %v1718_v50  ;;  %2092 = vmatpush.msra.mxu0 %v5348_v25  ;;  %2112 = vmatpush.msrb.mxu1 %v5350_v26  ;;  %v5360_v17 = vld [vmem:[#allocation9 + $0x108] sm:$0xff]  ;;  %v5404_v60 = vld [vmem:[#allocation9 + $0xa0] sm:$0xff]  ;;  %v5408_v50 = vld [vmem:[#allocation9 + $0xd8] sm:$0xff] }
 0x59d   :  { %v1710_v55 = vsel %vm1707_vm0, %v1709_v1, %v1705_v57  ;;  %v1733_v7 = vmul.f32 %v3626_v51, %v1691_v37  ;;  %7102 = vst [vmem:[#allocation43_spill] sm:$0xff] %v5404_v60  ;;  %v5406_v58 = vld [vmem:[#allocation9 + $0xa8] sm:$0xff]  ;;  %v5412_v1 = vld [vmem:[#allocation9 + $0x110] sm:$0xff]  ;;  %v5414_v6 = vld [vmem:[#allocation9 + $0x80] sm:$0xff]  ;;  %2155 = vmatpush.msrb.mxu3 %v5408_v50 }
 0x59e   :  { %v1732_v4 = vmul.f32 %v1710_v55, %v5237_v21  ;;  %v1720_v3 = vmul.f32 %v3624_v2, %v1719_v59  ;;  %2093 = vmatpush.msra.mxu0 %v5358_v29  ;;  %2113 = vmatpush.msrb.mxu1 %v5360_v17  ;;  %7103 = vst [vmem:[#allocation37_spill] sm:$0xff] %v5406_v58  ;;  %v5416_v51 = vld [vmem:[#allocation9 + $0x88] sm:$0xff]  ;;  %v5420_v37 = vld [vmem:[#allocation9 + $0xb8] sm:$0xff]  ;;  %v5422_v57 = vld [vmem:[#allocation9 + $0xf0] sm:$0xff] }
 0x59f   :  { %7104 = vst [vmem:[#allocation41_spill] sm:$0xff] %v5408_v50  ;;  %2156 = vmatpush.msrb.mxu3 %v5420_v37  ;;  %v1741_v59 = vld [vmem:[#allocation3 + $0x10] sm:$0xff]  ;;  %v5432_v55 = vld [vmem:[#allocation9 + $0x60] sm:$0xff] }
 0x5a0   :  { %v1734_v8 = vadd.f32 %v1733_v7, %v1732_v4  ;;  %v1721_v21 = vadd.f32 %v3624_v2, %v1720_v3  ;;  %2094 = vmatpush.msra.mxu0 %v5376_v36  ;;  %2114 = vmatpush.msrb.mxu1 %v5378_v40  ;;  %7105 = vst [vmem:[#allocation46_spill] sm:$0xff] %v5414_v6  ;;  %v5434_v7 = vld [vmem:[#allocation9 + $0x68] sm:$0xff]  ;;  %v5436_v4 = vld [vmem:[#allocation9 + $0x98] sm:$0xff]  ;;  %v5440_v3 = vld [vmem:[#allocation9 + $0xd0] sm:$0xff] }
 0x5a1   :  { %7106 = vst [vmem:[#allocation45_spill] sm:$0xff] %v5416_v51  ;;  %2157 = vmatpush.msrb.mxu3 %v5436_v4 }
 0x5a2   :  { %3627 = vtanh.f32 %v1734_v8  ;;  %v1725_v45 = vsel %vm5316_vm9, %v3624_v2, %v1721_v21  ;;  %v5394_v2 = vld [vmem:[#allocation9 + $0x130] sm:$0xff]  ;;  %2095 = vmatpush.msra.mxu0 %v5386_v41  ;;  %2115 = vmatpush.msrb.mxu1 %v5388_v49  ;;  %7107 = vst [vmem:[#allocation48_spill] sm:$0xff] %v5420_v37  ;;  %v5442_v8 = vld [vmem:[#allocation9 + $0x40] sm:$0xff]  ;;  %v5444_v21 = vld [vmem:[#allocation9 + $0x48] sm:$0xff] }
 0x5a3   :  { %v1730_v23 = vsel %vm1727_vm10, %v1729_v13, %v1725_v45  ;;  %2132 = vmatpush.msrb.mxu2 %v5394_v2  ;;  %7108 = vst [vmem:[#allocation49_spill] sm:$0xff] %v5432_v55  ;;  %2158 = vmatpush.msrb.mxu3 %v5450_v63  ;;  %v1742_v45 = vld [vmem:[#allocation3 + $0x18] sm:$0xff]  ;;  %v5463_v13 = vld [vmem:[#allocation9 + $0x20] sm:$0xff] }
 0x5a4   :  { %2096 = vmatpush.msra.mxu0 %v5404_v60  ;;  %2116 = vmatpush.msrb.mxu1 %v5406_v58  ;;  %7109 = vst [vmem:[#allocation52_spill] sm:$0xff] %v5434_v7 }
 0x5a5   :  { %2133 = vmatpush.msrb.mxu2 %v5412_v1  ;;  %7110 = vst [vmem:[#allocation53_spill] sm:$0xff] %v5436_v4 }
 0x5a6   :  { %2097 = vmatpush.msra.mxu0 %v5414_v6  ;;  %2117 = vmatpush.msrb.mxu1 %v5416_v51  ;;  %7111 = vst [vmem:[#allocation56_spill] sm:$0xff] %v5440_v3 }
 0x5a7   :  { %2134 = vmatpush.msrb.mxu2 %v5422_v57  ;;  %7112 = vst [vmem:[#allocation55_spill] sm:$0xff] %v5442_v8 }
 0x5a8   :  { %v3628_v22 = vpop.eup %3627  ;;  %2098 = vmatpush.msra.mxu0 %v5432_v55  ;;  %2118 = vmatpush.msrb.mxu1 %v5434_v7  ;;  %7113 = vst [vmem:[#allocation57_spill] sm:$0xff] %v5444_v21 }
 0x5a9   :  { %v1736_v24 = vmul.f32 %v3628_v22, %v1730_v23  ;;  %2135 = vmatpush.msrb.mxu2 %v5440_v3  ;;  %7117 = vst [vmem:[#allocation66_spill] sm:$0xff] %v5463_v13  ;;  %v5465_v22 = vld [vmem:[#allocation9 + $0x28] sm:$0xff]  ;;  %v5467_v23 = vld [vmem:[#allocation9 + $0x70] sm:$0xff] }
 0x5aa   :  { %2099 = vmatpush.msra.mxu0 %v5442_v8  ;;  %2119 = vmatpush.msrb.mxu1 %v5444_v21  ;;  %7118 = vst [vmem:[#allocation63_spill] sm:$0xff] %v5465_v22 }
 0x5ab   :  { %1737 = vst.msk [vmem:[#allocation3 + $0x38] sm:$0xff] %vm608_vm5, %v1736_v24  ;;  %vm1789_vm5 = vcmask 523264   ;;  %2136 = vmatpush.msrb.mxu2 %v5448_v18 }
 0x5ac   :  { %1738 = vst.msk [vmem:[#allocation3] sm:$0xff] %vm610_vm6, %v1736_v24  ;;  %2100 = vmatpush.msra.mxu0 %v5463_v13  ;;  %2120 = vmatpush.msrb.mxu1 %v5465_v22  ;;  %v5471_v24 = vld [vmem:[#allocation9 + $0x58] sm:$0xff]  ;;  %v5494_v22 = vld [vmem:[#allocation9 + $0x10] sm:$0xff] }
 0x5ad   :  { %2137 = vmatpush.msrb.mxu2 %v5454_v53  ;;  %7119 = vst [vmem:[#allocation61_spill] sm:$0xff] %v5467_v23  ;;  %2159 = vmatpush.msrb.mxu3 %v5471_v24 }
 0x5ae   :  { %7120 = vst [vmem:[#allocation16_spill] sm:$0xff] %v5471_v24 }
 0x5af   :  { %2138 = vmatpush.msrb.mxu2 %v5467_v23  ;;  %7127 = vst [vmem:[#allocation24_spill] sm:$0xff] %v5494_v22 }
 0x5b3   :  { %v1739_v33 = vld [vmem:[#allocation3] sm:$0xff] }
 0x5b4   :  { %3431 = vmatmul.msk.f32.vlgmr.msrb.gmra.mxu0 %vm1789_vm5, %v1739_v33  ;;  %3439 = vmatmul.msk.f32.vlgmr.msra.gmra.mxu1 %vm1789_vm5, %v1739_v33 }
 0x5b5   :  { %3447 = vmatmul.msk.f32.vlgmr.msra.gmra.mxu2 %vm1789_vm5, %v1739_v33  ;;  %3455 = vmatmul.msk.f32.vlgmr.msra.gmra.mxu3 %vm1789_vm5, %v1739_v33  ;;  %v5473_v33 = vld [vmem:[#allocation9 + $0x50] sm:$0xff] }
 0x5b6   :  { %7121 = vst [vmem:[#allocation14_spill] sm:$0xff] %v5473_v33  ;;  %2139 = vmatpush.msrb.mxu2 %v5473_v33 }
 0x5b8   :  { %2140 = vmatpush.msrb.mxu2 %v5485_v39 }
 0x5ba   :  { %2141 = vmatpush.msrb.mxu2 %v5494_v22 }
 0x5bc   :  { %3432 = vmatmul.msk.f32.gmra.mxu0 %vm1789_vm5, %v1740_v42  ;;  %3440 = vmatmul.msk.f32.gmra.mxu1 %vm1789_vm5, %v1740_v42 }
 0x5bd   :  { %3448 = vmatmul.msk.f32.gmra.mxu2 %vm1789_vm5, %v1740_v42  ;;  %3456 = vmatmul.msk.f32.gmra.mxu3 %vm1789_vm5, %v1740_v42  ;;  %v5475_v42 = vld [vmem:[#allocation9] sm:$0xff] }
 0x5be   :  { %7122 = vst [vmem:[#allocation15_spill] sm:$0xff] %v5475_v42  ;;  %2101 = vmatpush.msra.mxu0 %v5475_v42  ;;  %2285 = vmatpush.msra.mxu2 %v5307_v10 }
 0x5c0   :  { %2245 = vmatpush.msrb.mxu0 %v5269_v34  ;;  %2286 = vmatpush.msra.mxu2 %v5330_v14 }
 0x5c2   :  { %2246 = vmatpush.msrb.mxu0 %v5276_v47  ;;  %2287 = vmatpush.msra.mxu2 %v5340_v20 }
 0x5c4   :  { %3433 = vmatmul.msk.f32.gmra.mxu0 %vm1789_vm5, %v1741_v59  ;;  %3441 = vmatmul.msk.f32.gmra.mxu1 %vm1789_vm5, %v1741_v59 }
 0x5c5   :  { %3449 = vmatmul.msk.f32.gmra.mxu2 %vm1789_vm5, %v1741_v59  ;;  %3457 = vmatmul.msk.f32.gmra.mxu3 %vm1789_vm5, %v1741_v59  ;;  %v5479_v59 = vld [vmem:[#allocation9 + $0x8] sm:$0xff] }
 0x5c6   :  { %7123 = vst [vmem:[#allocation20_spill] sm:$0xff] %v5479_v59  ;;  %2121 = vmatpush.msrb.mxu1 %v5479_v59  ;;  %2247 = vmatpush.msrb.mxu0 %v5291_v5 }
 0x5c7   :  { %2288 = vmatpush.msra.mxu2 %v5356_v27 }
 0x5c8   :  { %2265 = vmatpush.msra.mxu1 %v5271_v35  ;;  %2248 = vmatpush.msrb.mxu0 %v5300_v56 }
 0x5c9   :  { %2289 = vmatpush.msra.mxu2 %v5366_v32 }
 0x5ca   :  { %2266 = vmatpush.msra.mxu1 %v5278_v48  ;;  %2249 = vmatpush.msrb.mxu0 %v5322_v62 }
 0x5cb   :  { %2290 = vmatpush.msra.mxu2 %v5384_v12 }
 0x5cc   :  { %3434 = vmatmul.msk.f32.gmra.mxu0 %vm1789_vm5, %v1742_v45  ;;  %3442 = vmatmul.msk.f32.gmra.mxu1 %vm1789_vm5, %v1742_v45 }
 0x5cd   :  { %3450 = vmatmul.msk.f32.gmra.mxu2 %vm1789_vm5, %v1742_v45  ;;  %3458 = vmatmul.msk.f32.gmra.mxu3 %vm1789_vm5, %v1742_v45  ;;  %v5481_v45 = vld [vmem:[#allocation9 + $0x38] sm:$0xff] }
 0x5ce   :  { %7124 = vst [vmem:[#allocation19_spill] sm:$0xff] %v5481_v45  ;;  %2160 = vmatpush.msrb.mxu3 %v5481_v45  ;;  %2267 = vmatpush.msra.mxu1 %v5293_v46 }
 0x5cf   :  { %2250 = vmatpush.msrb.mxu0 %v5332_v15  ;;  %2291 = vmatpush.msra.mxu2 %v5394_v2 }
 0x5d0   :  { %2161 = vmatpush.msrb.mxu3 %v5487_v38  ;;  %2268 = vmatpush.msra.mxu1 %v5302_v52 }
 0x5d1   :  { %2251 = vmatpush.msrb.mxu0 %v5348_v25  ;;  %2292 = vmatpush.msra.mxu2 %v5412_v1 }
 0x5d2   :  { %2305 = vmatpush.msra.mxu3 %v5280_v44  ;;  %2269 = vmatpush.msra.mxu1 %v5324_v0 }
 0x5d3   :  { %2252 = vmatpush.msrb.mxu0 %v5358_v29  ;;  %2293 = vmatpush.msra.mxu2 %v5422_v57 }
 0x5d4   :  { %3435 = vmatmul.msk.f32.gmra.mxu0 %vm1789_vm5, %v1743_v28  ;;  %3443 = vmatmul.msk.f32.gmra.mxu1 %vm1789_vm5, %v1743_v28 }
 0x5d5   :  { %3451 = vmatmul.msk.f32.gmra.mxu2 %vm1789_vm5, %v1743_v28  ;;  %3459 = vmatmul.msk.f32.gmra.mxu3 %vm1789_vm5, %v1743_v28  ;;  %v1744_v28 = vld [vmem:[#allocation3 + $0x28] sm:$0xff] }
 0x5d6   :  { %2306 = vmatpush.msra.mxu3 %v5295_v61  ;;  %2270 = vmatpush.msra.mxu1 %v5334_v16 }
 0x5d7   :  { %2253 = vmatpush.msrb.mxu0 %v5376_v36  ;;  %2294 = vmatpush.msra.mxu2 %v5440_v3 }
 0x5d8   :  { %2307 = vmatpush.msra.mxu3 %v5304_v54  ;;  %2271 = vmatpush.msra.mxu1 %v5350_v26 }
 0x5d9   :  { %2254 = vmatpush.msrb.mxu0 %v5386_v41  ;;  %2295 = vmatpush.msra.mxu2 %v5448_v18 }
 0x5da   :  { %2308 = vmatpush.msra.mxu3 %v5326_v9  ;;  %2272 = vmatpush.msra.mxu1 %v5360_v17 }
 0x5db   :  { %2255 = vmatpush.msrb.mxu0 %v5404_v60  ;;  %2296 = vmatpush.msra.mxu2 %v5454_v53 }
 0x5dc   :  { %3436 = vmatmul.msk.f32.gmra.mxu0 %vm1789_vm5, %v1744_v28  ;;  %3444 = vmatmul.msk.f32.gmra.mxu1 %vm1789_vm5, %v1744_v28 }
 0x5dd   :  { %3452 = vmatmul.msk.f32.gmra.mxu2 %vm1789_vm5, %v1744_v28  ;;  %3460 = vmatmul.msk.f32.gmra.mxu3 %vm1789_vm5, %v1744_v28  ;;  %v1745_v28 = vld [vmem:[#allocation3 + $0x30] sm:$0xff] }
 0x5de   :  { %2309 = vmatpush.msra.mxu3 %v5338_v19  ;;  %2273 = vmatpush.msra.mxu1 %v5378_v40 }
 0x5df   :  { %2256 = vmatpush.msrb.mxu0 %v5414_v6  ;;  %2297 = vmatpush.msra.mxu2 %v5467_v23 }
 0x5e0   :  { %2310 = vmatpush.msra.mxu3 %v5352_v31  ;;  %2274 = vmatpush.msra.mxu1 %v5388_v49 }
 0x5e1   :  { %2257 = vmatpush.msrb.mxu0 %v5432_v55  ;;  %2298 = vmatpush.msra.mxu2 %v5473_v33  ;;  %v7129_v55 = vld [vmem:[#allocation63_spill] sm:$0xff] }
 0x5e2   :  { %2311 = vmatpush.msra.mxu3 %v5364_v30  ;;  %2275 = vmatpush.msra.mxu1 %v5406_v58 }
 0x5e3   :  { %2258 = vmatpush.msrb.mxu0 %v5442_v8  ;;  %2299 = vmatpush.msra.mxu2 %v5485_v39 }
 0x5e4   :  { %3437 = vmatmul.msk.f32.gmra.mxu0 %vm1789_vm5, %v1745_v28  ;;  %3445 = vmatmul.msk.f32.gmra.mxu1 %vm1789_vm5, %v1745_v28 }
 0x5e5   :  { %3453 = vmatmul.msk.f32.gmra.mxu2 %vm1789_vm5, %v1745_v28  ;;  %3461 = vmatmul.msk.f32.gmra.mxu3 %vm1789_vm5, %v1745_v28  ;;  %v1746_v28 = vld [vmem:[#allocation3 + $0x38] sm:$0xff] }
 0x5e6   :  { %2312 = vmatpush.msra.mxu3 %v5380_v11  ;;  %2276 = vmatpush.msra.mxu1 %v5416_v51 }
 0x5e7   :  { %2259 = vmatpush.msrb.mxu0 %v5463_v13  ;;  %2300 = vmatpush.msra.mxu2 %v5494_v22 }
 0x5e8   :  { %2313 = vmatpush.msra.mxu3 %v5392_v43  ;;  %2277 = vmatpush.msra.mxu1 %v5434_v7 }
 0x5e9   :  { %2260 = vmatpush.msrb.mxu0 %v5475_v42 }
 0x5ea   :  { %2314 = vmatpush.msra.mxu3 %v5408_v50  ;;  %2278 = vmatpush.msra.mxu1 %v5444_v21 }
 0x5ec   :  { %3438 = vmatmul.msk.f32.gmra.mxu0 %vm1789_vm5, %v1746_v28  ;;  %3446 = vmatmul.msk.f32.gmra.mxu1 %vm1789_vm5, %v1746_v28 }
 0x5ed   :  { %3454 = vmatmul.msk.f32.gmra.mxu2 %vm1789_vm5, %v1746_v28  ;;  %3462 = vmatmul.msk.f32.gmra.mxu3 %vm1789_vm5, %v1746_v28  ;;  %v7128_v28 = vmov 0.0  }
 0x5ee   :  { %2315 = vmatpush.msra.mxu3 %v5420_v37  ;;  %2279 = vmatpush.msra.mxu1 %v7129_v55 }
 0x5f0   :  { %2316 = vmatpush.msra.mxu3 %v5436_v4  ;;  %2280 = vmatpush.msra.mxu1 %v5479_v59 }
 0x5f2   :  { %2317 = vmatpush.msra.mxu3 %v5450_v63 }
 0x5f4   :  { %2102 = vmatmul.f32.vlgmr.msra.gmra.mxu0 %v7128_v28  ;;  %2122 = vmatmul.f32.vlgmr.msrb.gmra.mxu1 %v7128_v28 }
 0x5f5   :  { %2142 = vmatmul.f32.vlgmr.msrb.gmra.mxu2 %v7128_v28  ;;  %2162 = vmatmul.f32.vlgmr.msrb.gmra.mxu3 %v7128_v28 }
 0x5f6   :  { %2318 = vmatpush.msra.mxu3 %v5471_v24  ;;  %2404 = vmatpush.msra.mxu0 %v5269_v34  ;;  %v7130_v34 = vld [vmem:[#allocation49_spill] sm:$0xff] }
 0x5f7   :  { %2424 = vmatpush.msrb.mxu1 %v5271_v35  ;;  %2444 = vmatpush.msrb.mxu2 %v5307_v10 }
 0x5f8   :  { %2319 = vmatpush.msra.mxu3 %v5481_v45  ;;  %2405 = vmatpush.msra.mxu0 %v5276_v47 }
 0x5f9   :  { %2425 = vmatpush.msrb.mxu1 %v5278_v48  ;;  %2445 = vmatpush.msrb.mxu2 %v5330_v14  ;;  %v1779_v48 = vld [vmem:[%s6529_s6] sm:$0xf] }
 0x5fa   :  { %2320 = vmatpush.msra.mxu3 %v5487_v38  ;;  %2406 = vmatpush.msra.mxu0 %v5291_v5  ;;  %v5653_v28 = vperm.slane %v1779_v48, 1 }
 0x5fb   :  { %2426 = vmatpush.msrb.mxu1 %v5293_v46  ;;  %2446 = vmatpush.msrb.mxu2 %v5340_v20 }
 0x5fc   :  { %2464 = vmatpush.msrb.mxu3 %v5280_v44  ;;  %2407 = vmatpush.msra.mxu0 %v5300_v56  ;;  %v5651_v44 = vperm.slane %v1779_v48, 0 }
 0x5fd   :  { %2427 = vmatpush.msrb.mxu1 %v5302_v52  ;;  %2447 = vmatpush.msrb.mxu2 %v5356_v27 }
 0x5fe   :  { %2465 = vmatpush.msrb.mxu3 %v5295_v61  ;;  %2408 = vmatpush.msra.mxu0 %v5322_v62 }
 0x5ff   :  { %2428 = vmatpush.msrb.mxu1 %v5324_v0  ;;  %2448 = vmatpush.msrb.mxu2 %v5366_v32 }
 0x600   :  { %2466 = vmatpush.msrb.mxu3 %v5304_v54  ;;  %2409 = vmatpush.msra.mxu0 %v5332_v15 }
 0x601   :  { %2429 = vmatpush.msrb.mxu1 %v5334_v16  ;;  %2449 = vmatpush.msrb.mxu2 %v5384_v12 }
 0x602   :  { %2467 = vmatpush.msrb.mxu3 %v5326_v9  ;;  %2410 = vmatpush.msra.mxu0 %v5348_v25 }
 0x603   :  { %2430 = vmatpush.msrb.mxu1 %v5350_v26  ;;  %2450 = vmatpush.msrb.mxu2 %v5394_v2 }
 0x604   :  { %2468 = vmatpush.msrb.mxu3 %v5338_v19  ;;  %2411 = vmatpush.msra.mxu0 %v5358_v29 }
 0x605   :  { %2431 = vmatpush.msrb.mxu1 %v5360_v17  ;;  %2451 = vmatpush.msrb.mxu2 %v5412_v1 }
 0x606   :  { %2469 = vmatpush.msrb.mxu3 %v5352_v31  ;;  %2412 = vmatpush.msra.mxu0 %v5376_v36 }
 0x607   :  { %2432 = vmatpush.msrb.mxu1 %v5378_v40  ;;  %2452 = vmatpush.msrb.mxu2 %v5422_v57 }
 0x608   :  { %2470 = vmatpush.msrb.mxu3 %v5364_v30  ;;  %2413 = vmatpush.msra.mxu0 %v5386_v41 }
 0x609   :  { %2433 = vmatpush.msrb.mxu1 %v5388_v49  ;;  %2453 = vmatpush.msrb.mxu2 %v5440_v3 }
 0x60a   :  { %2471 = vmatpush.msrb.mxu3 %v5380_v11  ;;  %2414 = vmatpush.msra.mxu0 %v5404_v60 }
 0x60b   :  { %2434 = vmatpush.msrb.mxu1 %v5406_v58  ;;  %2454 = vmatpush.msrb.mxu2 %v5448_v18 }
 0x60c   :  { %2472 = vmatpush.msrb.mxu3 %v5392_v43  ;;  %2415 = vmatpush.msra.mxu0 %v5414_v6 }
 0x60d   :  { %2435 = vmatpush.msrb.mxu1 %v5416_v51  ;;  %2455 = vmatpush.msrb.mxu2 %v5454_v53 }
 0x60e   :  { %2473 = vmatpush.msrb.mxu3 %v5408_v50  ;;  %2416 = vmatpush.msra.mxu0 %v7130_v34 }
 0x60f   :  { %2436 = vmatpush.msrb.mxu1 %v5434_v7  ;;  %2456 = vmatpush.msrb.mxu2 %v5467_v23 }
 0x610   :  { %2474 = vmatpush.msrb.mxu3 %v5420_v37  ;;  %2417 = vmatpush.msra.mxu0 %v5442_v8 }
 0x611   :  { %2437 = vmatpush.msrb.mxu1 %v5444_v21  ;;  %2457 = vmatpush.msrb.mxu2 %v5473_v33 }
 0x612   :  { %2475 = vmatpush.msrb.mxu3 %v5436_v4  ;;  %2418 = vmatpush.msra.mxu0 %v5463_v13  ;;  %v5667_v13 = vperm.slane %v1779_v48, 3 }
 0x613   :  { %2438 = vmatpush.msrb.mxu1 %v7129_v55  ;;  %2458 = vmatpush.msrb.mxu2 %v5485_v39  ;;  %v5665_v55 = vperm.slane %v1779_v48, 2 }
 0x614   :  { %2476 = vmatpush.msrb.mxu3 %v5450_v63  ;;  %2419 = vmatpush.msra.mxu0 %v5475_v42 }
 0x615   :  { %2439 = vmatpush.msrb.mxu1 %v5479_v59  ;;  %2459 = vmatpush.msrb.mxu2 %v5494_v22 }
 0x616   :  { %2477 = vmatpush.msrb.mxu3 %v5471_v24 }
 0x618   :  { %2478 = vmatpush.msrb.mxu3 %v5481_v45 }
 0x61a   :  { %2479 = vmatpush.msrb.mxu3 %v5487_v38 }
 0x631   :  { %v5644_v35 = vpop.f32.mrf.mxu0  ;;  %v5646_v47 = vpop.f32.mrf.mxu1 }
 0x638   :  { %v5655_v45 = vpop.f32.mrf.mxu2  ;;  %v5657_v42 = vpop.f32.mrf.mxu3 }
 0x639   :  { %v1834_v59 = vpop.f32.mrf.mxu0  ;;  %v1875_v22 = vpop.f32.mrf.mxu1 }
 0x63a   :  { %v5660_v38 = vadd.f32 %v1834_v59, %v5651_v44  ;;  %v5663_v39 = vadd.f32 %v1875_v22, %v5653_v28 }
 0x63c   :  { %7131 = vst [vmem:[#allocation23_spill] sm:$0xff] %v5663_v39 }
 0x640   :  { %v1916_v24 = vpop.f32.mrf.mxu2  ;;  %v1957_v33 = vpop.f32.mrf.mxu3 }
 0x641   :  { %v5670_v21 = vadd.f32 %v1916_v24, %v5665_v55  ;;  %v5673_v8 = vadd.f32 %v1957_v33, %v5667_v13  ;;  %v1837_v63 = vpop.f32.mrf.mxu0  ;;  %v1878_v23 = vpop.f32.mrf.mxu1 }
 0x642   :  { %v1838_v59 = vadd.f32 %v1837_v63, %v5651_v44  ;;  %v5677_v7 = vadd.f32 %v1878_v23, %v5653_v28 }
 0x643   :  { %7132 = vst [vmem:[#allocation21_spill] sm:$0xff] %v5670_v21 }
 0x644   :  { %7133 = vst [vmem:[#allocation22_spill] sm:$0xff] %v5673_v8 }
 0x645   :  { %7134 = vst [vmem:[#allocation30_spill] sm:$0xff] %v5677_v7 }
 0x648   :  { %v1919_v22 = vpop.f32.mrf.mxu2  ;;  %v1960_v34 = vpop.f32.mrf.mxu3 }
 0x649   :  { %v5680_v48 = vadd.f32 %v1919_v22, %v5665_v55  ;;  %v5683_v4 = vadd.f32 %v1960_v34, %v5667_v13  ;;  %v1840_v24 = vpop.f32.mrf.mxu0  ;;  %v1881_v53 = vpop.f32.mrf.mxu1 }
 0x64a   :  { %v1841_v33 = vadd.f32 %v1840_v24, %v5651_v44  ;;  %v5687_v51 = vadd.f32 %v1881_v53, %v5653_v28 }
 0x64b   :  { %7135 = vst [vmem:[#allocation28_spill] sm:$0xff] %v5680_v48  ;;  %v1832_v48 = vadd.f32 %v5644_v35, %v5651_v44 }
 0x64c   :  { %7136 = vst [vmem:[#allocation25_spill] sm:$0xff] %v5683_v4 }
 0x64d   :  { %7137 = vst [vmem:[#allocation27_spill] sm:$0xff] %v5687_v51 }
 0x650   :  { %v1922_v6 = vpop.f32.mrf.mxu2  ;;  %v1963_v63 = vpop.f32.mrf.mxu3 }
 0x651   :  { %v5690_v23 = vadd.f32 %v1922_v6, %v5665_v55  ;;  %v5693_v37 = vadd.f32 %v1963_v63, %v5667_v13  ;;  %v1843_v22 = vpop.f32.mrf.mxu0  ;;  %v1884_v18 = vpop.f32.mrf.mxu1 }
 0x652   :  { %v1844_v34 = vadd.f32 %v1843_v22, %v5651_v44  ;;  %v5697_v58 = vadd.f32 %v1884_v18, %v5653_v28 }
 0x653   :  { %7138 = vst [vmem:[#allocation34_spill] sm:$0xff] %v5690_v23 }
 0x654   :  { %7139 = vst [vmem:[#allocation32_spill] sm:$0xff] %v5693_v37  ;;  %v5701_v24 = vsel %vm133_vm1, %v1841_v33, %v1844_v34  ;;  %v5709_v63 = vsel %vm133_vm1, %v1844_v34, %v1841_v33 }
 0x655   :  { %7140 = vst [vmem:[#allocation26_spill] sm:$0xff] %v5697_v58 }
 0x656   :  { %7142 = vst [vmem:[#allocation31_spill] sm:$0xff] %v5701_v24 }
 0x657   :  { %7144 = vst [vmem:[#allocation39_spill] sm:$0xff] %v5709_v63 }
 0x658   :  { %v1925_v18 = vpop.f32.mrf.mxu2  ;;  %v1966_v50 = vpop.f32.mrf.mxu3 }
 0x659   :  { %v5716_v3 = vadd.f32 %v1925_v18, %v5665_v55  ;;  %v5719_v24 = vadd.f32 %v1966_v50, %v5667_v13  ;;  %v1846_v49 = vpop.f32.mrf.mxu0  ;;  %v1887_v41 = vpop.f32.mrf.mxu1 }
 0x65a   :  { %v1847_v6 = vadd.f32 %v1846_v49, %v5651_v44  ;;  %v5723_v33 = vadd.f32 %v1887_v41, %v5653_v28 }
 0x65b   :  { %7145 = vst [vmem:[#allocation36_spill] sm:$0xff] %v5716_v3 }
 0x65c   :  { %7146 = vst [vmem:[#allocation29_spill] sm:$0xff] %v5719_v24  ;;  %v5743_v49 = vsel %vm133_vm1, %v1838_v59, %v1847_v6  ;;  %v5751_v18 = vsel %vm133_vm1, %v1847_v6, %v1838_v59 }
 0x65d   :  { %7147 = vst [vmem:[#allocation35_spill] sm:$0xff] %v5723_v33 }
 0x65e   :  { %7150 = vst [vmem:[#allocation42_spill] sm:$0xff] %v5743_v49 }
 0x65f   :  { %7151 = vst [vmem:[#allocation40_spill] sm:$0xff] %v5751_v18 }
 0x660   :  { %v1928_v3 = vpop.f32.mrf.mxu2  ;;  %v1969_v41 = vpop.f32.mrf.mxu3 }
 0x661   :  { %v5758_v23 = vadd.f32 %v1928_v3, %v5665_v55  ;;  %v5761_v24 = vadd.f32 %v1969_v41, %v5667_v13  ;;  %v1849_v37 = vpop.f32.mrf.mxu0  ;;  %v1890_v58 = vpop.f32.mrf.mxu1 }
 0x662   :  { %v1850_v22 = vadd.f32 %v1849_v37, %v5651_v44  ;;  %v5765_v59 = vadd.f32 %v1890_v58, %v5653_v28 }
 0x663   :  { %7152 = vst [vmem:[#allocation33_spill] sm:$0xff] %v5758_v23 }
 0x664   :  { %7153 = vst [vmem:[#allocation54_spill] sm:$0xff] %v5761_v24  ;;  %v5786_v37 = vsel %vm133_vm1, %v5660_v38, %v1850_v22  ;;  %v5795_v6 = vsel %vm133_vm1, %v1850_v22, %v5660_v38  ;;  %v5811_v38 = vadd.f32 %v5646_v47, %v5653_v28 }
 0x665   :  { %7154 = vst [vmem:[#allocation68_spill] sm:$0xff] %v5765_v59 }
 0x666   :  { %7155 = vst [vmem:[#allocation65_spill] sm:$0xff] %v5795_v6 }
 0x667   :  { %7158 = vst [vmem:[#allocation71_spill] sm:$0xff] %v5811_v38 }
 0x668   :  { %v1931_v58 = vpop.f32.mrf.mxu2  ;;  %v1972_v3 = vpop.f32.mrf.mxu3 }
 0x669   :  { %v5802_v18 = vadd.f32 %v1931_v58, %v5665_v55  ;;  %v5805_v51 = vadd.f32 %v1972_v3, %v5667_v13  ;;  %v1852_v23 = vpop.f32.mrf.mxu0  ;;  %v1893_v50 = vpop.f32.mrf.mxu1 }
 0x66a   :  { %v1853_v22 = vadd.f32 %v1852_v23, %v5651_v44  ;;  %v5815_v41 = vadd.f32 %v1893_v50, %v5653_v28  ;;  %v5843_v23 = vadd.f32 %v5655_v45, %v5665_v55  ;;  %v5847_v50 = vadd.f32 %v5657_v42, %v5667_v13 }
 0x66b   :  { %7156 = vst [vmem:[#allocation73_spill] sm:$0xff] %v5802_v18 }
 0x66c   :  { %7157 = vst [vmem:[#allocation72_spill] sm:$0xff] %v5805_v51  ;;  %v5835_v44 = vsel %vm133_vm1, %v1853_v22, %v1832_v48  ;;  %v2083_v45 = vsel %vm4530_vm2, %v5811_v38, %v5815_v41 }
 0x66d   :  { %7159 = vst [vmem:[#allocation70_spill] sm:$0xff] %v5815_v41 }
 0x66e   :  { %7160 = vst [vmem:[#allocation51_spill] sm:$0xff] %v5835_v44  ;;  %v2082_v44 = vsel %vm133_vm1, %v1832_v48, %v1853_v22 }
 0x66f   :  { %7161 = vst [vmem:[#allocation74_spill] sm:$0xff] %v5843_v23 }
 0x670   :  { %7162 = vst [vmem:[#allocation69_spill] sm:$0xff] %v5847_v50  ;;  %v1934_v35 = vpop.f32.mrf.mxu2  ;;  %v1975_v3 = vpop.f32.mrf.mxu3 }
 0x671   :  { %v5850_v47 = vadd.f32 %v1934_v35, %v5665_v55  ;;  %v5853_v58 = vadd.f32 %v1975_v3, %v5667_v13  ;;  %v2103_v28 = vpop.f32.mrf.mxu0  ;;  %v2123_v6 = vpop.f32.mrf.mxu1 }
 0x672   :  { %v2166_v42 = vadd.f32 %v2103_v28, %v2082_v44  ;;  %v2167_v24 = vadd.f32 %v2123_v6, %v2083_v45 }
 0x673   :  { %7163 = vst [vmem:[#allocation79_spill] sm:$0xff] %v5850_v47  ;;  %v2085_v3 = vsel %vm4551_vm4, %v5847_v50, %v5853_v58 }
 0x674   :  { %7164 = vst [vmem:[#allocation78_spill] sm:$0xff] %v5853_v58  ;;  %v3463_v48 = vmul.f32 -1.442695, %v2166_v42  ;;  %v3464_v22 = vmul.f32 -1.442695, %v2167_v24  ;;  %v2084_v24 = vsel %vm4545_vm3, %v5843_v23, %v5850_v47 }
 0x676   :  { %3629 = vpow2.f32 %v3463_v48 }
 0x677   :  { %3631 = vpow2.f32 %v3464_v22 }
 0x678   :  { %v2163_v6 = vpop.f32.mrf.mxu3  ;;  %v2143_v13 = vpop.f32.mrf.mxu2 }
 0x679   :  { %v2169_v35 = vadd.f32 %v2163_v6, %v2085_v3  ;;  %v2168_v50 = vadd.f32 %v2143_v13, %v2084_v24 }
 0x67b   :  { %v3465_v44 = vmul.f32 -1.442695, %v2169_v35 }
 0x67c   :  { %v3630_v28 = vpop.eup %3629 }
 0x67d   :  { %v3632_v45 = vpop.eup %3631  ;;  %v2173_v55 = vadd.f32 1.0, %v3630_v28  ;;  %3633 = vpow2.f32 %v3465_v44 }
 0x67e   :  { %v2192_v60 = vadd.f32 1.0, %v3632_v45 }
 0x67f   :  { %3635 = vrcp.f32 %v2173_v55  ;;  %v2185_v44 = vand.u32 2147483648, %v2173_v55  ;;  %v2183_v41 = vand.u32 2147483647, %v2173_v55  ;;  %vm2179_vm12 = vweird.f32 %v2173_v55 }
 0x680   :  { %3637 = vrcp.f32 %v2192_v60  ;;  %v2204_v45 = vand.u32 2147483648, %v2192_v60  ;;  %v2202_v33 = vand.u32 2147483647, %v2192_v60  ;;  %vm2198_vm13 = vweird.f32 %v2192_v60 }
 0x681   :  { %v2186_v13 = vor.u32 1.1754944e-38, %v2185_v44  ;;  %vm2184_vm15 = vcmp.eq.f32.partialorder %v2183_v41, 8.507059e+37 }
 0x682   :  { %v2205_v47 = vor.u32 1.1754944e-38, %v2204_v45  ;;  %vm2203_vm7 = vcmp.eq.f32.partialorder %v2202_v33, 8.507059e+37 }
 0x683   :  { %v3634_v42 = vpop.eup %3633 }
 0x684   :  { %v2212_v48 = vadd.f32 1.0, %v3634_v42 }
 0x685   :  { %v3636_v22 = vpop.eup %3635 }
 0x686   :  { %v3638_v58 = vpop.eup %3637  ;;  %v2175_v3 = vmul.f32 %v3636_v22, %v2173_v55  ;;  %3639 = vrcp.f32 %v2212_v48  ;;  %vm2180_vm6 = vweird.f32 %v3636_v22  ;;  %vm2218_vm9 = vweird.f32 %v2212_v48 }
 0x687   :  { %v2194_v6 = vmul.f32 %v3638_v58, %v2192_v60  ;;  %3641 = vtanh.f32 %v2168_v50  ;;  %vm2199_vm11 = vweird.f32 %v3638_v58  ;;  %vm2181_vm14 = vmor %vm2179_vm12, %vm2180_vm6 }
 0x688   :  { %v2176_v35 = vsub.f32 1.0, %v2175_v3  ;;  %vm2200_vm0 = vmor %vm2198_vm13, %vm2199_vm11 }
 0x689   :  { %v2195_v28 = vsub.f32 1.0, %v2194_v6 }
 0x68a   :  { %v2177_v38 = vmul.f32 %v3636_v22, %v2176_v35 }
 0x68b   :  { %v2196_v4 = vmul.f32 %v3638_v58, %v2195_v28 }
 0x68c   :  { %v3640_v7 = vpop.eup %3639  ;;  %v2178_v23 = vadd.f32 %v3636_v22, %v2177_v38 }
 0x68d   :  { %v2197_v42 = vadd.f32 %v3638_v58, %v2196_v4  ;;  %v2214_v24 = vmul.f32 %v3640_v7, %v2212_v48  ;;  %v3642_v50 = vpop.eup %3641  ;;  %vm2219_vm8 = vweird.f32 %v3640_v7  ;;  %v2224_v4 = vand.u32 2147483648, %v2212_v48 }
 0x68e   :  { %v2182_v3 = vsel %vm2181_vm14, %v3636_v22, %v2178_v23  ;;  %v2222_v23 = vand.u32 2147483647, %v2212_v48  ;;  %vm2220_vm10 = vmor %vm2218_vm9, %vm2219_vm8 }
 0x68f   :  { %v2187_v6 = vsel %vm2184_vm15, %v2186_v13, %v2182_v3  ;;  %v2201_v35 = vsel %vm2200_vm0, %v3638_v58, %v2197_v42  ;;  %v2215_v49 = vsub.f32 1.0, %v2214_v24  ;;  %v2225_v55 = vor.u32 1.1754944e-38, %v2224_v4 }
 0x690   :  { %v2206_v28 = vsel %vm2203_vm7, %v2205_v47, %v2201_v35  ;;  %v2229_v18 = vmul.f32 %v3642_v50, %v2187_v6  ;;  %vm2223_vm5 = vcmp.eq.f32.partialorder %v2222_v23, 8.507059e+37  ;;  %v7194_v47 = vsel %vm4530_vm2, %v5663_v39, %v5765_v59  ;;  %v6144_v39 = vld [vmem:[#allocation9 + $0x30] sm:$0xff]  ;;  %v6147_v59 = vld [vmem:[#allocation9 + $0x38] sm:$0xff] }
 0x691   :  { %v2228_v21 = vmul.f32 0.0, %v2206_v28  ;;  %v2216_v34 = vmul.f32 %v3640_v7, %v2215_v49  ;;  %v5899_v49 = vld [vmem:[#allocation9 + $0x1c8] sm:$0xff]  ;;  %v7195_v42 = vsel %vm4551_vm4, %v5673_v8, %v5805_v51  ;;  %v6138_v8 = vld [vmem:[#allocation9 + $0x20] sm:$0xff] }
 0x692   :  { %v6141_v51 = vld [vmem:[#allocation9 + $0x28] sm:$0xff] }
 0x693   :  { %v5877_v38 = vadd.f32 %v2229_v18, %v2228_v21  ;;  %v2217_v60 = vadd.f32 %v3640_v7, %v2216_v34  ;;  %v5886_v21 = vld [vmem:[#allocation9 + $0x1e0] sm:$0xff]  ;;  %v5889_v34 = vld [vmem:[#allocation9 + $0x1e8] sm:$0xff] }
 0x694   :  { %v5896_v18 = vld [vmem:[#allocation9 + $0x1c0] sm:$0xff] }
 0x695   :  { %3643 = vtanh.f32 %v5877_v38  ;;  %v2221_v41 = vsel %vm2220_vm10, %v3640_v7, %v2217_v60  ;;  %v5893_v7 = vld [vmem:[#allocation9 + $0x1f8] sm:$0xff] }
 0x696   :  { %v2226_v33 = vsel %vm2223_vm5, %v2225_v55, %v2221_v41  ;;  %v7197_v55 = vld [vmem:[#allocation21_spill] sm:$0xff] }
 0x69b   :  { %v3644_v58 = vpop.eup %3643 }
 0x69c   :  { %v5880_v22 = vmul.f32 %v3644_v58, %v2226_v33  ;;  %v7198_v58 = vld [vmem:[#allocation73_spill] sm:$0xff] }
 0x69d   :  { %v7199_v33 = vsel %vm4545_vm3, %v7197_v55, %v7198_v58  ;;  %v6132_v55 = vld [vmem:[#allocation9 + $0x50] sm:$0xff]  ;;  %v6135_v58 = vld [vmem:[#allocation9 + $0x58] sm:$0xff] }
 0x69e   :  { %7165 = vst [vmem:[#allocation76_spill] sm:$0xff] %v5880_v22  ;;  %2261 = vmatmul.f32.vlgmr.msrb.gmra.mxu0 %v5880_v22  ;;  %2281 = vmatmul.f32.vlgmr.msra.gmra.mxu1 %v5880_v22 }
 0x69f   :  { %2301 = vmatmul.f32.vlgmr.msra.gmra.mxu2 %v5880_v22  ;;  %2321 = vmatmul.f32.vlgmr.msra.gmra.mxu3 %v5880_v22  ;;  %v6129_v22 = vld [vmem:[#allocation9 + $0x48] sm:$0xff] }
 0x6a0   :  { %2563 = vmatpush.msrb.mxu0 %v5886_v21  ;;  %2583 = vmatpush.msra.mxu1 %v5889_v34 }
 0x6a1   :  { %2603 = vmatpush.msra.mxu2 %v5307_v10  ;;  %2623 = vmatpush.msra.mxu3 %v5893_v7  ;;  %v7172_v10 = vld [vmem:[#allocation60_spill] sm:$0xff] }
 0x6a2   :  { %2564 = vmatpush.msrb.mxu0 %v5896_v18  ;;  %2584 = vmatpush.msra.mxu1 %v5899_v49 }
 0x6a3   :  { %2604 = vmatpush.msra.mxu2 %v5330_v14  ;;  %2624 = vmatpush.msra.mxu3 %v5295_v61  ;;  %v7168_v61 = vld [vmem:[#allocation56_spill] sm:$0xff]  ;;  %v7176_v14 = vld [vmem:[#allocation67_spill] sm:$0xff] }
 0x6a4   :  { %2565 = vmatpush.msrb.mxu0 %v5291_v5  ;;  %2585 = vmatpush.msra.mxu1 %v5293_v46  ;;  %v7166_v5 = vld [vmem:[#allocation38_spill] sm:$0xff]  ;;  %v7167_v46 = vld [vmem:[#allocation44_spill] sm:$0xff]  ;;  %7218 = vst [vmem:[#allocation67_spill] sm:$0xff] %v6138_v8 }
 0x6a5   :  { %2605 = vmatpush.msra.mxu2 %v5340_v20  ;;  %2625 = vmatpush.msra.mxu3 %v5304_v54  ;;  %v7171_v54 = vld [vmem:[#allocation37_spill] sm:$0xff] }
 0x6a6   :  { %2566 = vmatpush.msrb.mxu0 %v5300_v56  ;;  %2586 = vmatpush.msra.mxu1 %v5302_v52  ;;  %v7169_v56 = vld [vmem:[#allocation41_spill] sm:$0xff]  ;;  %v7170_v52 = vld [vmem:[#allocation43_spill] sm:$0xff] }
 0x6a7   :  { %2606 = vmatpush.msra.mxu2 %v5356_v27  ;;  %2626 = vmatpush.msra.mxu3 %v5326_v9  ;;  %v7175_v9 = vld [vmem:[#allocation45_spill] sm:$0xff]  ;;  %v7184_v27 = vld [vmem:[#allocation14_spill] sm:$0xff] }
 0x6a8   :  { %2567 = vmatpush.msrb.mxu0 %v5322_v62  ;;  %2587 = vmatpush.msra.mxu1 %v5324_v0  ;;  %v7173_v62 = vld [vmem:[#allocation48_spill] sm:$0xff]  ;;  %v7174_v0 = vld [vmem:[#allocation46_spill] sm:$0xff]  ;;  %v7180_v20 = vld [vmem:[#allocation61_spill] sm:$0xff]  ;;  %7217 = vst [vmem:[#allocation45_spill] sm:$0xff] %v6135_v58 }
 0x6a9   :  { %2607 = vmatpush.msra.mxu2 %v5366_v32  ;;  %2627 = vmatpush.msra.mxu3 %v5338_v19  ;;  %v7179_v19 = vld [vmem:[#allocation52_spill] sm:$0xff]  ;;  %v7188_v32 = vld [vmem:[#allocation17_spill] sm:$0xff]  ;;  %7215 = vst [vmem:[#allocation48_spill] sm:$0xff] %v6129_v22 }
 0x6aa   :  { %2568 = vmatpush.msrb.mxu0 %v5332_v15  ;;  %2588 = vmatpush.msra.mxu1 %v5334_v16  ;;  %v7177_v15 = vld [vmem:[#allocation53_spill] sm:$0xff]  ;;  %7216 = vst [vmem:[#allocation46_spill] sm:$0xff] %v6132_v55 }
 0x6ab   :  { %2608 = vmatpush.msra.mxu2 %v5384_v12  ;;  %2628 = vmatpush.msra.mxu3 %v5352_v31  ;;  %v7178_v16 = vld [vmem:[#allocation49_spill] sm:$0xff]  ;;  %v7192_v12 = vld [vmem:[#allocation24_spill] sm:$0xff]  ;;  %7219 = vst [vmem:[#allocation53_spill] sm:$0xff] %v6141_v51 }
 0x6ac   :  { %2569 = vmatpush.msrb.mxu0 %v5348_v25  ;;  %2589 = vmatpush.msra.mxu1 %v5350_v26  ;;  %v7181_v25 = vld [vmem:[#allocation59_spill] sm:$0xff]  ;;  %v7183_v31 = vld [vmem:[#allocation57_spill] sm:$0xff]  ;;  %7220 = vst [vmem:[#allocation49_spill] sm:$0xff] %v6144_v39 }
 0x6ad   :  { %2609 = vmatpush.msra.mxu2 %v5394_v2  ;;  %2629 = vmatpush.msra.mxu3 %v5364_v30  ;;  %v7182_v26 = vld [vmem:[#allocation55_spill] sm:$0xff]  ;;  %7221 = vst [vmem:[#allocation52_spill] sm:$0xff] %v6147_v59 }
 0x6ae   :  { %2570 = vmatpush.msrb.mxu0 %v5358_v29  ;;  %2590 = vmatpush.msra.mxu1 %v5360_v17  ;;  %v7185_v29 = vld [vmem:[#allocation16_spill] sm:$0xff]  ;;  %v7186_v17 = vld [vmem:[#allocation66_spill] sm:$0xff]  ;;  %v7187_v30 = vld [vmem:[#allocation63_spill] sm:$0xff] }
 0x6af   :  { %2610 = vmatpush.msra.mxu2 %v5412_v1  ;;  %2630 = vmatpush.msra.mxu3 %v5380_v11  ;;  %v7191_v11 = vld [vmem:[#allocation20_spill] sm:$0xff] }
 0x6b0   :  { %2571 = vmatpush.msrb.mxu0 %v5376_v36  ;;  %2591 = vmatpush.msra.mxu1 %v5378_v40  ;;  %v7189_v36 = vld [vmem:[#allocation19_spill] sm:$0xff] }
 0x6b1   :  { %2611 = vmatpush.msra.mxu2 %v5422_v57  ;;  %2631 = vmatpush.msra.mxu3 %v5392_v43  ;;  %v7190_v40 = vld [vmem:[#allocation15_spill] sm:$0xff]  ;;  %v7193_v43 = vld [vmem:[#allocation18_spill] sm:$0xff] }
 0x6b2   :  { %2572 = vmatpush.msrb.mxu0 %v7166_v5  ;;  %2592 = vmatpush.msra.mxu1 %v7167_v46 }
 0x6b3   :  { %2612 = vmatpush.msra.mxu2 %v7168_v61  ;;  %2632 = vmatpush.msra.mxu3 %v7169_v56 }
 0x6b4   :  { %2573 = vmatpush.msrb.mxu0 %v7170_v52  ;;  %2593 = vmatpush.msra.mxu1 %v7171_v54 }
 0x6b5   :  { %2613 = vmatpush.msra.mxu2 %v7172_v10  ;;  %2633 = vmatpush.msra.mxu3 %v7173_v62 }
 0x6b6   :  { %2574 = vmatpush.msrb.mxu0 %v7174_v0  ;;  %2594 = vmatpush.msra.mxu1 %v7175_v9 }
 0x6b7   :  { %2614 = vmatpush.msra.mxu2 %v7176_v14  ;;  %2634 = vmatpush.msra.mxu3 %v7177_v15 }
 0x6b8   :  { %2575 = vmatpush.msrb.mxu0 %v7178_v16  ;;  %2595 = vmatpush.msra.mxu1 %v7179_v19 }
 0x6b9   :  { %2615 = vmatpush.msra.mxu2 %v7180_v20  ;;  %2635 = vmatpush.msra.mxu3 %v7181_v25 }
 0x6ba   :  { %2576 = vmatpush.msrb.mxu0 %v7182_v26  ;;  %2596 = vmatpush.msra.mxu1 %v7183_v31 }
 0x6bb   :  { %2616 = vmatpush.msra.mxu2 %v7184_v27  ;;  %2636 = vmatpush.msra.mxu3 %v7185_v29 }
 0x6bc   :  { %2577 = vmatpush.msrb.mxu0 %v7186_v17  ;;  %2597 = vmatpush.msra.mxu1 %v7187_v30 }
 0x6bd   :  { %2617 = vmatpush.msra.mxu2 %v7188_v32  ;;  %2637 = vmatpush.msra.mxu3 %v7189_v36 }
 0x6be   :  { %2578 = vmatpush.msrb.mxu0 %v7190_v40  ;;  %2598 = vmatpush.msra.mxu1 %v7191_v11 }
 0x6bf   :  { %2618 = vmatpush.msra.mxu2 %v7192_v12  ;;  %2638 = vmatpush.msra.mxu3 %v7193_v43 }
 0x71b   :  { %v2262_v2 = vpop.f32.mrf.mxu0  ;;  %v2282_v1 = vpop.f32.mrf.mxu1 }
 0x71c   :  { %v2325_v57 = vadd.f32 %v2262_v2, %v5786_v37  ;;  %v2326_v48 = vadd.f32 %v2282_v1, %v7194_v47 }
 0x71e   :  { %v3466_v44 = vmul.f32 -1.442695, %v2325_v57  ;;  %v3467_v45 = vmul.f32 -1.442695, %v2326_v48 }
 0x720   :  { %3645 = vpow2.f32 %v3466_v44 }
 0x721   :  { %3647 = vpow2.f32 %v3467_v45 }
 0x722   :  { %v2322_v13 = vpop.f32.mrf.mxu3  ;;  %v2302_v28 = vpop.f32.mrf.mxu2 }
 0x723   :  { %v2328_v24 = vadd.f32 %v2322_v13, %v7195_v42  ;;  %v2327_v5 = vadd.f32 %v2302_v28, %v7199_v33  ;;  %v5988_v42 = vld [vmem:[#allocation9 + $0x1d0] sm:$0xff]  ;;  %v6009_v28 = vld [vmem:[#allocation9 + $0x188] sm:$0xff] }
 0x724   :  { %v6021_v33 = vld [vmem:[#allocation9 + $0x168] sm:$0xff] }
 0x725   :  { %v3468_v3 = vmul.f32 -1.442695, %v2328_v24  ;;  %v5991_v24 = vld [vmem:[#allocation9 + $0x1d8] sm:$0xff] }
 0x726   :  { %v3646_v50 = vpop.eup %3645 }
 0x727   :  { %v3648_v37 = vpop.eup %3647  ;;  %v2332_v6 = vadd.f32 1.0, %v3646_v50  ;;  %3649 = vpow2.f32 %v3468_v3  ;;  %v5994_v3 = vld [vmem:[#allocation9 + $0x1a0] sm:$0xff]  ;;  %v5997_v50 = vld [vmem:[#allocation9 + $0x1a8] sm:$0xff] }
 0x728   :  { %v2351_v35 = vadd.f32 1.0, %v3648_v37  ;;  %v6000_v37 = vld [vmem:[#allocation9 + $0x1b0] sm:$0xff] }
 0x729   :  { %3651 = vrcp.f32 %v2332_v6  ;;  %v2344_v10 = vand.u32 2147483648, %v2332_v6  ;;  %v2342_v9 = vand.u32 2147483647, %v2332_v6  ;;  %vm2338_vm12 = vweird.f32 %v2332_v6 }
 0x72a   :  { %3653 = vrcp.f32 %v2351_v35  ;;  %v2363_v62 = vand.u32 2147483648, %v2351_v35  ;;  %v2361_v15 = vand.u32 2147483647, %v2351_v35  ;;  %vm2357_vm13 = vweird.f32 %v2351_v35 }
 0x72b   :  { %v2345_v20 = vor.u32 1.1754944e-38, %v2344_v10  ;;  %vm2343_vm0 = vcmp.eq.f32.partialorder %v2342_v9, 8.507059e+37  ;;  %v6042_v10 = vld [vmem:[#allocation9 + $0x120] sm:$0xff]  ;;  %v6051_v9 = vld [vmem:[#allocation9 + $0x138] sm:$0xff] }
 0x72c   :  { %v2364_v31 = vor.u32 1.1754944e-38, %v2363_v62  ;;  %vm2362_vm7 = vcmp.eq.f32.partialorder %v2361_v15, 8.507059e+37  ;;  %v6045_v62 = vld [vmem:[#allocation9 + $0x128] sm:$0xff] }
 0x72d   :  { %v3650_v60 = vpop.eup %3649  ;;  %v6057_v15 = vld [vmem:[#allocation9 + $0x108] sm:$0xff] }
 0x72e   :  { %v2371_v4 = vadd.f32 1.0, %v3650_v60  ;;  %v6012_v60 = vld [vmem:[#allocation9 + $0x190] sm:$0xff] }
 0x72f   :  { %v3652_v23 = vpop.eup %3651 }
 0x730   :  { %v3654_v46 = vpop.eup %3653  ;;  %v2334_v61 = vmul.f32 %v3652_v23, %v2332_v6  ;;  %3655 = vrcp.f32 %v2371_v4  ;;  %vm2339_vm6 = vweird.f32 %v3652_v23  ;;  %v2383_v1 = vand.u32 2147483648, %v2371_v4  ;;  %v6003_v6 = vld [vmem:[#allocation9 + $0x1b8] sm:$0xff] }
 0x731   :  { %v2353_v56 = vmul.f32 %v3654_v46, %v2351_v35  ;;  %3657 = vtanh.f32 %v2327_v5  ;;  %vm2358_vm11 = vweird.f32 %v3654_v46  ;;  %vm2340_vm14 = vmor %vm2338_vm12, %vm2339_vm6  ;;  %vm2377_vm9 = vweird.f32 %v2371_v4  ;;  %v6006_v35 = vld [vmem:[#allocation9 + $0x180] sm:$0xff]  ;;  %v6024_v5 = vld [vmem:[#allocation9 + $0x170] sm:$0xff] }
 0x732   :  { %v2335_v52 = vsub.f32 1.0, %v2334_v61  ;;  %vm2359_vm15 = vmor %vm2357_vm13, %vm2358_vm11  ;;  %v2381_v57 = vand.u32 2147483647, %v2371_v4  ;;  %v2384_v48 = vor.u32 1.1754944e-38, %v2383_v1  ;;  %v6030_v61 = vld [vmem:[#allocation9 + $0x140] sm:$0xff]  ;;  %v6108_v1 = vld [vmem:[#allocation9 + $0x90] sm:$0xff] }
 0x733   :  { %v2354_v54 = vsub.f32 1.0, %v2353_v56  ;;  %v6033_v56 = vld [vmem:[#allocation9 + $0x148] sm:$0xff]  ;;  %7208 = vst [vmem:[#allocation38_spill] sm:$0xff] %v6108_v1 }
 0x734   :  { %v2336_v0 = vmul.f32 %v3652_v23, %v2335_v52  ;;  %vm2382_vm5 = vcmp.eq.f32.partialorder %v2381_v57, 8.507059e+37  ;;  %v6036_v52 = vld [vmem:[#allocation9 + $0x150] sm:$0xff]  ;;  %v6111_v57 = vld [vmem:[#allocation9 + $0x98] sm:$0xff] }
 0x735   :  { %v2355_v14 = vmul.f32 %v3654_v46, %v2354_v54  ;;  %v6039_v54 = vld [vmem:[#allocation9 + $0x158] sm:$0xff]  ;;  %7209 = vst [vmem:[#allocation44_spill] sm:$0xff] %v6111_v57 }
 0x736   :  { %v3656_v16 = vpop.eup %3655  ;;  %v2337_v19 = vadd.f32 %v3652_v23, %v2336_v0  ;;  %v6048_v0 = vld [vmem:[#allocation9 + $0x130] sm:$0xff] }
 0x737   :  { %v2356_v25 = vadd.f32 %v3654_v46, %v2355_v14  ;;  %v2373_v26 = vmul.f32 %v3656_v16, %v2371_v4  ;;  %v3658_v29 = vpop.eup %3657  ;;  %vm2378_vm8 = vweird.f32 %v3656_v16  ;;  %v6015_v4 = vld [vmem:[#allocation9 + $0x198] sm:$0xff]  ;;  %v6054_v14 = vld [vmem:[#allocation9 + $0x100] sm:$0xff] }
 0x738   :  { %v2341_v27 = vsel %vm2340_vm14, %v3652_v23, %v2337_v19  ;;  %vm2379_vm10 = vmor %vm2377_vm9, %vm2378_vm8  ;;  %v6018_v23 = vld [vmem:[#allocation9 + $0x160] sm:$0xff]  ;;  %v6063_v19 = vld [vmem:[#allocation9 + $0x118] sm:$0xff] }
 0x739   :  { %v2346_v17 = vsel %vm2343_vm0, %v2345_v20, %v2341_v27  ;;  %v2360_v30 = vsel %vm2359_vm15, %v3654_v46, %v2356_v25  ;;  %v2374_v32 = vsub.f32 1.0, %v2373_v26  ;;  %v6027_v46 = vld [vmem:[#allocation9 + $0x178] sm:$0xff]  ;;  %v6066_v20 = vld [vmem:[#allocation9 + $0xe0] sm:$0xff]  ;;  %v6069_v25 = vld [vmem:[#allocation9 + $0xe8] sm:$0xff] }
 0x73a   :  { %v2365_v36 = vsel %vm2362_vm7, %v2364_v31, %v2360_v30  ;;  %v2388_v40 = vmul.f32 %v3658_v29, %v2346_v17  ;;  %v6072_v26 = vld [vmem:[#allocation9 + $0xf0] sm:$0xff]  ;;  %v6075_v31 = vld [vmem:[#allocation9 + $0xf8] sm:$0xff]  ;;  %v6078_v27 = vld [vmem:[#allocation9 + $0xc0] sm:$0xff] }
 0x73b   :  { %v2387_v11 = vmul.f32 %v2365_v36, %v5877_v38  ;;  %v2375_v12 = vmul.f32 %v3656_v16, %v2374_v32  ;;  %v5982_v38 = vld [vmem:[#allocation9 + $0x1f0] sm:$0xff]  ;;  %v6081_v29 = vld [vmem:[#allocation9 + $0xc8] sm:$0xff]  ;;  %v6087_v30 = vld [vmem:[#allocation9 + $0xd8] sm:$0xff] }
 0x73c   :  { %v6084_v17 = vld [vmem:[#allocation9 + $0xd0] sm:$0xff]  ;;  %7201 = vst [vmem:[#allocation50_spill] sm:$0xff] %v6087_v30  ;;  %v6090_v32 = vld [vmem:[#allocation9 + $0xa0] sm:$0xff]  ;;  %v6093_v36 = vld [vmem:[#allocation9 + $0xa8] sm:$0xff] }
 0x73d   :  { %v5977_v43 = vadd.f32 %v2388_v40, %v2387_v11  ;;  %v2376_v2 = vadd.f32 %v3656_v16, %v2375_v12  ;;  %7200 = vst [vmem:[#allocation75_spill] sm:$0xff] %v6084_v17  ;;  %v6096_v40 = vld [vmem:[#allocation9 + $0xb0] sm:$0xff]  ;;  %v6099_v11 = vld [vmem:[#allocation9 + $0xb8] sm:$0xff]  ;;  %v6102_v12 = vld [vmem:[#allocation9 + $0x80] sm:$0xff] }
 0x73e   :  { %7202 = vst [vmem:[#allocation80_spill] sm:$0xff] %v6090_v32 }
 0x73f   :  { %3659 = vtanh.f32 %v5977_v43  ;;  %v2380_v47 = vsel %vm2379_vm10, %v3656_v16, %v2376_v2  ;;  %v6060_v16 = vld [vmem:[#allocation9 + $0x110] sm:$0xff]  ;;  %7203 = vst [vmem:[#allocation77_spill] sm:$0xff] %v6093_v36  ;;  %v6105_v2 = vld [vmem:[#allocation9 + $0x88] sm:$0xff] }
 0x740   :  { %v2385_v45 = vsel %vm2382_vm5, %v2384_v48, %v2380_v47  ;;  %7204 = vst [vmem:[#allocation84_spill] sm:$0xff] %v6096_v40  ;;  %v6114_v47 = vld [vmem:[#allocation9 + $0x60] sm:$0xff]  ;;  %v6117_v48 = vld [vmem:[#allocation9 + $0x68] sm:$0xff] }
 0x741   :  { %7205 = vst [vmem:[#allocation83_spill] sm:$0xff] %v6099_v11 }
 0x742   :  { %7206 = vst [vmem:[#allocation82_spill] sm:$0xff] %v6102_v12 }
 0x743   :  { %7207 = vst [vmem:[#allocation81_spill] sm:$0xff] %v6105_v2 }
 0x744   :  { %7210 = vst [vmem:[#allocation56_spill] sm:$0xff] %v6114_v47 }
 0x745   :  { %v3660_v44 = vpop.eup %3659  ;;  %7211 = vst [vmem:[#allocation41_spill] sm:$0xff] %v6117_v48 }
 0x746   :  { %v2391_v13 = vmul.f32 %v3660_v44, %v2385_v45  ;;  %v6120_v44 = vld [vmem:[#allocation9 + $0x70] sm:$0xff]  ;;  %v6123_v45 = vld [vmem:[#allocation9 + $0x78] sm:$0xff] }
 0x747   :  { %7212 = vst [vmem:[#allocation43_spill] sm:$0xff] %v6120_v44 }
 0x748   :  { %2420 = vmatmul.f32.vlgmr.msra.gmra.mxu0 %v2391_v13  ;;  %2440 = vmatmul.f32.vlgmr.msrb.gmra.mxu1 %v2391_v13  ;;  %7213 = vst [vmem:[#allocation37_spill] sm:$0xff] %v6123_v45 }
 0x749   :  { %2460 = vmatmul.f32.vlgmr.msrb.gmra.mxu2 %v2391_v13  ;;  %2480 = vmatmul.f32.vlgmr.msrb.gmra.mxu3 %v2391_v13  ;;  %v6126_v13 = vld [vmem:[#allocation9 + $0x40] sm:$0xff] }
 0x74a   :  { %2714 = vmatpush.msra.mxu0 %v5886_v21  ;;  %2734 = vmatpush.msrb.mxu1 %v5889_v34  ;;  %7214 = vst [vmem:[#allocation60_spill] sm:$0xff] %v6126_v13 }
 0x74b   :  { %2754 = vmatpush.msrb.mxu2 %v5982_v38  ;;  %2774 = vmatpush.msrb.mxu3 %v5893_v7 }
 0x74c   :  { %2715 = vmatpush.msra.mxu0 %v5896_v18  ;;  %2735 = vmatpush.msrb.mxu1 %v5899_v49 }
 0x74d   :  { %2755 = vmatpush.msrb.mxu2 %v5988_v42  ;;  %2775 = vmatpush.msrb.mxu3 %v5991_v24 }
 0x74e   :  { %2716 = vmatpush.msra.mxu0 %v5994_v3  ;;  %2736 = vmatpush.msrb.mxu1 %v5997_v50 }
 0x74f   :  { %2756 = vmatpush.msrb.mxu2 %v6000_v37  ;;  %2776 = vmatpush.msrb.mxu3 %v6003_v6 }
 0x750   :  { %2717 = vmatpush.msra.mxu0 %v6006_v35  ;;  %2737 = vmatpush.msrb.mxu1 %v6009_v28 }
 0x751   :  { %2757 = vmatpush.msrb.mxu2 %v6012_v60  ;;  %2777 = vmatpush.msrb.mxu3 %v6015_v4 }
 0x752   :  { %2718 = vmatpush.msra.mxu0 %v6018_v23  ;;  %2738 = vmatpush.msrb.mxu1 %v6021_v33 }
 0x753   :  { %2758 = vmatpush.msrb.mxu2 %v6024_v5  ;;  %2778 = vmatpush.msrb.mxu3 %v6027_v46 }
 0x754   :  { %2719 = vmatpush.msra.mxu0 %v6030_v61  ;;  %2739 = vmatpush.msrb.mxu1 %v6033_v56 }
 0x755   :  { %2759 = vmatpush.msrb.mxu2 %v6036_v52  ;;  %2779 = vmatpush.msrb.mxu3 %v6039_v54 }
 0x756   :  { %2720 = vmatpush.msra.mxu0 %v6042_v10  ;;  %2740 = vmatpush.msrb.mxu1 %v6045_v62 }
 0x757   :  { %2760 = vmatpush.msrb.mxu2 %v6048_v0  ;;  %2780 = vmatpush.msrb.mxu3 %v6051_v9 }
 0x758   :  { %2721 = vmatpush.msra.mxu0 %v6054_v14  ;;  %2741 = vmatpush.msrb.mxu1 %v6057_v15 }
 0x759   :  { %2761 = vmatpush.msrb.mxu2 %v6060_v16  ;;  %2781 = vmatpush.msrb.mxu3 %v6063_v19 }
 0x75a   :  { %2722 = vmatpush.msra.mxu0 %v6066_v20  ;;  %2742 = vmatpush.msrb.mxu1 %v6069_v25 }
 0x75b   :  { %2762 = vmatpush.msrb.mxu2 %v6072_v26  ;;  %2782 = vmatpush.msrb.mxu3 %v6075_v31 }
 0x75c   :  { %2723 = vmatpush.msra.mxu0 %v6078_v27  ;;  %2743 = vmatpush.msrb.mxu1 %v6081_v29 }
 0x75d   :  { %2763 = vmatpush.msrb.mxu2 %v6084_v17  ;;  %2783 = vmatpush.msrb.mxu3 %v6087_v30 }
 0x75e   :  { %2724 = vmatpush.msra.mxu0 %v6090_v32  ;;  %2744 = vmatpush.msrb.mxu1 %v6093_v36 }
 0x75f   :  { %2764 = vmatpush.msrb.mxu2 %v6096_v40  ;;  %2784 = vmatpush.msrb.mxu3 %v6099_v11 }
 0x760   :  { %2725 = vmatpush.msra.mxu0 %v6102_v12  ;;  %2745 = vmatpush.msrb.mxu1 %v6105_v2 }
 0x761   :  { %2765 = vmatpush.msrb.mxu2 %v6108_v1  ;;  %2785 = vmatpush.msrb.mxu3 %v6111_v57  ;;  %v7231_v1 = vld [vmem:[#allocation54_spill] sm:$0xff] }
 0x762   :  { %2726 = vmatpush.msra.mxu0 %v6114_v47  ;;  %2746 = vmatpush.msrb.mxu1 %v6117_v48 }
 0x763   :  { %2766 = vmatpush.msrb.mxu2 %v6120_v44  ;;  %2786 = vmatpush.msrb.mxu3 %v6123_v45  ;;  %v7227_v45 = vld [vmem:[#allocation30_spill] sm:$0xff] }
 0x764   :  { %2727 = vmatpush.msra.mxu0 %v6126_v13  ;;  %2747 = vmatpush.msrb.mxu1 %v6129_v22  ;;  %v7226_v13 = vld [vmem:[#allocation42_spill] sm:$0xff] }
 0x765   :  { %2767 = vmatpush.msrb.mxu2 %v6132_v55  ;;  %2787 = vmatpush.msrb.mxu3 %v6135_v58  ;;  %v6150_v55 = vld [vmem:[#allocation9] sm:$0xff]  ;;  %v6153_v58 = vld [vmem:[#allocation9 + $0x8] sm:$0xff] }
 0x766   :  { %2728 = vmatpush.msra.mxu0 %v6138_v8  ;;  %2748 = vmatpush.msrb.mxu1 %v6141_v51  ;;  %7222 = vst [vmem:[#allocation61_spill] sm:$0xff] %v6150_v55  ;;  %v6156_v8 = vld [vmem:[#allocation9 + $0x10] sm:$0xff]  ;;  %v6159_v51 = vld [vmem:[#allocation9 + $0x18] sm:$0xff] }
 0x767   :  { %2768 = vmatpush.msrb.mxu2 %v6144_v39  ;;  %2788 = vmatpush.msrb.mxu3 %v6147_v59  ;;  %7223 = vst [vmem:[#allocation59_spill] sm:$0xff] %v6153_v58 }
 0x768   :  { %2729 = vmatpush.msra.mxu0 %v6150_v55  ;;  %2749 = vmatpush.msrb.mxu1 %v6153_v58  ;;  %7224 = vst [vmem:[#allocation55_spill] sm:$0xff] %v6156_v8  ;;  %v7228_v55 = vld [vmem:[#allocation35_spill] sm:$0xff] }
 0x769   :  { %2769 = vmatpush.msrb.mxu2 %v6156_v8  ;;  %7225 = vst [vmem:[#allocation57_spill] sm:$0xff] %v6159_v51  ;;  %2789 = vmatpush.msrb.mxu3 %v6159_v51  ;;  %v7229_v44 = vsel %vm4530_vm2, %v7227_v45, %v7228_v55  ;;  %v7230_v8 = vld [vmem:[#allocation25_spill] sm:$0xff] }
 0x76a   :  { %v7232_v51 = vsel %vm4551_vm4, %v7230_v8, %v7231_v1 }
 0x7c5   :  { %v2421_v39 = vpop.f32.mrf.mxu0  ;;  %v2441_v22 = vpop.f32.mrf.mxu1 }
 0x7c6   :  { %v2484_v59 = vadd.f32 %v2421_v39, %v7226_v13  ;;  %v2485_v48 = vadd.f32 %v2441_v22, %v7229_v44  ;;  %v7234_v44 = vld [vmem:[#allocation33_spill] sm:$0xff] }
 0x7c8   :  { %v3469_v47 = vmul.f32 -1.442695, %v2484_v59  ;;  %v3470_v58 = vmul.f32 -1.442695, %v2485_v48 }
 0x7ca   :  { %3661 = vpow2.f32 %v3469_v47 }
 0x7cb   :  { %3663 = vpow2.f32 %v3470_v58  ;;  %v7233_v58 = vld [vmem:[#allocation28_spill] sm:$0xff] }
 0x7cc   :  { %v2481_v57 = vpop.f32.mrf.mxu3  ;;  %v2461_v22 = vpop.f32.mrf.mxu2  ;;  %v7235_v45 = vsel %vm4545_vm3, %v7233_v58, %v7234_v44 }
 0x7cd   :  { %v2487_v2 = vadd.f32 %v2481_v57, %v7232_v51  ;;  %v2486_v55 = vadd.f32 %v2461_v22, %v7235_v45 }
 0x7cf   :  { %v3471_v12 = vmul.f32 -1.442695, %v2487_v2 }
 0x7d0   :  { %v3662_v11 = vpop.eup %3661 }
 0x7d1   :  { %v3664_v39 = vpop.eup %3663  ;;  %v2491_v13 = vadd.f32 1.0, %v3662_v11  ;;  %3665 = vpow2.f32 %v3471_v12 }
 0x7d2   :  { %v2510_v53 = vadd.f32 1.0, %v3664_v39 }
 0x7d3   :  { %3667 = vrcp.f32 %v2491_v13  ;;  %v2503_v12 = vand.u32 2147483648, %v2491_v13  ;;  %v2501_v63 = vand.u32 2147483647, %v2491_v13  ;;  %vm2497_vm12 = vweird.f32 %v2491_v13 }
 0x7d4   :  { %3669 = vrcp.f32 %v2510_v53  ;;  %v2522_v39 = vand.u32 2147483648, %v2510_v53  ;;  %v2520_v40 = vand.u32 2147483647, %v2510_v53  ;;  %vm2516_vm13 = vweird.f32 %v2510_v53 }
 0x7d5   :  { %v2504_v45 = vor.u32 1.1754944e-38, %v2503_v12  ;;  %vm2502_vm0 = vcmp.eq.f32.partialorder %v2501_v63, 8.507059e+37 }
 0x7d6   :  { %vm2521_vm7 = vcmp.eq.f32.partialorder %v2520_v40, 8.507059e+37 }
 0x7d7   :  { %v3666_v59 = vpop.eup %3665 }
 0x7d8   :  { %v2530_v48 = vadd.f32 1.0, %v3666_v59 }
 0x7d9   :  { %v3668_v47 = vpop.eup %3667 }
 0x7da   :  { %v3670_v8 = vpop.eup %3669  ;;  %v2493_v51 = vmul.f32 %v3668_v47, %v2491_v13  ;;  %3671 = vrcp.f32 %v2530_v48  ;;  %vm2498_vm6 = vweird.f32 %v3668_v47  ;;  %v2542_v12 = vand.u32 2147483648, %v2530_v48 }
 0x7db   :  { %v2512_v2 = vmul.f32 %v3670_v8, %v2510_v53  ;;  %3673 = vtanh.f32 %v2486_v55  ;;  %vm2517_vm11 = vweird.f32 %v3670_v8  ;;  %vm2499_vm14 = vmor %vm2497_vm12, %vm2498_vm6  ;;  %vm2536_vm9 = vweird.f32 %v2530_v48 }
 0x7dc   :  { %v2494_v57 = vsub.f32 1.0, %v2493_v51  ;;  %vm2518_vm15 = vmor %vm2516_vm13, %vm2517_vm11  ;;  %v2523_v51 = vor.u32 1.1754944e-38, %v2522_v39  ;;  %v7243_v39 = vld [vmem:[#allocation81_spill] sm:$0xff] }
 0x7dd   :  { %v2513_v11 = vsub.f32 1.0, %v2512_v2 }
 0x7de   :  { %v2495_v1 = vmul.f32 %v3668_v47, %v2494_v57 }
 0x7df   :  { %v2514_v59 = vmul.f32 %v3670_v8, %v2513_v11 }
 0x7e0   :  { %v3672_v41 = vpop.eup %3671  ;;  %v2496_v36 = vadd.f32 %v3668_v47, %v2495_v1 }
 0x7e1   :  { %v2515_v22 = vadd.f32 %v3670_v8, %v2514_v59  ;;  %v2532_v58 = vmul.f32 %v3672_v41, %v2530_v48  ;;  %v3674_v55 = vpop.eup %3673  ;;  %vm2537_vm8 = vweird.f32 %v3672_v41  ;;  %v7244_v59 = vld [vmem:[#allocation38_spill] sm:$0xff] }
 0x7e2   :  { %v2500_v2 = vsel %vm2499_vm14, %v3668_v47, %v2496_v36  ;;  %v2540_v36 = vand.u32 2147483647, %v2530_v48  ;;  %vm2538_vm10 = vmor %vm2536_vm9, %vm2537_vm8  ;;  %v2543_v47 = vor.u32 1.1754944e-38, %v2542_v12  ;;  %v7241_v48 = vld [vmem:[#allocation83_spill] sm:$0xff] }
 0x7e3   :  { %v2505_v44 = vsel %vm2502_vm0, %v2504_v45, %v2500_v2  ;;  %v2519_v57 = vsel %vm2518_vm15, %v3670_v8, %v2515_v22  ;;  %v2533_v32 = vsub.f32 1.0, %v2532_v58  ;;  %v7245_v45 = vld [vmem:[#allocation44_spill] sm:$0xff]  ;;  %v7248_v2 = vld [vmem:[#allocation43_spill] sm:$0xff] }
 0x7e4   :  { %v2524_v11 = vsel %vm2521_vm7, %v2523_v51, %v2519_v57  ;;  %v2547_v30 = vmul.f32 %v3674_v55, %v2505_v44  ;;  %vm2541_vm5 = vcmp.eq.f32.partialorder %v2540_v36, 8.507059e+37  ;;  %v7242_v44 = vld [vmem:[#allocation82_spill] sm:$0xff]  ;;  %v7246_v22 = vld [vmem:[#allocation56_spill] sm:$0xff]  ;;  %v7247_v51 = vld [vmem:[#allocation41_spill] sm:$0xff] }
 0x7e5   :  { %v2546_v17 = vmul.f32 %v2524_v11, %v5977_v43  ;;  %v2534_v1 = vmul.f32 %v3672_v41, %v2533_v32  ;;  %v7237_v43 = vld [vmem:[#allocation50_spill] sm:$0xff]  ;;  %v7240_v32 = vld [vmem:[#allocation84_spill] sm:$0xff]  ;;  %v7249_v55 = vld [vmem:[#allocation37_spill] sm:$0xff] }
 0x7e6   :  { %v7250_v57 = vld [vmem:[#allocation60_spill] sm:$0xff]  ;;  %v7254_v12 = vld [vmem:[#allocation67_spill] sm:$0xff]  ;;  %v7255_v36 = vld [vmem:[#allocation53_spill] sm:$0xff] }
 0x7e7   :  { %v6179_v13 = vadd.f32 %v2547_v30, %v2546_v17  ;;  %v2535_v53 = vadd.f32 %v3672_v41, %v2534_v1  ;;  %v7238_v17 = vld [vmem:[#allocation80_spill] sm:$0xff]  ;;  %v7239_v30 = vld [vmem:[#allocation77_spill] sm:$0xff]  ;;  %v7252_v1 = vld [vmem:[#allocation46_spill] sm:$0xff] }
 0x7e8   :  { %v7251_v11 = vld [vmem:[#allocation48_spill] sm:$0xff] }
 0x7e9   :  { %3675 = vtanh.f32 %v6179_v13  ;;  %v2539_v63 = vsel %vm2538_vm10, %v3672_v41, %v2535_v53  ;;  %v7236_v41 = vld [vmem:[#allocation75_spill] sm:$0xff]  ;;  %v7253_v53 = vld [vmem:[#allocation45_spill] sm:$0xff] }
 0x7ea   :  { %v2544_v40 = vsel %vm2541_vm5, %v2543_v47, %v2539_v63  ;;  %v7256_v63 = vld [vmem:[#allocation49_spill] sm:$0xff]  ;;  %v7257_v47 = vld [vmem:[#allocation52_spill] sm:$0xff] }
 0x7ef   :  { %v3676_v8 = vpop.eup %3675 }
 0x7f0   :  { %v2550_v58 = vmul.f32 %v3676_v8, %v2544_v40  ;;  %v7258_v8 = vld [vmem:[#allocation61_spill] sm:$0xff]  ;;  %v7259_v40 = vld [vmem:[#allocation59_spill] sm:$0xff] }
 0x7f2   :  { %2579 = vmatmul.f32.vlgmr.msrb.gmra.mxu0 %v2550_v58  ;;  %2599 = vmatmul.f32.vlgmr.msra.gmra.mxu1 %v2550_v58 }
 0x7f3   :  { %2619 = vmatmul.f32.vlgmr.msra.gmra.mxu2 %v2550_v58  ;;  %2639 = vmatmul.f32.vlgmr.msra.gmra.mxu3 %v2550_v58  ;;  %v7260_v58 = vld [vmem:[#allocation55_spill] sm:$0xff] }
 0x7f4   :  { %2865 = vmatpush.msrb.mxu0 %v5886_v21  ;;  %2885 = vmatpush.msra.mxu1 %v5889_v34 }
 0x7f5   :  { %2905 = vmatpush.msra.mxu2 %v5982_v38  ;;  %2925 = vmatpush.msra.mxu3 %v5893_v7 }
 0x7f6   :  { %2866 = vmatpush.msrb.mxu0 %v5896_v18  ;;  %2886 = vmatpush.msra.mxu1 %v5899_v49 }
 0x7f7   :  { %2906 = vmatpush.msra.mxu2 %v5988_v42  ;;  %2926 = vmatpush.msra.mxu3 %v5991_v24 }
 0x7f8   :  { %2867 = vmatpush.msrb.mxu0 %v5994_v3  ;;  %2887 = vmatpush.msra.mxu1 %v5997_v50 }
 0x7f9   :  { %2907 = vmatpush.msra.mxu2 %v6000_v37  ;;  %2927 = vmatpush.msra.mxu3 %v6003_v6 }
 0x7fa   :  { %2868 = vmatpush.msrb.mxu0 %v6006_v35  ;;  %2888 = vmatpush.msra.mxu1 %v6009_v28 }
 0x7fb   :  { %2908 = vmatpush.msra.mxu2 %v6012_v60  ;;  %2928 = vmatpush.msra.mxu3 %v6015_v4 }
 0x7fc   :  { %2869 = vmatpush.msrb.mxu0 %v6018_v23  ;;  %2889 = vmatpush.msra.mxu1 %v6021_v33 }
 0x7fd   :  { %2909 = vmatpush.msra.mxu2 %v6024_v5  ;;  %2929 = vmatpush.msra.mxu3 %v6027_v46 }
 0x7fe   :  { %2870 = vmatpush.msrb.mxu0 %v6030_v61  ;;  %2890 = vmatpush.msra.mxu1 %v6033_v56 }
 0x7ff   :  { %2910 = vmatpush.msra.mxu2 %v6036_v52  ;;  %2930 = vmatpush.msra.mxu3 %v6039_v54 }
 0x800   :  { %2871 = vmatpush.msrb.mxu0 %v6042_v10  ;;  %2891 = vmatpush.msra.mxu1 %v6045_v62 }
 0x801   :  { %2911 = vmatpush.msra.mxu2 %v6048_v0  ;;  %2931 = vmatpush.msra.mxu3 %v6051_v9 }
 0x802   :  { %2872 = vmatpush.msrb.mxu0 %v6054_v14  ;;  %2892 = vmatpush.msra.mxu1 %v6057_v15 }
 0x803   :  { %2912 = vmatpush.msra.mxu2 %v6060_v16  ;;  %2932 = vmatpush.msra.mxu3 %v6063_v19 }
 0x804   :  { %2873 = vmatpush.msrb.mxu0 %v6066_v20  ;;  %2893 = vmatpush.msra.mxu1 %v6069_v25 }
 0x805   :  { %2913 = vmatpush.msra.mxu2 %v6072_v26  ;;  %2933 = vmatpush.msra.mxu3 %v6075_v31 }
 0x806   :  { %2874 = vmatpush.msrb.mxu0 %v6078_v27  ;;  %2894 = vmatpush.msra.mxu1 %v6081_v29 }
 0x807   :  { %2914 = vmatpush.msra.mxu2 %v7236_v41  ;;  %2934 = vmatpush.msra.mxu3 %v7237_v43 }
 0x808   :  { %2875 = vmatpush.msrb.mxu0 %v7238_v17  ;;  %2895 = vmatpush.msra.mxu1 %v7239_v30 }
 0x809   :  { %2915 = vmatpush.msra.mxu2 %v7240_v32  ;;  %2935 = vmatpush.msra.mxu3 %v7241_v48 }
 0x80a   :  { %2876 = vmatpush.msrb.mxu0 %v7242_v44  ;;  %2896 = vmatpush.msra.mxu1 %v7243_v39 }
 0x80b   :  { %2916 = vmatpush.msra.mxu2 %v7244_v59  ;;  %2936 = vmatpush.msra.mxu3 %v7245_v45  ;;  %v7269_v45 = vld [vmem:[#allocation29_spill] sm:$0xff] }
 0x80c   :  { %2877 = vmatpush.msrb.mxu0 %v7246_v22  ;;  %2897 = vmatpush.msra.mxu1 %v7247_v51 }
 0x80d   :  { %2917 = vmatpush.msra.mxu2 %v7248_v2  ;;  %2937 = vmatpush.msra.mxu3 %v7249_v55  ;;  %v7262_v55 = vld [vmem:[#allocation31_spill] sm:$0xff] }
 0x80e   :  { %2878 = vmatpush.msrb.mxu0 %v7250_v57  ;;  %2898 = vmatpush.msra.mxu1 %v7251_v11  ;;  %v7261_v57 = vld [vmem:[#allocation57_spill] sm:$0xff] }
 0x80f   :  { %2918 = vmatpush.msra.mxu2 %v7252_v1  ;;  %2938 = vmatpush.msra.mxu3 %v7253_v53 }
 0x810   :  { %2879 = vmatpush.msrb.mxu0 %v7254_v12  ;;  %2899 = vmatpush.msra.mxu1 %v7255_v36  ;;  %v7264_v12 = vld [vmem:[#allocation27_spill] sm:$0xff]  ;;  %v7265_v36 = vld [vmem:[#allocation26_spill] sm:$0xff] }
 0x811   :  { %2919 = vmatpush.msra.mxu2 %v7256_v63  ;;  %2939 = vmatpush.msra.mxu3 %v7257_v47  ;;  %v7266_v51 = vsel %vm4530_vm2, %v7264_v12, %v7265_v36 }
 0x812   :  { %2880 = vmatpush.msrb.mxu0 %v7258_v8  ;;  %2900 = vmatpush.msra.mxu1 %v7259_v40  ;;  %v7273_v40 = vld [vmem:[#allocation36_spill] sm:$0xff] }
 0x813   :  { %2920 = vmatpush.msra.mxu2 %v7260_v58  ;;  %2940 = vmatpush.msra.mxu3 %v7261_v57  ;;  %v7268_v58 = vld [vmem:[#allocation32_spill] sm:$0xff] }
 0x814   :  { %v7270_v57 = vsel %vm4551_vm4, %v7268_v58, %v7269_v45 }
 0x86f   :  { %v2580_v11 = vpop.f32.mrf.mxu0  ;;  %v2600_v1 = vpop.f32.mrf.mxu1 }
 0x870   :  { %v2643_v53 = vadd.f32 %v2580_v11, %v7262_v55  ;;  %v2644_v63 = vadd.f32 %v2600_v1, %v7266_v51 }
 0x872   :  { %v3472_v22 = vmul.f32 -1.442695, %v2643_v53  ;;  %v3473_v47 = vmul.f32 -1.442695, %v2644_v63 }
 0x874   :  { %3677 = vpow2.f32 %v3472_v22 }
 0x875   :  { %3679 = vpow2.f32 %v3473_v47  ;;  %v7272_v47 = vld [vmem:[#allocation34_spill] sm:$0xff] }
 0x876   :  { %v2640_v8 = vpop.f32.mrf.mxu3  ;;  %v2620_v51 = vpop.f32.mrf.mxu2  ;;  %v7274_v12 = vsel %vm4545_vm3, %v7272_v47, %v7273_v40 }
 0x877   :  { %v2646_v59 = vadd.f32 %v2640_v8, %v7270_v57  ;;  %v2645_v36 = vadd.f32 %v2620_v51, %v7274_v12 }
 0x879   :  { %v3474_v39 = vmul.f32 -1.442695, %v2646_v59 }
 0x87a   :  { %v3678_v44 = vpop.eup %3677 }
 0x87b   :  { %v3680_v55 = vpop.eup %3679  ;;  %v2650_v11 = vadd.f32 1.0, %v3678_v44  ;;  %3681 = vpow2.f32 %v3474_v39 }
 0x87c   :  { %v2669_v2 = vadd.f32 1.0, %v3680_v55 }
 0x87d   :  { %3683 = vrcp.f32 %v2650_v11  ;;  %v2662_v39 = vand.u32 2147483648, %v2650_v11  ;;  %v2660_v48 = vand.u32 2147483647, %v2650_v11  ;;  %vm2656_vm12 = vweird.f32 %v2650_v11 }
 0x87e   :  { %3685 = vrcp.f32 %v2669_v2  ;;  %v2681_v55 = vand.u32 2147483648, %v2669_v2  ;;  %v2679_v32 = vand.u32 2147483647, %v2669_v2  ;;  %vm2675_vm13 = vweird.f32 %v2669_v2 }
 0x87f   :  { %v2663_v12 = vor.u32 1.1754944e-38, %v2662_v39  ;;  %vm2661_vm0 = vcmp.eq.f32.partialorder %v2660_v48, 8.507059e+37 }
 0x880   :  { %vm2680_vm7 = vcmp.eq.f32.partialorder %v2679_v32, 8.507059e+37 }
 0x881   :  { %v3682_v1 = vpop.eup %3681 }
 0x882   :  { %v2689_v53 = vadd.f32 1.0, %v3682_v1 }
 0x883   :  { %v3684_v22 = vpop.eup %3683 }
 0x884   :  { %v3686_v58 = vpop.eup %3685  ;;  %v2652_v57 = vmul.f32 %v3684_v22, %v2650_v11  ;;  %3687 = vrcp.f32 %v2689_v53  ;;  %vm2657_vm6 = vweird.f32 %v3684_v22  ;;  %v2701_v39 = vand.u32 2147483648, %v2689_v53 }
 0x885   :  { %v2671_v59 = vmul.f32 %v3686_v58, %v2669_v2  ;;  %3689 = vtanh.f32 %v2645_v36  ;;  %vm2676_vm11 = vweird.f32 %v3686_v58  ;;  %vm2658_vm14 = vmor %vm2656_vm12, %vm2657_vm6  ;;  %vm2695_vm9 = vweird.f32 %v2689_v53 }
 0x886   :  { %v2653_v8 = vsub.f32 1.0, %v2652_v57  ;;  %vm2677_vm15 = vmor %vm2675_vm13, %vm2676_vm11  ;;  %v2682_v57 = vor.u32 1.1754944e-38, %v2681_v55  ;;  %v7287_v55 = vld [vmem:[#allocation43_spill] sm:$0xff] }
 0x887   :  { %v2672_v44 = vsub.f32 1.0, %v2671_v59 }
 0x888   :  { %v2654_v45 = vmul.f32 %v3684_v22, %v2653_v8 }
 0x889   :  { %v2673_v1 = vmul.f32 %v3686_v58, %v2672_v44 }
 0x88a   :  { %v3688_v63 = vpop.eup %3687  ;;  %v2655_v30 = vadd.f32 %v3684_v22, %v2654_v45 }
 0x88b   :  { %v2674_v51 = vadd.f32 %v3686_v58, %v2673_v1  ;;  %v2691_v47 = vmul.f32 %v3688_v63, %v2689_v53  ;;  %v3690_v36 = vpop.eup %3689  ;;  %vm2696_vm8 = vweird.f32 %v3688_v63  ;;  %v7288_v1 = vld [vmem:[#allocation37_spill] sm:$0xff] }
 0x88c   :  { %v2659_v59 = vsel %vm2658_vm14, %v3684_v22, %v2655_v30  ;;  %v2699_v30 = vand.u32 2147483647, %v2689_v53  ;;  %vm2697_vm10 = vmor %vm2695_vm9, %vm2696_vm8  ;;  %v2702_v22 = vor.u32 1.1754944e-38, %v2701_v39  ;;  %v7285_v53 = vld [vmem:[#allocation56_spill] sm:$0xff]  ;;  %v7298_v39 = vld [vmem:[#allocation59_spill] sm:$0xff] }
 0x88d   :  { %v2664_v40 = vsel %vm2661_vm0, %v2663_v12, %v2659_v59  ;;  %v2678_v8 = vsel %vm2677_vm15, %v3686_v58, %v2674_v51  ;;  %v2692_v17 = vsub.f32 1.0, %v2691_v47  ;;  %v7289_v12 = vld [vmem:[#allocation60_spill] sm:$0xff]  ;;  %v7292_v59 = vld [vmem:[#allocation45_spill] sm:$0xff] }
 0x88e   :  { %v2683_v44 = vsel %vm2680_vm7, %v2682_v57, %v2678_v8  ;;  %v2706_v43 = vmul.f32 %v3690_v36, %v2664_v40  ;;  %vm2700_vm5 = vcmp.eq.f32.partialorder %v2699_v30, 8.507059e+37  ;;  %v7284_v40 = vld [vmem:[#allocation44_spill] sm:$0xff]  ;;  %v7291_v57 = vld [vmem:[#allocation46_spill] sm:$0xff]  ;;  %v7293_v36 = vld [vmem:[#allocation67_spill] sm:$0xff] }
 0x88f   :  { %v2705_v41 = vmul.f32 %v2683_v44, %v6179_v13  ;;  %v2693_v45 = vmul.f32 %v3688_v63, %v2692_v17  ;;  %v7280_v13 = vld [vmem:[#allocation83_spill] sm:$0xff]  ;;  %v7283_v17 = vld [vmem:[#allocation38_spill] sm:$0xff]  ;;  %v7290_v51 = vld [vmem:[#allocation48_spill] sm:$0xff] }
 0x890   :  { %v7294_v8 = vld [vmem:[#allocation53_spill] sm:$0xff]  ;;  %v7299_v30 = vld [vmem:[#allocation55_spill] sm:$0xff] }
 0x891   :  { %v6263_v11 = vadd.f32 %v2706_v43, %v2705_v41  ;;  %v2694_v2 = vadd.f32 %v3688_v63, %v2693_v45  ;;  %v7281_v41 = vld [vmem:[#allocation82_spill] sm:$0xff]  ;;  %v7282_v43 = vld [vmem:[#allocation81_spill] sm:$0xff]  ;;  %v7296_v45 = vld [vmem:[#allocation52_spill] sm:$0xff] }
 0x892   :  { %v7295_v44 = vld [vmem:[#allocation49_spill] sm:$0xff] }
 0x893   :  { %3691 = vtanh.f32 %v6263_v11  ;;  %v2698_v48 = vsel %vm2697_vm10, %v3688_v63, %v2694_v2  ;;  %v7286_v63 = vld [vmem:[#allocation41_spill] sm:$0xff] }
 0x894   :  { %v2703_v58 = vsel %vm2700_vm5, %v2702_v22, %v2698_v48  ;;  %v7297_v2 = vld [vmem:[#allocation61_spill] sm:$0xff] }
 0x895   :  { %v7300_v48 = vld [vmem:[#allocation57_spill] sm:$0xff] }
 0x899   :  { %v3692_v32 = vpop.eup %3691 }
 0x89a   :  { %v2709_v47 = vmul.f32 %v3692_v32, %v2703_v58  ;;  %v7301_v58 = vld [vmem:[#allocation39_spill] sm:$0xff] }
 0x89c   :  { %2730 = vmatmul.f32.vlgmr.msra.gmra.mxu0 %v2709_v47  ;;  %2750 = vmatmul.f32.vlgmr.msrb.gmra.mxu1 %v2709_v47 }
 0x89d   :  { %2770 = vmatmul.f32.vlgmr.msrb.gmra.mxu2 %v2709_v47  ;;  %2790 = vmatmul.f32.vlgmr.msrb.gmra.mxu3 %v2709_v47 }
 0x89e   :  { %3016 = vmatpush.msra.mxu0 %v5886_v21  ;;  %3036 = vmatpush.msrb.mxu1 %v5889_v34  ;;  %v7275_v21 = vld [vmem:[#allocation75_spill] sm:$0xff]  ;;  %v7276_v34 = vld [vmem:[#allocation50_spill] sm:$0xff] }
 0x89f   :  { %3056 = vmatpush.msrb.mxu2 %v5982_v38  ;;  %3076 = vmatpush.msrb.mxu3 %v5893_v7  ;;  %v7277_v7 = vld [vmem:[#allocation80_spill] sm:$0xff] }
 0x8a0   :  { %3017 = vmatpush.msra.mxu0 %v5896_v18  ;;  %3037 = vmatpush.msrb.mxu1 %v5899_v49  ;;  %v7278_v18 = vld [vmem:[#allocation77_spill] sm:$0xff]  ;;  %v7279_v49 = vld [vmem:[#allocation84_spill] sm:$0xff] }
 0x8a1   :  { %3057 = vmatpush.msrb.mxu2 %v5988_v42  ;;  %3077 = vmatpush.msrb.mxu3 %v5991_v24 }
 0x8a2   :  { %3018 = vmatpush.msra.mxu0 %v5994_v3  ;;  %3038 = vmatpush.msrb.mxu1 %v5997_v50 }
 0x8a3   :  { %3058 = vmatpush.msrb.mxu2 %v6000_v37  ;;  %3078 = vmatpush.msrb.mxu3 %v6003_v6 }
 0x8a4   :  { %3019 = vmatpush.msra.mxu0 %v6006_v35  ;;  %3039 = vmatpush.msrb.mxu1 %v6009_v28 }
 0x8a5   :  { %3059 = vmatpush.msrb.mxu2 %v6012_v60  ;;  %3079 = vmatpush.msrb.mxu3 %v6015_v4 }
 0x8a6   :  { %3020 = vmatpush.msra.mxu0 %v6018_v23  ;;  %3040 = vmatpush.msrb.mxu1 %v6021_v33 }
 0x8a7   :  { %3060 = vmatpush.msrb.mxu2 %v6024_v5  ;;  %3080 = vmatpush.msrb.mxu3 %v6027_v46 }
 0x8a8   :  { %3021 = vmatpush.msra.mxu0 %v6030_v61  ;;  %3041 = vmatpush.msrb.mxu1 %v6033_v56 }
 0x8a9   :  { %3061 = vmatpush.msrb.mxu2 %v6036_v52  ;;  %3081 = vmatpush.msrb.mxu3 %v6039_v54 }
 0x8aa   :  { %3022 = vmatpush.msra.mxu0 %v6042_v10  ;;  %3042 = vmatpush.msrb.mxu1 %v6045_v62 }
 0x8ab   :  { %3062 = vmatpush.msrb.mxu2 %v6048_v0  ;;  %3082 = vmatpush.msrb.mxu3 %v6051_v9 }
 0x8ac   :  { %3023 = vmatpush.msra.mxu0 %v6054_v14  ;;  %3043 = vmatpush.msrb.mxu1 %v6057_v15 }
 0x8ad   :  { %3063 = vmatpush.msrb.mxu2 %v6060_v16  ;;  %3083 = vmatpush.msrb.mxu3 %v6063_v19 }
 0x8ae   :  { %3024 = vmatpush.msra.mxu0 %v6066_v20  ;;  %3044 = vmatpush.msrb.mxu1 %v6069_v25 }
 0x8af   :  { %3064 = vmatpush.msrb.mxu2 %v6072_v26  ;;  %3084 = vmatpush.msrb.mxu3 %v6075_v31 }
 0x8b0   :  { %3025 = vmatpush.msra.mxu0 %v6078_v27  ;;  %3045 = vmatpush.msrb.mxu1 %v6081_v29 }
 0x8b1   :  { %3065 = vmatpush.msrb.mxu2 %v7275_v21  ;;  %3085 = vmatpush.msrb.mxu3 %v7276_v34 }
 0x8b2   :  { %3026 = vmatpush.msra.mxu0 %v7277_v7  ;;  %3046 = vmatpush.msrb.mxu1 %v7278_v18 }
 0x8b3   :  { %3066 = vmatpush.msrb.mxu2 %v7279_v49  ;;  %3086 = vmatpush.msrb.mxu3 %v7280_v13 }
 0x8b4   :  { %3027 = vmatpush.msra.mxu0 %v7281_v41  ;;  %3047 = vmatpush.msrb.mxu1 %v7282_v43 }
 0x8b5   :  { %3067 = vmatpush.msrb.mxu2 %v7283_v17  ;;  %3087 = vmatpush.msrb.mxu3 %v7284_v40 }
 0x8b6   :  { %3028 = vmatpush.msra.mxu0 %v7285_v53  ;;  %3048 = vmatpush.msrb.mxu1 %v7286_v63 }
 0x8b7   :  { %3068 = vmatpush.msrb.mxu2 %v7287_v55  ;;  %3088 = vmatpush.msrb.mxu3 %v7288_v1 }
 0x8b8   :  { %3029 = vmatpush.msra.mxu0 %v7289_v12  ;;  %3049 = vmatpush.msrb.mxu1 %v7290_v51  ;;  %v7308_v12 = vld [vmem:[#allocation32_spill] sm:$0xff] }
 0x8b9   :  { %3069 = vmatpush.msrb.mxu2 %v7291_v57  ;;  %3089 = vmatpush.msrb.mxu3 %v7292_v59 }
 0x8ba   :  { %3030 = vmatpush.msra.mxu0 %v7293_v36  ;;  %3050 = vmatpush.msrb.mxu1 %v7294_v8  ;;  %v7303_v36 = vld [vmem:[#allocation26_spill] sm:$0xff]  ;;  %v7304_v8 = vld [vmem:[#allocation27_spill] sm:$0xff] }
 0x8bb   :  { %3070 = vmatpush.msrb.mxu2 %v7295_v44  ;;  %3090 = vmatpush.msrb.mxu3 %v7296_v45  ;;  %v7305_v57 = vsel %vm4530_vm2, %v7303_v36, %v7304_v8 }
 0x8bc   :  { %3031 = vmatpush.msra.mxu0 %v7297_v2  ;;  %3051 = vmatpush.msrb.mxu1 %v7298_v39 }
 0x8bd   :  { %3071 = vmatpush.msrb.mxu2 %v7299_v30  ;;  %3091 = vmatpush.msrb.mxu3 %v7300_v48  ;;  %v7307_v30 = vld [vmem:[#allocation29_spill] sm:$0xff] }
 0x8be   :  { %v7309_v48 = vsel %vm4551_vm4, %v7307_v30, %v7308_v12 }
 0x919   :  { %v2731_v22 = vpop.f32.mrf.mxu0  ;;  %v2751_v32 = vpop.f32.mrf.mxu1 }
 0x91a   :  { %v2794_v47 = vadd.f32 %v2731_v22, %v7301_v58  ;;  %v2795_v44 = vadd.f32 %v2751_v32, %v7305_v57  ;;  %v7312_v32 = vld [vmem:[#allocation34_spill] sm:$0xff] }
 0x91c   :  { %v3475_v51 = vmul.f32 -1.442695, %v2794_v47  ;;  %v3476_v45 = vmul.f32 -1.442695, %v2795_v44 }
 0x91e   :  { %3693 = vpow2.f32 %v3475_v51 }
 0x91f   :  { %3695 = vpow2.f32 %v3476_v45  ;;  %v7311_v45 = vld [vmem:[#allocation36_spill] sm:$0xff] }
 0x920   :  { %v2791_v2 = vpop.f32.mrf.mxu3  ;;  %v2771_v57 = vpop.f32.mrf.mxu2  ;;  %v7313_v47 = vsel %vm4545_vm3, %v7311_v45, %v7312_v32 }
 0x921   :  { %v2797_v1 = vadd.f32 %v2791_v2, %v7309_v48  ;;  %v2796_v39 = vadd.f32 %v2771_v57, %v7313_v47 }
 0x923   :  { %v3477_v55 = vmul.f32 -1.442695, %v2797_v1 }
 0x924   :  { %v3694_v63 = vpop.eup %3693 }
 0x925   :  { %v3696_v22 = vpop.eup %3695  ;;  %v2801_v58 = vadd.f32 1.0, %v3694_v63  ;;  %3697 = vpow2.f32 %v3477_v55 }
 0x926   :  { %v2820_v59 = vadd.f32 1.0, %v3696_v22 }
 0x927   :  { %3699 = vrcp.f32 %v2801_v58  ;;  %v2813_v55 = vand.u32 2147483648, %v2801_v58  ;;  %v2811_v53 = vand.u32 2147483647, %v2801_v58  ;;  %vm2807_vm12 = vweird.f32 %v2801_v58 }
 0x928   :  { %3701 = vrcp.f32 %v2820_v59  ;;  %v2832_v48 = vand.u32 2147483648, %v2820_v59  ;;  %v2830_v40 = vand.u32 2147483647, %v2820_v59  ;;  %vm2826_vm13 = vweird.f32 %v2820_v59 }
 0x929   :  { %v2814_v57 = vor.u32 1.1754944e-38, %v2813_v55  ;;  %vm2812_vm0 = vcmp.eq.f32.partialorder %v2811_v53, 8.507059e+37 }
 0x92a   :  { %v2833_v47 = vor.u32 1.1754944e-38, %v2832_v48  ;;  %vm2831_vm7 = vcmp.eq.f32.partialorder %v2830_v40, 8.507059e+37 }
 0x92b   :  { %v3698_v36 = vpop.eup %3697 }
 0x92c   :  { %v2840_v8 = vadd.f32 1.0, %v3698_v36 }
 0x92d   :  { %v3700_v51 = vpop.eup %3699 }
 0x92e   :  { %v3702_v12 = vpop.eup %3701  ;;  %v2803_v2 = vmul.f32 %v3700_v51, %v2801_v58  ;;  %3703 = vrcp.f32 %v2840_v8  ;;  %vm2808_vm6 = vweird.f32 %v3700_v51  ;;  %v2852_v55 = vand.u32 2147483648, %v2840_v8 }
 0x92f   :  { %v2822_v1 = vmul.f32 %v3702_v12, %v2820_v59  ;;  %3705 = vtanh.f32 %v2796_v39  ;;  %vm2827_vm11 = vweird.f32 %v3702_v12  ;;  %vm2809_vm14 = vmor %vm2807_vm12, %vm2808_vm6  ;;  %vm2846_vm9 = vweird.f32 %v2840_v8 }
 0x930   :  { %v2804_v30 = vsub.f32 1.0, %v2803_v2  ;;  %vm2828_vm15 = vmor %vm2826_vm13, %vm2827_vm11 }
 0x931   :  { %v2823_v63 = vsub.f32 1.0, %v2822_v1 }
 0x932   :  { %v2805_v22 = vmul.f32 %v3700_v51, %v2804_v30 }
 0x933   :  { %v2824_v36 = vmul.f32 %v3702_v12, %v2823_v63 }
 0x934   :  { %v3704_v44 = vpop.eup %3703  ;;  %v2806_v17 = vadd.f32 %v3700_v51, %v2805_v22 }
 0x935   :  { %v2825_v45 = vadd.f32 %v3702_v12, %v2824_v36  ;;  %v2842_v32 = vmul.f32 %v3704_v44, %v2840_v8  ;;  %v3706_v39 = vpop.eup %3705  ;;  %vm2847_vm8 = vweird.f32 %v3704_v44 }
 0x936   :  { %v2810_v2 = vsel %vm2809_vm14, %v3700_v51, %v2806_v17  ;;  %v2850_v17 = vand.u32 2147483647, %v2840_v8  ;;  %vm2848_vm10 = vmor %vm2846_vm9, %vm2847_vm8  ;;  %v2853_v51 = vor.u32 1.1754944e-38, %v2852_v55  ;;  %v3889_v8 = vld [vmem:[#allocation9 + $0x1c8] sm:$0xff] }
 0x937   :  { %v2815_v1 = vsel %vm2812_vm0, %v2814_v57, %v2810_v2  ;;  %v2829_v30 = vsel %vm2828_vm15, %v3702_v12, %v2825_v45  ;;  %v2843_v43 = vsub.f32 1.0, %v2842_v32 }
 0x938   :  { %v2834_v63 = vsel %vm2831_vm7, %v2833_v47, %v2829_v30  ;;  %v2857_v41 = vmul.f32 %v3706_v39, %v2815_v1  ;;  %vm2851_vm5 = vcmp.eq.f32.partialorder %v2850_v17, 8.507059e+37 }
 0x939   :  { %v2856_v13 = vmul.f32 %v2834_v63, %v6263_v11  ;;  %v2844_v22 = vmul.f32 %v3704_v44, %v2843_v43  ;;  %v3885_v11 = vld [vmem:[#allocation9 + $0x1e0] sm:$0xff] }
 0x93a   :  { %v3888_v43 = vld [vmem:[#allocation9 + $0x1c0] sm:$0xff] }
 0x93b   :  { %v6347_v58 = vadd.f32 %v2857_v41, %v2856_v13  ;;  %v2845_v59 = vadd.f32 %v3704_v44, %v2844_v22  ;;  %v3886_v13 = vld [vmem:[#allocation9 + $0x1e8] sm:$0xff]  ;;  %v3887_v41 = vld [vmem:[#allocation9 + $0x1f8] sm:$0xff]  ;;  %v7345_v63 = vld [vmem:[#allocation33_spill] sm:$0xff] }
 0x93c   :  { %v7346_v22 = vld [vmem:[#allocation28_spill] sm:$0xff] }
 0x93d   :  { %3707 = vtanh.f32 %v6347_v58  ;;  %v2849_v53 = vsel %vm2848_vm10, %v3704_v44, %v2845_v59  ;;  %v7347_v59 = vsel %vm4545_vm3, %v7345_v63, %v7346_v22 }
 0x93e   :  { %v2854_v12 = vsel %vm2851_vm5, %v2853_v51, %v2849_v53 }
 0x943   :  { %v3708_v40 = vpop.eup %3707 }
 0x944   :  { %v2860_v48 = vmul.f32 %v3708_v40, %v2854_v12 }
 0x946   :  { %2881 = vmatmul.f32.vlgmr.msrb.gmra.mxu0 %v2860_v48  ;;  %2901 = vmatmul.f32.vlgmr.msra.gmra.mxu1 %v2860_v48 }
 0x947   :  { %2921 = vmatmul.f32.vlgmr.msra.gmra.mxu2 %v2860_v48  ;;  %2941 = vmatmul.f32.vlgmr.msra.gmra.mxu3 %v2860_v48 }
 0x948   :  { %3167 = vmatpush.msrb.mxu0 %v3885_v11  ;;  %3187 = vmatpush.msra.mxu1 %v3886_v13 }
 0x949   :  { %3207 = vmatpush.msra.mxu2 %v5982_v38  ;;  %3227 = vmatpush.msra.mxu3 %v3887_v41  ;;  %v7314_v38 = vld [vmem:[#allocation83_spill] sm:$0xff] }
 0x94a   :  { %3168 = vmatpush.msrb.mxu0 %v3888_v43  ;;  %3188 = vmatpush.msra.mxu1 %v3889_v8 }
 0x94b   :  { %3208 = vmatpush.msra.mxu2 %v5988_v42  ;;  %3228 = vmatpush.msra.mxu3 %v5991_v24  ;;  %v7315_v42 = vld [vmem:[#allocation82_spill] sm:$0xff]  ;;  %v7316_v24 = vld [vmem:[#allocation81_spill] sm:$0xff] }
 0x94c   :  { %3169 = vmatpush.msrb.mxu0 %v5994_v3  ;;  %3189 = vmatpush.msra.mxu1 %v5997_v50  ;;  %v7317_v3 = vld [vmem:[#allocation38_spill] sm:$0xff]  ;;  %v7318_v50 = vld [vmem:[#allocation44_spill] sm:$0xff] }
 0x94d   :  { %3209 = vmatpush.msra.mxu2 %v6000_v37  ;;  %3229 = vmatpush.msra.mxu3 %v6003_v6  ;;  %v7319_v37 = vld [vmem:[#allocation56_spill] sm:$0xff]  ;;  %v7320_v6 = vld [vmem:[#allocation41_spill] sm:$0xff] }
 0x94e   :  { %3170 = vmatpush.msrb.mxu0 %v6006_v35  ;;  %3190 = vmatpush.msra.mxu1 %v6009_v28  ;;  %v7321_v35 = vld [vmem:[#allocation43_spill] sm:$0xff]  ;;  %v7322_v28 = vld [vmem:[#allocation37_spill] sm:$0xff] }
 0x94f   :  { %3210 = vmatpush.msra.mxu2 %v6012_v60  ;;  %3230 = vmatpush.msra.mxu3 %v6015_v4  ;;  %v7323_v60 = vld [vmem:[#allocation60_spill] sm:$0xff] }
 0x950   :  { %3171 = vmatpush.msrb.mxu0 %v6018_v23  ;;  %3191 = vmatpush.msra.mxu1 %v6021_v33  ;;  %v7324_v4 = vld [vmem:[#allocation48_spill] sm:$0xff]  ;;  %v7325_v23 = vld [vmem:[#allocation46_spill] sm:$0xff]  ;;  %v7326_v33 = vld [vmem:[#allocation45_spill] sm:$0xff] }
 0x951   :  { %3211 = vmatpush.msra.mxu2 %v6024_v5  ;;  %3231 = vmatpush.msra.mxu3 %v6027_v46  ;;  %v7327_v5 = vld [vmem:[#allocation67_spill] sm:$0xff]  ;;  %v7328_v46 = vld [vmem:[#allocation53_spill] sm:$0xff] }
 0x952   :  { %3172 = vmatpush.msrb.mxu0 %v6030_v61  ;;  %3192 = vmatpush.msra.mxu1 %v6033_v56  ;;  %v7329_v61 = vld [vmem:[#allocation49_spill] sm:$0xff]  ;;  %v7330_v56 = vld [vmem:[#allocation52_spill] sm:$0xff] }
 0x953   :  { %3212 = vmatpush.msra.mxu2 %v6036_v52  ;;  %3232 = vmatpush.msra.mxu3 %v6039_v54  ;;  %v7331_v52 = vld [vmem:[#allocation61_spill] sm:$0xff]  ;;  %v7332_v54 = vld [vmem:[#allocation59_spill] sm:$0xff] }
 0x954   :  { %3173 = vmatpush.msrb.mxu0 %v6042_v10  ;;  %3193 = vmatpush.msra.mxu1 %v6045_v62  ;;  %v7333_v10 = vld [vmem:[#allocation55_spill] sm:$0xff]  ;;  %v7334_v62 = vld [vmem:[#allocation57_spill] sm:$0xff] }
 0x955   :  { %3213 = vmatpush.msra.mxu2 %v6048_v0  ;;  %3233 = vmatpush.msra.mxu3 %v6051_v9 }
 0x956   :  { %3174 = vmatpush.msrb.mxu0 %v6054_v14  ;;  %3194 = vmatpush.msra.mxu1 %v6057_v15  ;;  %v7335_v14 = vld [vmem:[#allocation40_spill] sm:$0xff] }
 0x957   :  { %3214 = vmatpush.msra.mxu2 %v6060_v16  ;;  %3234 = vmatpush.msra.mxu3 %v6063_v19  ;;  %v7337_v19 = vld [vmem:[#allocation35_spill] sm:$0xff]  ;;  %v3319_v16 = vld [vmem:[%s6530_s7 + $0x20] sm:$0xff] }
 0x958   :  { %3175 = vmatpush.msrb.mxu0 %v6066_v20  ;;  %3195 = vmatpush.msra.mxu1 %v6069_v25  ;;  %v7338_v20 = vld [vmem:[#allocation30_spill] sm:$0xff] }
 0x959   :  { %3215 = vmatpush.msra.mxu2 %v6072_v26  ;;  %3235 = vmatpush.msra.mxu3 %v6075_v31  ;;  %v7339_v25 = vsel %vm4530_vm2, %v7337_v19, %v7338_v20  ;;  %v7348_v19 = vld [vmem:[#allocation65_spill] sm:$0xff] }
 0x95a   :  { %3176 = vmatpush.msrb.mxu0 %v6078_v27  ;;  %3196 = vmatpush.msra.mxu1 %v6081_v29 }
 0x95b   :  { %3216 = vmatpush.msra.mxu2 %v7275_v21  ;;  %3236 = vmatpush.msra.mxu3 %v7276_v34  ;;  %v7341_v34 = vld [vmem:[#allocation54_spill] sm:$0xff] }
 0x95c   :  { %3177 = vmatpush.msrb.mxu0 %v7277_v7  ;;  %3197 = vmatpush.msra.mxu1 %v7278_v18  ;;  %v7342_v7 = vld [vmem:[#allocation25_spill] sm:$0xff] }
 0x95d   :  { %3217 = vmatpush.msra.mxu2 %v7279_v49  ;;  %3237 = vmatpush.msra.mxu3 %v7314_v38  ;;  %v7343_v18 = vsel %vm4551_vm4, %v7341_v34, %v7342_v7 }
 0x95e   :  { %3178 = vmatpush.msrb.mxu0 %v7315_v42  ;;  %3198 = vmatpush.msra.mxu1 %v7316_v24 }
 0x95f   :  { %3218 = vmatpush.msra.mxu2 %v7317_v3  ;;  %3238 = vmatpush.msra.mxu3 %v7318_v50 }
 0x960   :  { %3179 = vmatpush.msrb.mxu0 %v7319_v37  ;;  %3199 = vmatpush.msra.mxu1 %v7320_v6 }
 0x961   :  { %3219 = vmatpush.msra.mxu2 %v7321_v35  ;;  %3239 = vmatpush.msra.mxu3 %v7322_v28 }
 0x962   :  { %3180 = vmatpush.msrb.mxu0 %v7323_v60  ;;  %3200 = vmatpush.msra.mxu1 %v7324_v4 }
 0x963   :  { %3220 = vmatpush.msra.mxu2 %v7325_v23  ;;  %3240 = vmatpush.msra.mxu3 %v7326_v33 }
 0x964   :  { %3181 = vmatpush.msrb.mxu0 %v7327_v5  ;;  %3201 = vmatpush.msra.mxu1 %v7328_v46 }
 0x965   :  { %3221 = vmatpush.msra.mxu2 %v7329_v61  ;;  %3241 = vmatpush.msra.mxu3 %v7330_v56 }
 0x966   :  { %3182 = vmatpush.msrb.mxu0 %v7331_v52  ;;  %3202 = vmatpush.msra.mxu1 %v7332_v54 }
 0x967   :  { %3222 = vmatpush.msra.mxu2 %v7333_v10  ;;  %3242 = vmatpush.msra.mxu3 %v7334_v62 }
 0x9c3   :  { %v2882_v0 = vpop.f32.mrf.mxu0  ;;  %v2902_v9 = vpop.f32.mrf.mxu1 }
 0x9c4   :  { %v2945_v15 = vadd.f32 %v2882_v0, %v7335_v14  ;;  %v2946_v26 = vadd.f32 %v2902_v9, %v7339_v25  ;;  %v7349_v25 = vld [vmem:[#allocation68_spill] sm:$0xff] }
 0x9c6   :  { %v3478_v31 = vmul.f32 -1.442695, %v2945_v15  ;;  %v3479_v27 = vmul.f32 -1.442695, %v2946_v26  ;;  %v7350_v26 = vld [vmem:[#allocation23_spill] sm:$0xff] }
 0x9c8   :  { %3709 = vpow2.f32 %v3478_v31  ;;  %v7351_v31 = vsel %vm4530_vm2, %v7349_v25, %v7350_v26  ;;  %v3328_v25 = vld [vmem:[%s6530_s7 + $0x68] sm:$0xff]  ;;  %v3327_v26 = vld [vmem:[%s6530_s7 + $0x60] sm:$0xff] }
 0x9c9   :  { %3711 = vpow2.f32 %v3479_v27 }
 0x9ca   :  { %v2942_v29 = vpop.f32.mrf.mxu3  ;;  %v2922_v47 = vpop.f32.mrf.mxu2 }
 0x9cb   :  { %v2948_v49 = vadd.f32 %v2942_v29, %v7343_v18  ;;  %v2947_v55 = vadd.f32 %v2922_v47, %v7347_v59  ;;  %v7352_v18 = vld [vmem:[#allocation72_spill] sm:$0xff]  ;;  %v7355_v59 = vld [vmem:[#allocation73_spill] sm:$0xff] }
 0x9cd   :  { %v3480_v44 = vmul.f32 -1.442695, %v2948_v49  ;;  %v7353_v49 = vld [vmem:[#allocation22_spill] sm:$0xff] }
 0x9ce   :  { %v3710_v36 = vpop.eup %3709 }
 0x9cf   :  { %v3712_v57 = vpop.eup %3711  ;;  %v2952_v45 = vadd.f32 1.0, %v3710_v36  ;;  %3713 = vpow2.f32 %v3480_v44  ;;  %v7354_v44 = vsel %vm4551_vm4, %v7352_v18, %v7353_v49 }
 0x9d0   :  { %v2971_v32 = vadd.f32 1.0, %v3712_v57 }
 0x9d1   :  { %3715 = vrcp.f32 %v2952_v45  ;;  %v2964_v48 = vand.u32 2147483648, %v2952_v45  ;;  %v2962_v41 = vand.u32 2147483647, %v2952_v45  ;;  %vm2958_vm12 = vweird.f32 %v2952_v45 }
 0x9d2   :  { %3717 = vrcp.f32 %v2971_v32  ;;  %v2983_v11 = vand.u32 2147483648, %v2971_v32  ;;  %v2981_v8 = vand.u32 2147483647, %v2971_v32  ;;  %vm2977_vm13 = vweird.f32 %v2971_v32 }
 0x9d3   :  { %v2965_v24 = vor.u32 1.1754944e-38, %v2964_v48  ;;  %vm2963_vm0 = vcmp.eq.f32.partialorder %v2962_v41, 8.507059e+37 }
 0x9d4   :  { %v2984_v37 = vor.u32 1.1754944e-38, %v2983_v11  ;;  %vm2982_vm7 = vcmp.eq.f32.partialorder %v2981_v8, 8.507059e+37 }
 0x9d5   :  { %v3714_v2 = vpop.eup %3713 }
 0x9d6   :  { %v2991_v39 = vadd.f32 1.0, %v3714_v2 }
 0x9d7   :  { %v3716_v1 = vpop.eup %3715 }
 0x9d8   :  { %v3718_v17 = vpop.eup %3717  ;;  %v2954_v53 = vmul.f32 %v3716_v1, %v2952_v45  ;;  %3719 = vrcp.f32 %v2991_v39  ;;  %vm2959_vm6 = vweird.f32 %v3716_v1  ;;  %v3003_v52 = vand.u32 2147483648, %v2991_v39 }
 0x9d9   :  { %v2973_v51 = vmul.f32 %v3718_v17, %v2971_v32  ;;  %3721 = vtanh.f32 %v2947_v55  ;;  %vm2978_vm11 = vweird.f32 %v3718_v17  ;;  %vm2960_vm14 = vmor %vm2958_vm12, %vm2959_vm6  ;;  %vm2997_vm9 = vweird.f32 %v2991_v39  ;;  %v7356_v55 = vld [vmem:[#allocation21_spill] sm:$0xff] }
 0x9da   :  { %v2955_v40 = vsub.f32 1.0, %v2954_v53  ;;  %vm2979_vm15 = vmor %vm2977_vm13, %vm2978_vm11  ;;  %v3001_v54 = vand.u32 2147483647, %v2991_v39  ;;  %v3004_v62 = vor.u32 1.1754944e-38, %v3003_v52 }
 0x9db   :  { %v2974_v12 = vsub.f32 1.0, %v2973_v51 }
 0x9dc   :  { %v2956_v13 = vmul.f32 %v3716_v1, %v2955_v40  ;;  %vm3002_vm5 = vcmp.eq.f32.partialorder %v3001_v54, 8.507059e+37 }
 0x9dd   :  { %v2975_v43 = vmul.f32 %v3718_v17, %v2974_v12 }
 0x9de   :  { %v3720_v38 = vpop.eup %3719  ;;  %v2957_v42 = vadd.f32 %v3716_v1, %v2956_v13 }
 0x9df   :  { %v2976_v3 = vadd.f32 %v3718_v17, %v2975_v43  ;;  %v2993_v50 = vmul.f32 %v3720_v38, %v2991_v39  ;;  %v3722_v35 = vpop.eup %3721  ;;  %vm2998_vm8 = vweird.f32 %v3720_v38 }
 0x9e0   :  { %v2961_v6 = vsel %vm2960_vm14, %v3716_v1, %v2957_v42  ;;  %vm2999_vm10 = vmor %vm2997_vm9, %vm2998_vm8 }
 0x9e1   :  { %v2966_v28 = vsel %vm2963_vm0, %v2965_v24, %v2961_v6  ;;  %v2980_v60 = vsel %vm2979_vm15, %v3718_v17, %v2976_v3  ;;  %v2994_v4 = vsub.f32 1.0, %v2993_v50  ;;  %v7357_v17 = vsel %vm4545_vm3, %v7355_v59, %v7356_v55  ;;  %v3317_v55 = vld [vmem:[%s6530_s7 + $0x10] sm:$0xff] }
 0x9e2   :  { %v2985_v23 = vsel %vm2982_vm7, %v2984_v37, %v2980_v60  ;;  %v3008_v33 = vmul.f32 %v3722_v35, %v2966_v28 }
 0x9e3   :  { %v3007_v5 = vmul.f32 %v2985_v23, %v6347_v58  ;;  %v2995_v46 = vmul.f32 %v3720_v38, %v2994_v4 }
 0x9e5   :  { %v6426_v61 = vadd.f32 %v3008_v33, %v3007_v5  ;;  %v2996_v56 = vadd.f32 %v3720_v38, %v2995_v46 }
 0x9e7   :  { %3723 = vtanh.f32 %v6426_v61  ;;  %v3000_v10 = vsel %vm2999_vm10, %v3720_v38, %v2996_v56 }
 0x9e8   :  { %v3005_v9 = vsel %vm3002_vm5, %v3004_v62, %v3000_v10 }
 0x9ed   :  { %v3724_v0 = vpop.eup %3723 }
 0x9ee   :  { %v3011_v14 = vmul.f32 %v3724_v0, %v3005_v9 }
 0x9f0   :  { %3032 = vmatmul.f32.vlgmr.msra.gmra.mxu0 %v3011_v14  ;;  %3052 = vmatmul.f32.vlgmr.msrb.gmra.mxu1 %v3011_v14 }
 0x9f1   :  { %3072 = vmatmul.f32.vlgmr.msrb.gmra.mxu2 %v3011_v14  ;;  %3092 = vmatmul.f32.vlgmr.msrb.gmra.mxu3 %v3011_v14 }
 0xa6d   :  { %v3033_v58 = vpop.f32.mrf.mxu0  ;;  %v3053_v15 = vpop.f32.mrf.mxu1 }
 0xa6e   :  { %v3096_v20 = vadd.f32 %v3033_v58, %v7348_v19  ;;  %v3097_v27 = vadd.f32 %v3053_v15, %v7351_v31  ;;  %v3326_v31 = vld [vmem:[%s6530_s7 + $0x58] sm:$0xff] }
 0xa70   :  { %v3481_v29 = vmul.f32 -1.442695, %v3096_v20  ;;  %v3482_v34 = vmul.f32 -1.442695, %v3097_v27  ;;  %v3329_v20 = vld [vmem:[%s6530_s7 + $0x70] sm:$0xff] }
 0xa71   :  { %v3325_v27 = vld [vmem:[%s6530_s7 + $0x50] sm:$0xff] }
 0xa72   :  { %3725 = vpow2.f32 %v3481_v29  ;;  %v3324_v29 = vld [vmem:[%s6530_s7 + $0x48] sm:$0xff] }
 0xa73   :  { %3727 = vpow2.f32 %v3482_v34  ;;  %v3323_v34 = vld [vmem:[%s6530_s7 + $0x40] sm:$0xff] }
 0xa74   :  { %v3093_v7 = vpop.f32.mrf.mxu3  ;;  %v3073_v39 = vpop.f32.mrf.mxu2 }
 0xa75   :  { %v3099_v36 = vadd.f32 %v3093_v7, %v7354_v44  ;;  %v3098_v53 = vadd.f32 %v3073_v39, %v7357_v17  ;;  %v3322_v7 = vld [vmem:[%s6530_s7 + $0x38] sm:$0xff]  ;;  %v7358_v44 = vld [vmem:[#allocation51_spill] sm:$0xff]  ;;  %v7362_v17 = vld [vmem:[#allocation78_spill] sm:$0xff] }
 0xa77   :  { %v3483_v57 = vmul.f32 -1.442695, %v3099_v36 }
 0xa78   :  { %v3726_v45 = vpop.eup %3725 }
 0xa79   :  { %v3728_v32 = vpop.eup %3727  ;;  %v3103_v47 = vadd.f32 1.0, %v3726_v45  ;;  %3729 = vpow2.f32 %v3483_v57  ;;  %v7359_v57 = vld [vmem:[#allocation70_spill] sm:$0xff]  ;;  %v7360_v45 = vld [vmem:[#allocation71_spill] sm:$0xff] }
 0xa7a   :  { %v3122_v2 = vadd.f32 1.0, %v3728_v32  ;;  %v7361_v32 = vsel %vm4530_vm2, %v7359_v57, %v7360_v45 }
 0xa7b   :  { %3731 = vrcp.f32 %v3103_v47  ;;  %v3115_v13 = vand.u32 2147483648, %v3103_v47  ;;  %v3113_v8 = vand.u32 2147483647, %v3103_v47  ;;  %vm3109_vm12 = vweird.f32 %v3103_v47 }
 0xa7c   :  { %3733 = vrcp.f32 %v3122_v2  ;;  %v3134_v41 = vand.u32 2147483648, %v3122_v2  ;;  %v3132_v42 = vand.u32 2147483647, %v3122_v2  ;;  %vm3128_vm13 = vweird.f32 %v3122_v2 }
 0xa7d   :  { %v3116_v50 = vor.u32 1.1754944e-38, %v3115_v13  ;;  %vm3114_vm0 = vcmp.eq.f32.partialorder %v3113_v8, 8.507059e+37  ;;  %v3315_v13 = vld [vmem:[%s6530_s7] sm:$0xff] }
 0xa7e   :  { %v3135_v35 = vor.u32 1.1754944e-38, %v3134_v41  ;;  %vm3133_vm7 = vcmp.eq.f32.partialorder %v3132_v42, 8.507059e+37 }
 0xa7f   :  { %v3730_v1 = vpop.eup %3729 }
 0xa80   :  { %v3142_v63 = vadd.f32 1.0, %v3730_v1 }
 0xa81   :  { %v3732_v22 = vpop.eup %3731 }
 0xa82   :  { %v3734_v51 = vpop.eup %3733  ;;  %v3105_v40 = vmul.f32 %v3732_v22, %v3103_v47  ;;  %3735 = vrcp.f32 %v3142_v63  ;;  %vm3110_vm6 = vweird.f32 %v3732_v22  ;;  %v3154_v62 = vand.u32 2147483648, %v3142_v63 }
 0xa83   :  { %v3124_v12 = vmul.f32 %v3734_v51, %v3122_v2  ;;  %3737 = vtanh.f32 %v3098_v53  ;;  %vm3129_vm11 = vweird.f32 %v3734_v51  ;;  %vm3111_vm14 = vmor %vm3109_vm12, %vm3110_vm6  ;;  %vm3148_vm9 = vweird.f32 %v3142_v63  ;;  %v3321_v2 = vld [vmem:[%s6530_s7 + $0x30] sm:$0xff]  ;;  %v7363_v53 = vld [vmem:[#allocation69_spill] sm:$0xff] }
 0xa84   :  { %v3106_v48 = vsub.f32 1.0, %v3105_v40  ;;  %vm3130_vm15 = vmor %vm3128_vm13, %vm3129_vm11  ;;  %v3152_v0 = vand.u32 2147483647, %v3142_v63  ;;  %v3155_v14 = vor.u32 1.1754944e-38, %v3154_v62 }
 0xa85   :  { %v3125_v11 = vsub.f32 1.0, %v3124_v12  ;;  %v3316_v12 = vld [vmem:[%s6530_s7 + $0x8] sm:$0xff] }
 0xa86   :  { %v3107_v43 = vmul.f32 %v3732_v22, %v3106_v48  ;;  %vm3153_vm5 = vcmp.eq.f32.partialorder %v3152_v0, 8.507059e+37 }
 0xa87   :  { %v3126_v38 = vmul.f32 %v3734_v51, %v3125_v11 }
 0xa88   :  { %v3736_v24 = vpop.eup %3735  ;;  %v3108_v3 = vadd.f32 %v3732_v22, %v3107_v43 }
 0xa89   :  { %v3127_v37 = vadd.f32 %v3734_v51, %v3126_v38  ;;  %v3144_v6 = vmul.f32 %v3736_v24, %v3142_v63  ;;  %v3738_v60 = vpop.eup %3737  ;;  %vm3149_vm8 = vweird.f32 %v3736_v24  ;;  %v3320_v63 = vld [vmem:[%s6530_s7 + $0x28] sm:$0xff] }
 0xa8a   :  { %v3112_v28 = vsel %vm3111_vm14, %v3732_v22, %v3108_v3  ;;  %vm3150_vm10 = vmor %vm3148_vm9, %vm3149_vm8  ;;  %v3318_v22 = vld [vmem:[%s6530_s7 + $0x18] sm:$0xff]  ;;  %v7365_v3 = vld [vmem:[#allocation79_spill] sm:$0xff]  ;;  %vm3355_vm9 = vcmask 64512  }
 0xa8b   :  { %v3117_v4 = vsel %vm3114_vm0, %v3116_v50, %v3112_v28  ;;  %v3131_v23 = vsel %vm3130_vm15, %v3734_v51, %v3127_v37  ;;  %v3145_v33 = vsub.f32 1.0, %v3144_v6  ;;  %v7364_v51 = vsel %vm4551_vm4, %v7362_v17, %v7363_v53  ;;  %v7366_v50 = vld [vmem:[#allocation74_spill] sm:$0xff] }
 0xa8c   :  { %v3136_v5 = vsel %vm3133_vm7, %v3135_v35, %v3131_v23  ;;  %v3159_v46 = vmul.f32 %v3738_v60, %v3117_v4  ;;  %v7367_v37 = vsel %vm4545_vm3, %v7365_v3, %v7366_v50 }
 0xa8d   :  { %v3158_v56 = vmul.f32 %v3136_v5, %v6426_v61  ;;  %v3146_v52 = vmul.f32 %v3736_v24, %v3145_v33  ;;  %v3330_v61 = vld [vmem:[%s6530_s7 + $0x78] sm:$0xff] }
 0xa8e   :  { %3335 = vmatpush.msra.mxu0 %v3330_v61 }
 0xa8f   :  { %v6446_v54 = vadd.f32 %v3159_v46, %v3158_v56  ;;  %v3147_v10 = vadd.f32 %v3736_v24, %v3146_v52 }
 0xa90   :  { %3336 = vmatpush.msra.mxu0 %v3329_v20 }
 0xa91   :  { %3739 = vtanh.f32 %v6446_v54  ;;  %v3151_v9 = vsel %vm3150_vm10, %v3736_v24, %v3147_v10 }
 0xa92   :  { %v3156_v15 = vsel %vm3153_vm5, %v3155_v14, %v3151_v9  ;;  %3337 = vmatpush.msra.mxu0 %v3328_v25 }
 0xa94   :  { %3338 = vmatpush.msra.mxu0 %v3327_v26 }
 0xa96   :  { %3339 = vmatpush.msra.mxu0 %v3326_v31 }
 0xa97   :  { %v3740_v58 = vpop.eup %3739 }
 0xa98   :  { %v3162_v19 = vmul.f32 %v3740_v58, %v3156_v15  ;;  %3340 = vmatpush.msra.mxu0 %v3325_v27 }
 0xa9a   :  { %3183 = vmatmul.f32.vlgmr.msrb.gmra.mxu0 %v3162_v19  ;;  %3203 = vmatmul.f32.vlgmr.msra.gmra.mxu1 %v3162_v19 }
 0xa9b   :  { %3223 = vmatmul.f32.vlgmr.msra.gmra.mxu2 %v3162_v19  ;;  %3243 = vmatmul.f32.vlgmr.msra.gmra.mxu3 %v3162_v19 }
 0xa9c   :  { %3341 = vmatpush.msra.mxu0 %v3324_v29 }
 0xa9e   :  { %3342 = vmatpush.msra.mxu0 %v3323_v34 }
 0xaa0   :  { %3343 = vmatpush.msra.mxu0 %v3322_v7 }
 0xaa2   :  { %3344 = vmatpush.msra.mxu0 %v3321_v2 }
 0xaa4   :  { %3345 = vmatpush.msra.mxu0 %v3320_v63 }
 0xaa6   :  { %3346 = vmatpush.msra.mxu0 %v3319_v16 }
 0xaa8   :  { %3347 = vmatpush.msra.mxu0 %v3318_v22 }
 0xaaa   :  { %3348 = vmatpush.msra.mxu0 %v3317_v55 }
 0xaac   :  { %3349 = vmatpush.msra.mxu0 %v3316_v12 }
 0xaae   :  { %3350 = vmatpush.msra.mxu0 %v3315_v13 }
 0xb17   :  { %v3184_v18 = vpop.f32.mrf.mxu0  ;;  %v3204_v49 = vpop.f32.mrf.mxu1 }
 0xb18   :  { %v3247_v36 = vadd.f32 %v3184_v18, %v7358_v44  ;;  %v3248_v47 = vadd.f32 %v3204_v49, %v7361_v32 }
 0xb1a   :  { %v3484_v39 = vmul.f32 -1.442695, %v3247_v36  ;;  %v3485_v1 = vmul.f32 -1.442695, %v3248_v47  ;;  %v7368_v47 = vld [vmem:[#allocation76_spill] sm:$0xff] }
 0xb1c   :  { %3741 = vpow2.f32 %v3484_v39 }
 0xb1d   :  { %3743 = vpow2.f32 %v3485_v1 }
 0xb1e   :  { %v3244_v59 = vpop.f32.mrf.mxu3  ;;  %v3224_v8 = vpop.f32.mrf.mxu2 }
 0xb1f   :  { %v3250_v40 = vadd.f32 %v3244_v59, %v7364_v51  ;;  %v3249_v6 = vadd.f32 %v3224_v8, %v7367_v37 }
 0xb21   :  { %v3486_v48 = vmul.f32 -1.442695, %v3250_v40 }
 0xb22   :  { %v3742_v11 = vpop.eup %3741 }
 0xb23   :  { %v3744_v41 = vpop.eup %3743  ;;  %v3254_v43 = vadd.f32 1.0, %v3742_v11  ;;  %3745 = vpow2.f32 %v3486_v48 }
 0xb24   :  { %v3273_v21 = vadd.f32 1.0, %v3744_v41 }
 0xb25   :  { %3747 = vrcp.f32 %v3254_v43  ;;  %v3266_v33 = vand.u32 2147483648, %v3254_v43  ;;  %v3264_v56 = vand.u32 2147483647, %v3254_v43  ;;  %vm3260_vm6 = vweird.f32 %v3254_v43 }
 0xb26   :  { %3749 = vrcp.f32 %v3273_v21  ;;  %v3285_v5 = vand.u32 2147483648, %v3273_v21  ;;  %v3283_v10 = vand.u32 2147483647, %v3273_v21  ;;  %vm3279_vm3 = vweird.f32 %v3273_v21 }
 0xb27   :  { %v3267_v0 = vor.u32 1.1754944e-38, %v3266_v33  ;;  %vm3265_vm13 = vcmp.eq.f32.partialorder %v3264_v56, 8.507059e+37 }
 0xb28   :  { %v3286_v58 = vor.u32 1.1754944e-38, %v3285_v5  ;;  %vm3284_vm14 = vcmp.eq.f32.partialorder %v3283_v10, 8.507059e+37 }
 0xb29   :  { %v3746_v38 = vpop.eup %3745 }
 0xb2a   :  { %v3293_v42 = vadd.f32 1.0, %v3746_v38 }
 0xb2b   :  { %v3748_v24 = vpop.eup %3747 }
 0xb2c   :  { %v3750_v35 = vpop.eup %3749  ;;  %v3256_v28 = vmul.f32 %v3748_v24, %v3254_v43  ;;  %3751 = vrcp.f32 %v3293_v42  ;;  %vm3261_vm2 = vweird.f32 %v3748_v24  ;;  %v3305_v18 = vand.u32 2147483648, %v3293_v42 }
 0xb2d   :  { %v3275_v60 = vmul.f32 %v3750_v35, %v3273_v21  ;;  %3753 = vtanh.f32 %v3249_v6  ;;  %vm3280_vm4 = vweird.f32 %v3750_v35  ;;  %vm3262_vm11 = vmor %vm3260_vm6, %vm3261_vm2  ;;  %vm3299_vm0 = vweird.f32 %v3293_v42 }
 0xb2e   :  { %v3257_v4 = vsub.f32 1.0, %v3256_v28  ;;  %vm3281_vm12 = vmor %vm3279_vm3, %vm3280_vm4  ;;  %v3303_v49 = vand.u32 2147483647, %v3293_v42  ;;  %v3306_v36 = vor.u32 1.1754944e-38, %v3305_v18 }
 0xb2f   :  { %v3276_v23 = vsub.f32 1.0, %v3275_v60 }
 0xb30   :  { %v3258_v46 = vmul.f32 %v3748_v24, %v3257_v4  ;;  %vm3304_vm8 = vcmp.eq.f32.partialorder %v3303_v49, 8.507059e+37 }
 0xb31   :  { %v3277_v52 = vmul.f32 %v3750_v35, %v3276_v23 }
 0xb32   :  { %v3752_v30 = vpop.eup %3751  ;;  %v3259_v62 = vadd.f32 %v3748_v24, %v3258_v46 }
 0xb33   :  { %v3278_v9 = vadd.f32 %v3750_v35, %v3277_v52  ;;  %v3295_v14 = vmul.f32 %v3752_v30, %v3293_v42  ;;  %v3754_v19 = vpop.eup %3753  ;;  %vm3300_vm15 = vweird.f32 %v3752_v30 }
 0xb34   :  { %v3263_v15 = vsel %vm3262_vm11, %v3748_v24, %v3259_v62  ;;  %vm3301_vm7 = vmor %vm3299_vm0, %vm3300_vm15 }
 0xb35   :  { %v3268_v61 = vsel %vm3265_vm13, %v3267_v0, %v3263_v15  ;;  %v3282_v20 = vsel %vm3281_vm12, %v3750_v35, %v3278_v9  ;;  %v3296_v25 = vsub.f32 1.0, %v3295_v14 }
 0xb36   :  { %v3287_v26 = vsel %vm3284_vm14, %v3286_v58, %v3282_v20  ;;  %v3310_v31 = vmul.f32 %v3754_v19, %v3268_v61 }
 0xb37   :  { %v3309_v27 = vmul.f32 %v3287_v26, %v6446_v54  ;;  %v3297_v29 = vmul.f32 %v3752_v30, %v3296_v25  ;;  %v3500_v54 = vld [vmem:[%s6531_s8] ss:$0 sm:$0xff] }
 0xb39   :  { %v3311_v34 = vadd.f32 %v3310_v31, %v3309_v27  ;;  %v3298_v7 = vadd.f32 %v3752_v30, %v3297_v29 }
 0xb3b   :  { %3755 = vtanh.f32 %v3311_v34  ;;  %v3302_v44 = vsel %vm3301_vm7, %v3752_v30, %v3298_v7 }
 0xb3c   :  { %v3307_v45 = vsel %vm3304_vm8, %v3306_v36, %v3302_v44 }
 0xb41   :  { %v3756_v57 = vpop.eup %3755 }
 0xb42   :  { %v3313_v32 = vmul.f32 %v3756_v57, %v3307_v45 }
 0xb44   :  { %v3314_v39 = vsel %vm133_vm1, %v3313_v32, %v7368_v47 }
 0xb45   :  { %3351 = vmatmul.f32.vlgmr.msra.gmra.mxu0 %v3314_v39 }
 0xbc2   :  { %v3352_v1 = vpop.f32.mrf.mxu0 }
 0xbc3   :  { %v3353_v63 = vadd.f32 %v3500_v54, %v3352_v1 }
 0xbc5   :  { %3356 = vst.msk [vmem:[#allocation10] sm:$0xff] %vm3355_vm9, %v3353_v63 }
 0xbc6   :  { %3367 = dma.vmem_to_hbm [thread:$0]  %s3363_s16, 128, %s3365_s19, [#allocation6]  }
 0xbc7   :  { %3990 = dma.done.wait [#allocation6], 128  }
 0xbc8   :  { %3991 = vsyncadd [#allocation6], 4294967168 }
 0xbc9   :  { %3372 = vsyncpa [#allocation5], 1 }
 0xbca   :  { %3373 = vsyncpa [#allocation8], 1 }
 0xbcb   :  { %3374 = vsyncpa [#allocation6], 1 }

</bundles_post_ra>
